<compile_context>
chip_gen: v7x
topology: tpu7x:2x2x1
jax: 0.10.0
libtpu: 0.0.40
codegen_flags: <defaults>
</compile_context>

<pallas_src>
import functools
import math

import jax
import jax.numpy as jnp
from jax.experimental import pallas as pl
from jax.experimental.pallas import tpu as pltpu


# ---------------------------------------------------------------------------
# Packed per-layer vector row indices (biases + LayerNorm params).
# ---------------------------------------------------------------------------
(E_BQ, E_BK, E_BV, E_BO, E_LN1G, E_LN1B, E_B2, E_LN2G, E_LN2B) = range(9)
N_ENC_VEC = 9

(D_BQS, D_BKS, D_BVS, D_BOS, D_LN1G, D_LN1B,
 D_BQC, D_BKC, D_BVC, D_BOC, D_LN2G, D_LN2B,
 D_B2, D_LN3G, D_LN3B) = range(15)
N_DEC_VEC = 15


# ---------------------------------------------------------------------------
# In-kernel helpers
# ---------------------------------------------------------------------------
def _layernorm(x, g, b, eps=1e-5):
    mean = jnp.mean(x, axis=-1, keepdims=True)
    var = jnp.mean(jnp.square(x - mean), axis=-1, keepdims=True)
    return (x - mean) * jax.lax.rsqrt(var + eps) * g + b


def _softmax_rows(s):
    s = s - jnp.max(s, axis=-1, keepdims=True)
    p = jnp.exp(s)
    return p * pl.reciprocal(jnp.sum(p, axis=-1, keepdims=True), approx=True)


def _mha(q, k, v, *, batch, seq_q, seq_kv, num_head, mask_add=None):
    """Multi-head attention on SSA values.

    q: (B*Sq, D), k/v: (B*Skv, D).  1/sqrt(dh) is already folded into the Q
    projection weights.  Head loop is short & unrolled; each score / PV matmul
    is batched over the batch dimension (single einsum per head, MXU pushes
    back-to-back); the result is one lane-dense (B*Sq, D) value (no per-head
    masked stores).
    """
    d_model = q.shape[-1]
    dh = d_model // num_head
    mask_b = None if mask_add is None else mask_add[None, :, :]
    outs = []
    for h in range(num_head):
        c = h * dh
        qh = q[:, c:c + dh].reshape(batch, seq_q, dh).astype(jnp.bfloat16)
        kh = k[:, c:c + dh].reshape(batch, seq_kv, dh).astype(jnp.bfloat16)
        vh = v[:, c:c + dh].reshape(batch, seq_kv, dh).astype(jnp.bfloat16)
        s = jnp.einsum("bqd,bkd->bqk", qh, kh,
                       preferred_element_type=jnp.float32)
        if mask_b is not None:
            s = s + mask_b
        p = _softmax_rows(s)
        outs.append(jnp.einsum("bqk,bkd->bqd", p.astype(jnp.bfloat16), vh,
                               preferred_element_type=jnp.float32))
    o = jnp.concatenate(outs, axis=-1)            # (B, Sq, D), lane-dense
    return o.reshape(batch * seq_q, d_model)


def _vmem_limit(per_layer_bytes, resident_bytes, live_bytes):
    # Per-layer weight/vector blocks are double-buffered by the pipeline.
    est = 2 * per_layer_bytes + resident_bytes + live_bytes
    # 2x headroom for compiler temporaries; clamp to 64 MiB so the request is
    # legal on every generation (v7x physical VMEM is 64 MiB).
    return int(min(64 << 20, max(32 << 20, 2 * est)))


# ---------------------------------------------------------------------------
# Fused encoder stack kernel: grid = (num_layers,)
# ---------------------------------------------------------------------------
def _encoder_layers_kernel(
    x_ref,
    wqkv_ref, wo_ref, w1_ref, w2_ref, b1_ref, vec_ref,
    o_ref,
    h_scr,
    *, batch, seq, d_model, num_head):
    l = pl.program_id(0)
    D = d_model

    @pl.when(l == 0)
    def _():
        h_scr[...] = x_ref[...]

    x = h_scr[...]                                  # (B*S, D) f32
    vec = vec_ref[...]                              # (N_ENC_VEC, D) f32

    # ---- fused QKV projection (single MXU call) ----
    qkv = jnp.dot(x.astype(jnp.bfloat16), wqkv_ref[...],
                  preferred_element_type=jnp.float32)      # (B*S, 3D)
    q = qkv[:, 0 * D:1 * D] + vec[E_BQ:E_BQ + 1]
    k = qkv[:, 1 * D:2 * D] + vec[E_BK:E_BK + 1]
    v = qkv[:, 2 * D:3 * D] + vec[E_BV:E_BV + 1]

    # ---- multi-head self-attention ----
    attn = _mha(q, k, v, batch=batch, seq_q=seq, seq_kv=seq,
                num_head=num_head, mask_add=None)

    a = jnp.dot(attn.astype(jnp.bfloat16), wo_ref[...],
                preferred_element_type=jnp.float32) + vec[E_BO:E_BO + 1]

    # ---- residual + LayerNorm 1 (fused) ----
    x = _layernorm(x + a, vec[E_LN1G:E_LN1G + 1], vec[E_LN1B:E_LN1B + 1])

    # ---- FFN (two matmuls + ReLU) ----
    hmid = jnp.dot(x.astype(jnp.bfloat16), w1_ref[...],
                   preferred_element_type=jnp.float32) + b1_ref[...]
    hmid = jnp.maximum(hmid, 0.0)
    f = jnp.dot(hmid.astype(jnp.bfloat16), w2_ref[...],
                preferred_element_type=jnp.float32) + vec[E_B2:E_B2 + 1]

    # ---- residual + LayerNorm 2 (fused) ----
    x = _layernorm(x + f, vec[E_LN2G:E_LN2G + 1], vec[E_LN2B:E_LN2B + 1])

    h_scr[...] = x

    @pl.when(l == pl.num_programs(0) - 1)
    def _():
        o_ref[...] = x


def encoder_forward(x, p, num_head):
    B, S, D = x.shape
    BS = B * S
    L = p["wqkv"].shape[0]
    HID = p["w1"].shape[2]

    def _w(l):   # stacked per-layer block
        return (l, 0, 0)

    def _c(l):   # constant (resident) block
        return (0, 0)

    kernel = functools.partial(_encoder_layers_kernel, batch=B, seq=S,
                               d_model=D, num_head=num_head)

    per_layer_bytes = (2 * (3 * D * D + D * D + 2 * D * HID)     # bf16 weights
                       + 4 * (N_ENC_VEC * D + HID))              # f32 vectors
    resident_bytes = 4 * 3 * BS * D                              # x, out, h_scr
    live_bytes = 4 * BS * (3 * D + HID + 2 * D)                  # qkv/ffn temps

    out = pl.pallas_call(
        kernel,
        out_shape=jax.ShapeDtypeStruct((BS, D), jnp.float32),
        grid=(L,),
        in_specs=[
            pl.BlockSpec((BS, D), _c),                       # x
            pl.BlockSpec((None, D, 3 * D), _w),              # wqkv (bf16)
            pl.BlockSpec((None, D, D), _w),                  # wo   (bf16)
            pl.BlockSpec((None, D, HID), _w),                # w1   (bf16)
            pl.BlockSpec((None, HID, D), _w),                # w2   (bf16)
            pl.BlockSpec((None, 1, HID), _w),                # b1   (f32)
            pl.BlockSpec((None, N_ENC_VEC, D), _w),          # packed vectors
        ],
        out_specs=pl.BlockSpec((BS, D), _c),
        scratch_shapes=[
            pltpu.VMEM((BS, D), jnp.float32),                # resident residual
        ],
        compiler_params=pltpu.CompilerParams(
            dimension_semantics=("arbitrary",),
            vmem_limit_bytes=_vmem_limit(per_layer_bytes, resident_bytes,
                                         live_bytes)),
    )(x.reshape(BS, D), p["wqkv"], p["wo"], p["w1"], p["w2"], p["b1"], p["vec"])
    return out.reshape(B, S, D)


# ---------------------------------------------------------------------------
# Fused decoder stack kernel: grid = (num_layers,)
# ---------------------------------------------------------------------------
def _decoder_layers_kernel(
    y_ref, enc_ref, mask_ref,
    wqkv_ref, wos_ref, wqc_ref, wkvc_ref, woc_ref, w1_ref, w2_ref,
    b1_ref, vec_ref,
    o_ref,
    h_scr,
    *, batch, seq_q, seq_kv, d_model, num_head):
    l = pl.program_id(0)
    D = d_model

    @pl.when(l == 0)
    def _():
        h_scr[...] = y_ref[...]

    y = h_scr[...]                                  # (B*Sq, D) f32
    vec = vec_ref[...]                              # (N_DEC_VEC, D) f32
    mask_add = mask_ref[...]                        # (Sq, Sq) additive mask

    # ---- masked self-attention (fused QKV projection) ----
    qkv = jnp.dot(y.astype(jnp.bfloat16), wqkv_ref[...],
                  preferred_element_type=jnp.float32)
    q = qkv[:, 0 * D:1 * D] + vec[D_BQS:D_BQS + 1]
    k = qkv[:, 1 * D:2 * D] + vec[D_BKS:D_BKS + 1]
    v = qkv[:, 2 * D:3 * D] + vec[D_BVS:D_BVS + 1]
    attn = _mha(q, k, v, batch=batch, seq_q=seq_q, seq_kv=seq_q,
                num_head=num_head, mask_add=mask_add)
    a = jnp.dot(attn.astype(jnp.bfloat16), wos_ref[...],
                preferred_element_type=jnp.float32) + vec[D_BOS:D_BOS + 1]
    y = _layernorm(y + a, vec[D_LN1G:D_LN1G + 1], vec[D_LN1B:D_LN1B + 1])

    # ---- cross-attention: Q from decoder, fused K/V from encoder output ----
    qc = jnp.dot(y.astype(jnp.bfloat16), wqc_ref[...],
                 preferred_element_type=jnp.float32) + vec[D_BQC:D_BQC + 1]
    kv = jnp.dot(enc_ref[...].astype(jnp.bfloat16), wkvc_ref[...],
                 preferred_element_type=jnp.float32)
    kc = kv[:, 0 * D:1 * D] + vec[D_BKC:D_BKC + 1]
    vc = kv[:, 1 * D:2 * D] + vec[D_BVC:D_BVC + 1]
    attn = _mha(qc, kc, vc, batch=batch, seq_q=seq_q, seq_kv=seq_kv,
                num_head=num_head, mask_add=None)
    c = jnp.dot(attn.astype(jnp.bfloat16), woc_ref[...],
                preferred_element_type=jnp.float32) + vec[D_BOC:D_BOC + 1]
    y = _layernorm(y + c, vec[D_LN2G:D_LN2G + 1], vec[D_LN2B:D_LN2B + 1])

    # ---- FFN ----
    hmid = jnp.dot(y.astype(jnp.bfloat16), w1_ref[...],
                   preferred_element_type=jnp.float32) + b1_ref[...]
    hmid = jnp.maximum(hmid, 0.0)
    f = jnp.dot(hmid.astype(jnp.bfloat16), w2_ref[...],
                preferred_element_type=jnp.float32) + vec[D_B2:D_B2 + 1]
    y = _layernorm(y + f, vec[D_LN3G:D_LN3G + 1], vec[D_LN3B:D_LN3B + 1])

    h_scr[...] = y

    @pl.when(l == pl.num_programs(0) - 1)
    def _():
        o_ref[...] = y


def decoder_forward(enc_out, y, mask_add, p, num_head):
    B, Sq, D = y.shape
    Skv = enc_out.shape[1]
    BSq, BSkv = B * Sq, B * Skv
    L = p["wqkv_s"].shape[0]
    HID = p["w1"].shape[2]

    def _w(l):
        return (l, 0, 0)

    def _c(l):
        return (0, 0)

    kernel = functools.partial(_decoder_layers_kernel, batch=B, seq_q=Sq,
                               seq_kv=Skv, d_model=D, num_head=num_head)

    per_layer_bytes = (2 * (8 * D * D + 2 * D * HID)             # bf16 weights
                       + 4 * (N_DEC_VEC * D + HID))              # f32 vectors
    resident_bytes = 4 * (3 * BSq * D + BSkv * D + Sq * Sq)      # y,out,h,enc,mask
    live_bytes = 4 * (BSq * (3 * D + HID + 2 * D) + BSkv * 2 * D)

    out = pl.pallas_call(
        kernel,
        out_shape=jax.ShapeDtypeStruct((BSq, D), jnp.float32),
        grid=(L,),
        in_specs=[
            pl.BlockSpec((BSq, D), _c),                      # y
            pl.BlockSpec((BSkv, D), _c),                     # encoder output
            pl.BlockSpec((Sq, Sq), _c),                      # additive mask
            pl.BlockSpec((None, D, 3 * D), _w),              # self-attn wqkv
            pl.BlockSpec((None, D, D), _w),                  # self-attn wo
            pl.BlockSpec((None, D, D), _w),                  # cross-attn wq
            pl.BlockSpec((None, D, 2 * D), _w),              # cross-attn wkv
            pl.BlockSpec((None, D, D), _w),                  # cross-attn wo
            pl.BlockSpec((None, D, HID), _w),                # w1
            pl.BlockSpec((None, HID, D), _w),                # w2
            pl.BlockSpec((None, 1, HID), _w),                # b1
            pl.BlockSpec((None, N_DEC_VEC, D), _w),          # packed vectors
        ],
        out_specs=pl.BlockSpec((BSq, D), _c),
        scratch_shapes=[
            pltpu.VMEM((BSq, D), jnp.float32),               # resident residual
        ],
        compiler_params=pltpu.CompilerParams(
            dimension_semantics=("arbitrary",),
            vmem_limit_bytes=_vmem_limit(per_layer_bytes, resident_bytes,
                                         live_bytes)),
    )(y.reshape(BSq, D), enc_out.reshape(BSkv, D), mask_add,
      p["wqkv_s"], p["wo_s"], p["wq_c"], p["wkv_c"], p["wo_c"],
      p["w1"], p["w2"], p["b1"], p["vec"])
    return out.reshape(B, Sq, D)


# ---------------------------------------------------------------------------
# Model glue
# ---------------------------------------------------------------------------
def pos_embed(seq_len, d_model):
    pos = jnp.arange(seq_len, dtype=jnp.float32)[:, None]
    i = jnp.arange(d_model)[None, :]
    angle = pos / jnp.power(10000.0,
                            (2.0 * (i // 2).astype(jnp.float32)) / d_model)
    return jnp.where(i % 2 == 0, jnp.sin(angle), jnp.cos(angle)).astype(jnp.float32)


def transformer_forward(params, x, y, mask, num_head):
    b, s, d = x.shape
    # Positional embedding is added only to x, matching the reference forward.
    x = x + pos_embed(s, d)[None]

    enc_out = encoder_forward(x, params["encoder"], num_head)

    # mask: (S, S), 1 = attend, 0 = blocked  ->  additive mask (no B*H copy)
    mask_add = (1.0 - mask.astype(jnp.float32)) * -1e9

    return decoder_forward(enc_out, y, mask_add, params["decoder"], num_head)


# ---------------------------------------------------------------------------
# Deterministic parameter initialization.
# Weights are stacked over layers and stored in bf16; 1/sqrt(dh) is folded
# into the Q projection weights (the Q bias rows are zero, so no bias fold is
# needed here; fold it too if loading trained weights).
# ---------------------------------------------------------------------------
def init_params(key, d_model, hidden_dim, num_layers, num_head):
    D, HID, L = d_model, hidden_dim, num_layers
    dh = D // num_head
    q_scale = 1.0 / math.sqrt(dh)
    keys = iter(jax.random.split(key, 16))

    def w(shape):
        return jax.random.normal(next(keys), shape, jnp.float32) * 0.02

    # ----- encoder -----
    wqkv = w((L, D, 3 * D))
    wqkv = wqkv.at[:, :, :D].multiply(q_scale)          # fold 1/sqrt(dh) into Q
    enc_vec = jnp.zeros((L, N_ENC_VEC, D), jnp.float32)
    enc_vec = enc_vec.at[:, E_LN1G].set(1.0).at[:, E_LN2G].set(1.0)
    enc = dict(
        wqkv=wqkv.astype(jnp.bfloat16),
        wo=w((L, D, D)).astype(jnp.bfloat16),
        w1=w((L, D, HID)).astype(jnp.bfloat16),
        w2=w((L, HID, D)).astype(jnp.bfloat16),
        b1=jnp.zeros((L, 1, HID), jnp.float32),
        vec=enc_vec,
    )

    # ----- decoder -----
    wqkv_s = w((L, D, 3 * D))
    wqkv_s = wqkv_s.at[:, :, :D].multiply(q_scale)
    wq_c = w((L, D, D)) * q_scale
    dec_vec = jnp.zeros((L, N_DEC_VEC, D), jnp.float32)
    dec_vec = (dec_vec.at[:, D_LN1G].set(1.0)
                      .at[:, D_LN2G].set(1.0)
                      .at[:, D_LN3G].set(1.0))
    dec = dict(
        wqkv_s=wqkv_s.astype(jnp.bfloat16),
        wo_s=w((L, D, D)).astype(jnp.bfloat16),
        wq_c=wq_c.astype(jnp.bfloat16),
        wkv_c=w((L, D, 2 * D)).astype(jnp.bfloat16),
        wo_c=w((L, D, D)).astype(jnp.bfloat16),
        w1=w((L, D, HID)).astype(jnp.bfloat16),
        w2=w((L, HID, D)).astype(jnp.bfloat16),
        b1=jnp.zeros((L, 1, HID), jnp.float32),
        vec=dec_vec,
    )
    return dict(encoder=enc, decoder=dec)


# ---------------------------------------------------------------------------
if __name__ == "__main__":
    B, S, D, HID, H, L = 2, 8, 32, 64, 4, 2

    key = jax.random.PRNGKey(0)
    kx, ky, kp = jax.random.split(key, 3)
    x = jax.random.normal(kx, (B, S, D), jnp.float32)
    y = jax.random.normal(ky, (B, S, D), jnp.float32)
    mask = jnp.tril(jnp.ones((S, S), jnp.float32))  # causal mask, 1 = attend

    params = init_params(kp, D, HID, L, H)

    fwd = jax.jit(functools.partial(transformer_forward, num_head=H))
    out = fwd(params, x, y, mask)
    jax.block_until_ready(out)

    assert out.shape == (B, S, D), out.shape
    assert bool(jnp.all(jnp.isfinite(out)))
    print("KERNEL_OK")
</pallas_src>

<mosaic_0001>
module attributes {stable_mosaic.version = 11 : i64} {
  func.func @_encoder_layers_kernel(%arg0: i32, %arg1: memref<16x32xf32, #tpu.memory_space<vmem>>, %arg2: memref<1x32x96xbf16, #tpu.memory_space<vmem>>, %arg3: memref<1x32x32xbf16, #tpu.memory_space<vmem>>, %arg4: memref<1x32x64xbf16, #tpu.memory_space<vmem>>, %arg5: memref<1x64x32xbf16, #tpu.memory_space<vmem>>, %arg6: memref<1x1x64xf32, #tpu.memory_space<vmem>>, %arg7: memref<1x9x32xf32, #tpu.memory_space<vmem>>, %arg8: memref<16x32xf32, #tpu.memory_space<vmem>>, %arg9: memref<16x32xf32, #tpu.memory_space<vmem>>) attributes {dimension_semantics = [#tpu.dimension_semantics<arbitrary>], iteration_bounds = array<i64: 2>, scalar_prefetch = 0 : i64, scratch_operands = 1 : i64, tpu.core_type = #tpu.core_type<tc>, window_params = [{pipeline_mode = #tpu.pipeline_mode<synchronous>, transform_indices = @transform_0, window_bounds = array<i64: 16, 32>}, {transform_indices = @transform_1, window_bounds = array<i64: 1, 32, 96>}, {transform_indices = @transform_2, window_bounds = array<i64: 1, 32, 32>}, {transform_indices = @transform_3, window_bounds = array<i64: 1, 32, 64>}, {transform_indices = @transform_4, window_bounds = array<i64: 1, 64, 32>}, {transform_indices = @transform_5, window_bounds = array<i64: 1, 1, 64>}, {transform_indices = @transform_6, window_bounds = array<i64: 1, 9, 32>}, {pipeline_mode = #tpu.pipeline_mode<synchronous>, transform_indices = @transform_7, window_bounds = array<i64: 16, 32>}]} {
    %c0_i32 = arith.constant 0 : i32
    %0 = arith.cmpi eq, %arg0, %c0_i32 : i32
    %1 = arith.extui %0 : i1 to i32
    %c0_i32_0 = arith.constant 0 : i32
    %2 = arith.cmpi ne, %1, %c0_i32_0 : i32
    scf.if %2 {
      %c0_53 = arith.constant 0 : index
      %c0_54 = arith.constant 0 : index
      %190 = vector.load %arg1[%c0_53, %c0_54] : memref<16x32xf32, #tpu.memory_space<vmem>>, vector<16x32xf32>
      %c0_55 = arith.constant 0 : index
      %c0_56 = arith.constant 0 : index
      %191 = vector.load %arg9[%c0_55, %c0_56] : memref<16x32xf32, #tpu.memory_space<vmem>>, vector<16x32xf32>
      tpu.vector_store %arg9[%c0_55, %c0_56], %190 {strides = array<i32>} : memref<16x32xf32, #tpu.memory_space<vmem>>, vector<16x32xf32>,
    } else {
    }
    %c0 = arith.constant 0 : index
    %c0_1 = arith.constant 0 : index
    %3 = vector.load %arg9[%c0, %c0_1] : memref<16x32xf32, #tpu.memory_space<vmem>>, vector<16x32xf32>
    %c0_2 = arith.constant 0 : index
    %c0_3 = arith.constant 0 : index
    %c0_4 = arith.constant 0 : index
    %4 = vector.load %arg7[%c0_2, %c0_3, %c0_4] : memref<1x9x32xf32, #tpu.memory_space<vmem>>, vector<1x9x32xf32>
    %5 = vector.shape_cast %4 : vector<1x9x32xf32> to vector<9x32xf32>
    %6 = arith.truncf %3 : vector<16x32xf32> to vector<16x32xbf16>
    %c0_5 = arith.constant 0 : index
    %c0_6 = arith.constant 0 : index
    %c0_7 = arith.constant 0 : index
    %7 = vector.load %arg2[%c0_5, %c0_6, %c0_7] : memref<1x32x96xbf16, #tpu.memory_space<vmem>>, vector<1x32x96xbf16>
    %8 = vector.shape_cast %7 : vector<1x32x96xbf16> to vector<32x96xbf16>
    %cst = arith.constant dense<0.000000e+00> : vector<16x96xf32>
    %9 = tpu.matmul %6, %8, %cst {dimension_numbers = #tpu.dot_dimension_numbers<[1], [0], [0], [1], [0, 0, 1, 1], [], []>} : vector<16x32xbf16>, vector<32x96xbf16>, vector<16x96xf32> -> vector<16x96xf32>
    %10 = vector.extract_strided_slice %9 {offsets = [0, 0], sizes = [16, 32], strides = [1, 1]} : vector<16x96xf32> to vector<16x32xf32>
    %11 = vector.extract_strided_slice %5 {offsets = [0, 0], sizes = [1, 32], strides = [1, 1]} : vector<9x32xf32> to vector<1x32xf32>
    %12 = vector.broadcast %11 : vector<1x32xf32> to vector<16x32xf32>
    %13 = arith.addf %10, %12 : vector<16x32xf32>
    %14 = vector.extract_strided_slice %9 {offsets = [0, 32], sizes = [16, 32], strides = [1, 1]} : vector<16x96xf32> to vector<16x32xf32>
    %15 = vector.extract_strided_slice %5 {offsets = [1, 0], sizes = [1, 32], strides = [1, 1]} : vector<9x32xf32> to vector<1x32xf32>
    %16 = vector.broadcast %15 : vector<1x32xf32> to vector<16x32xf32>
    %17 = arith.addf %14, %16 : vector<16x32xf32>
    %18 = vector.extract_strided_slice %9 {offsets = [0, 64], sizes = [16, 32], strides = [1, 1]} : vector<16x96xf32> to vector<16x32xf32>
    %19 = vector.extract_strided_slice %5 {offsets = [2, 0], sizes = [1, 32], strides = [1, 1]} : vector<9x32xf32> to vector<1x32xf32>
    %20 = vector.broadcast %19 : vector<1x32xf32> to vector<16x32xf32>
    %21 = arith.addf %18, %20 : vector<16x32xf32>
    %22 = vector.extract_strided_slice %13 {offsets = [0, 0], sizes = [16, 8], strides = [1, 1]} : vector<16x32xf32> to vector<16x8xf32>
    %23 = vector.shape_cast %22 : vector<16x8xf32> to vector<2x8x8xf32>
    %24 = arith.truncf %23 : vector<2x8x8xf32> to vector<2x8x8xbf16>
    %25 = vector.extract_strided_slice %17 {offsets = [0, 0], sizes = [16, 8], strides = [1, 1]} : vector<16x32xf32> to vector<16x8xf32>
    %26 = vector.shape_cast %25 : vector<16x8xf32> to vector<2x8x8xf32>
    %27 = arith.truncf %26 : vector<2x8x8xf32> to vector<2x8x8xbf16>
    %28 = vector.extract_strided_slice %21 {offsets = [0, 0], sizes = [16, 8], strides = [1, 1]} : vector<16x32xf32> to vector<16x8xf32>
    %29 = vector.shape_cast %28 : vector<16x8xf32> to vector<2x8x8xf32>
    %30 = arith.truncf %29 : vector<2x8x8xf32> to vector<2x8x8xbf16>
    "tpu.trace_start"() <{level = 10 : i32, message = "bqd,bkd->bqk"}> : () -> ()
    %cst_8 = arith.constant dense<0.000000e+00> : vector<2x8x8xf32>
    %31 = tpu.matmul %24, %27, %cst_8 {dimension_numbers = #tpu.dot_dimension_numbers<[2], [2], [1], [1], [0, 0, 0, 1, 1, 1], [0], [0]>} : vector<2x8x8xbf16>, vector<2x8x8xbf16>, vector<2x8x8xf32> -> vector<2x8x8xf32>
    "tpu.trace_stop"() : () -> ()
    %cst_9 = arith.constant dense<0xFF800000> : vector<2x8xf32>
    %32 = vector.multi_reduction <maximumf>, %31, %cst_9 [2] : vector<2x8x8xf32> to vector<2x8xf32>
    %33 = vector.shape_cast %32 : vector<2x8xf32> to vector<2x8x1xf32>
    %34 = vector.broadcast %33 : vector<2x8x1xf32> to vector<2x8x8xf32>
    %35 = arith.subf %31, %34 : vector<2x8x8xf32>
    %36 = math.exp %35 : vector<2x8x8xf32>
    %cst_10 = arith.constant dense<0.000000e+00> : vector<2x8xf32>
    %37 = vector.multi_reduction <add>, %36, %cst_10 [2] : vector<2x8x8xf32> to vector<2x8xf32>
    %38 = vector.shape_cast %37 : vector<2x8xf32> to vector<2x8x1xf32>
    %39 = tpu.reciprocal %38 {approx = true} : vector<2x8x1xf32> -> vector<2x8x1xf32>
    %40 = vector.broadcast %39 : vector<2x8x1xf32> to vector<2x8x8xf32>
    %41 = arith.mulf %36, %40 : vector<2x8x8xf32>
    %42 = arith.truncf %41 : vector<2x8x8xf32> to vector<2x8x8xbf16>
    "tpu.trace_start"() <{level = 10 : i32, message = "bqk,bkd->bqd"}> : () -> ()
    %cst_11 = arith.constant dense<0.000000e+00> : vector<2x8x8xf32>
    %43 = tpu.matmul %42, %30, %cst_11 {dimension_numbers = #tpu.dot_dimension_numbers<[2], [1], [1], [2], [0, 0, 0, 1, 1, 2], [0], [0]>} : vector<2x8x8xbf16>, vector<2x8x8xbf16>, vector<2x8x8xf32> -> vector<2x8x8xf32>
    "tpu.trace_stop"() : () -> ()
    %44 = vector.extract_strided_slice %13 {offsets = [0, 8], sizes = [16, 8], strides = [1, 1]} : vector<16x32xf32> to vector<16x8xf32>
    %45 = vector.shape_cast %44 : vector<16x8xf32> to vector<2x8x8xf32>
    %46 = arith.truncf %45 : vector<2x8x8xf32> to vector<2x8x8xbf16>
    %47 = vector.extract_strided_slice %17 {offsets = [0, 8], sizes = [16, 8], strides = [1, 1]} : vector<16x32xf32> to vector<16x8xf32>
    %48 = vector.shape_cast %47 : vector<16x8xf32> to vector<2x8x8xf32>
    %49 = arith.truncf %48 : vector<2x8x8xf32> to vector<2x8x8xbf16>
    %50 = vector.extract_strided_slice %21 {offsets = [0, 8], sizes = [16, 8], strides = [1, 1]} : vector<16x32xf32> to vector<16x8xf32>
    %51 = vector.shape_cast %50 : vector<16x8xf32> to vector<2x8x8xf32>
    %52 = arith.truncf %51 : vector<2x8x8xf32> to vector<2x8x8xbf16>
    "tpu.trace_start"() <{level = 10 : i32, message = "bqd,bkd->bqk"}> : () -> ()
    %cst_12 = arith.constant dense<0.000000e+00> : vector<2x8x8xf32>
    %53 = tpu.matmul %46, %49, %cst_12 {dimension_numbers = #tpu.dot_dimension_numbers<[2], [2], [1], [1], [0, 0, 0, 1, 1, 1], [0], [0]>} : vector<2x8x8xbf16>, vector<2x8x8xbf16>, vector<2x8x8xf32> -> vector<2x8x8xf32>
    "tpu.trace_stop"() : () -> ()
    %cst_13 = arith.constant dense<0xFF800000> : vector<2x8xf32>
    %54 = vector.multi_reduction <maximumf>, %53, %cst_13 [2] : vector<2x8x8xf32> to vector<2x8xf32>
    %55 = vector.shape_cast %54 : vector<2x8xf32> to vector<2x8x1xf32>
    %56 = vector.broadcast %55 : vector<2x8x1xf32> to vector<2x8x8xf32>
    %57 = arith.subf %53, %56 : vector<2x8x8xf32>
    %58 = math.exp %57 : vector<2x8x8xf32>
    %cst_14 = arith.constant dense<0.000000e+00> : vector<2x8xf32>
    %59 = vector.multi_reduction <add>, %58, %cst_14 [2] : vector<2x8x8xf32> to vector<2x8xf32>
    %60 = vector.shape_cast %59 : vector<2x8xf32> to vector<2x8x1xf32>
    %61 = tpu.reciprocal %60 {approx = true} : vector<2x8x1xf32> -> vector<2x8x1xf32>
    %62 = vector.broadcast %61 : vector<2x8x1xf32> to vector<2x8x8xf32>
    %63 = arith.mulf %58, %62 : vector<2x8x8xf32>
    %64 = arith.truncf %63 : vector<2x8x8xf32> to vector<2x8x8xbf16>
    "tpu.trace_start"() <{level = 10 : i32, message = "bqk,bkd->bqd"}> : () -> ()
    %cst_15 = arith.constant dense<0.000000e+00> : vector<2x8x8xf32>
    %65 = tpu.matmul %64, %52, %cst_15 {dimension_numbers = #tpu.dot_dimension_numbers<[2], [1], [1], [2], [0, 0, 0, 1, 1, 2], [0], [0]>} : vector<2x8x8xbf16>, vector<2x8x8xbf16>, vector<2x8x8xf32> -> vector<2x8x8xf32>
    "tpu.trace_stop"() : () -> ()
    %66 = vector.extract_strided_slice %13 {offsets = [0, 16], sizes = [16, 8], strides = [1, 1]} : vector<16x32xf32> to vector<16x8xf32>
    %67 = vector.shape_cast %66 : vector<16x8xf32> to vector<2x8x8xf32>
    %68 = arith.truncf %67 : vector<2x8x8xf32> to vector<2x8x8xbf16>
    %69 = vector.extract_strided_slice %17 {offsets = [0, 16], sizes = [16, 8], strides = [1, 1]} : vector<16x32xf32> to vector<16x8xf32>
    %70 = vector.shape_cast %69 : vector<16x8xf32> to vector<2x8x8xf32>
    %71 = arith.truncf %70 : vector<2x8x8xf32> to vector<2x8x8xbf16>
    %72 = vector.extract_strided_slice %21 {offsets = [0, 16], sizes = [16, 8], strides = [1, 1]} : vector<16x32xf32> to vector<16x8xf32>
    %73 = vector.shape_cast %72 : vector<16x8xf32> to vector<2x8x8xf32>
    %74 = arith.truncf %73 : vector<2x8x8xf32> to vector<2x8x8xbf16>
    "tpu.trace_start"() <{level = 10 : i32, message = "bqd,bkd->bqk"}> : () -> ()
    %cst_16 = arith.constant dense<0.000000e+00> : vector<2x8x8xf32>
    %75 = tpu.matmul %68, %71, %cst_16 {dimension_numbers = #tpu.dot_dimension_numbers<[2], [2], [1], [1], [0, 0, 0, 1, 1, 1], [0], [0]>} : vector<2x8x8xbf16>, vector<2x8x8xbf16>, vector<2x8x8xf32> -> vector<2x8x8xf32>
    "tpu.trace_stop"() : () -> ()
    %cst_17 = arith.constant dense<0xFF800000> : vector<2x8xf32>
    %76 = vector.multi_reduction <maximumf>, %75, %cst_17 [2] : vector<2x8x8xf32> to vector<2x8xf32>
    %77 = vector.shape_cast %76 : vector<2x8xf32> to vector<2x8x1xf32>
    %78 = vector.broadcast %77 : vector<2x8x1xf32> to vector<2x8x8xf32>
    %79 = arith.subf %75, %78 : vector<2x8x8xf32>
    %80 = math.exp %79 : vector<2x8x8xf32>
    %cst_18 = arith.constant dense<0.000000e+00> : vector<2x8xf32>
    %81 = vector.multi_reduction <add>, %80, %cst_18 [2] : vector<2x8x8xf32> to vector<2x8xf32>
    %82 = vector.shape_cast %81 : vector<2x8xf32> to vector<2x8x1xf32>
    %83 = tpu.reciprocal %82 {approx = true} : vector<2x8x1xf32> -> vector<2x8x1xf32>
    %84 = vector.broadcast %83 : vector<2x8x1xf32> to vector<2x8x8xf32>
    %85 = arith.mulf %80, %84 : vector<2x8x8xf32>
    %86 = arith.truncf %85 : vector<2x8x8xf32> to vector<2x8x8xbf16>
    "tpu.trace_start"() <{level = 10 : i32, message = "bqk,bkd->bqd"}> : () -> ()
    %cst_19 = arith.constant dense<0.000000e+00> : vector<2x8x8xf32>
    %87 = tpu.matmul %86, %74, %cst_19 {dimension_numbers = #tpu.dot_dimension_numbers<[2], [1], [1], [2], [0, 0, 0, 1, 1, 2], [0], [0]>} : vector<2x8x8xbf16>, vector<2x8x8xbf16>, vector<2x8x8xf32> -> vector<2x8x8xf32>
    "tpu.trace_stop"() : () -> ()
    %88 = vector.extract_strided_slice %13 {offsets = [0, 24], sizes = [16, 8], strides = [1, 1]} : vector<16x32xf32> to vector<16x8xf32>
    %89 = vector.shape_cast %88 : vector<16x8xf32> to vector<2x8x8xf32>
    %90 = arith.truncf %89 : vector<2x8x8xf32> to vector<2x8x8xbf16>
    %91 = vector.extract_strided_slice %17 {offsets = [0, 24], sizes = [16, 8], strides = [1, 1]} : vector<16x32xf32> to vector<16x8xf32>
    %92 = vector.shape_cast %91 : vector<16x8xf32> to vector<2x8x8xf32>
    %93 = arith.truncf %92 : vector<2x8x8xf32> to vector<2x8x8xbf16>
    %94 = vector.extract_strided_slice %21 {offsets = [0, 24], sizes = [16, 8], strides = [1, 1]} : vector<16x32xf32> to vector<16x8xf32>
    %95 = vector.shape_cast %94 : vector<16x8xf32> to vector<2x8x8xf32>
    %96 = arith.truncf %95 : vector<2x8x8xf32> to vector<2x8x8xbf16>
    "tpu.trace_start"() <{level = 10 : i32, message = "bqd,bkd->bqk"}> : () -> ()
    %cst_20 = arith.constant dense<0.000000e+00> : vector<2x8x8xf32>
    %97 = tpu.matmul %90, %93, %cst_20 {dimension_numbers = #tpu.dot_dimension_numbers<[2], [2], [1], [1], [0, 0, 0, 1, 1, 1], [0], [0]>} : vector<2x8x8xbf16>, vector<2x8x8xbf16>, vector<2x8x8xf32> -> vector<2x8x8xf32>
    "tpu.trace_stop"() : () -> ()
    %cst_21 = arith.constant dense<0xFF800000> : vector<2x8xf32>
    %98 = vector.multi_reduction <maximumf>, %97, %cst_21 [2] : vector<2x8x8xf32> to vector<2x8xf32>
    %99 = vector.shape_cast %98 : vector<2x8xf32> to vector<2x8x1xf32>
    %100 = vector.broadcast %99 : vector<2x8x1xf32> to vector<2x8x8xf32>
    %101 = arith.subf %97, %100 : vector<2x8x8xf32>
    %102 = math.exp %101 : vector<2x8x8xf32>
    %cst_22 = arith.constant dense<0.000000e+00> : vector<2x8xf32>
    %103 = vector.multi_reduction <add>, %102, %cst_22 [2] : vector<2x8x8xf32> to vector<2x8xf32>
    %104 = vector.shape_cast %103 : vector<2x8xf32> to vector<2x8x1xf32>
    %105 = tpu.reciprocal %104 {approx = true} : vector<2x8x1xf32> -> vector<2x8x1xf32>
    %106 = vector.broadcast %105 : vector<2x8x1xf32> to vector<2x8x8xf32>
    %107 = arith.mulf %102, %106 : vector<2x8x8xf32>
    %108 = arith.truncf %107 : vector<2x8x8xf32> to vector<2x8x8xbf16>
    "tpu.trace_start"() <{level = 10 : i32, message = "bqk,bkd->bqd"}> : () -> ()
    %cst_23 = arith.constant dense<0.000000e+00> : vector<2x8x8xf32>
    %109 = tpu.matmul %108, %96, %cst_23 {dimension_numbers = #tpu.dot_dimension_numbers<[2], [1], [1], [2], [0, 0, 0, 1, 1, 2], [0], [0]>} : vector<2x8x8xbf16>, vector<2x8x8xbf16>, vector<2x8x8xf32> -> vector<2x8x8xf32>
    "tpu.trace_stop"() : () -> ()
    %110 = tpu.concatenate %43, %65, %87, %109 in 2 : vector<2x8x8xf32>, vector<2x8x8xf32>, vector<2x8x8xf32>, vector<2x8x8xf32> -> vector<2x8x32xf32>
    %111 = vector.shape_cast %110 : vector<2x8x32xf32> to vector<16x32xf32>
    %112 = arith.truncf %111 : vector<16x32xf32> to vector<16x32xbf16>
    %c0_24 = arith.constant 0 : index
    %c0_25 = arith.constant 0 : index
    %c0_26 = arith.constant 0 : index
    %113 = vector.load %arg3[%c0_24, %c0_25, %c0_26] : memref<1x32x32xbf16, #tpu.memory_space<vmem>>, vector<1x32x32xbf16>
    %114 = vector.shape_cast %113 : vector<1x32x32xbf16> to vector<32x32xbf16>
    %cst_27 = arith.constant dense<0.000000e+00> : vector<16x32xf32>
    %115 = tpu.matmul %112, %114, %cst_27 {dimension_numbers = #tpu.dot_dimension_numbers<[1], [0], [0], [1], [0, 0, 1, 1], [], []>} : vector<16x32xbf16>, vector<32x32xbf16>, vector<16x32xf32> -> vector<16x32xf32>
    %116 = vector.extract_strided_slice %5 {offsets = [3, 0], sizes = [1, 32], strides = [1, 1]} : vector<9x32xf32> to vector<1x32xf32>
    %117 = vector.broadcast %116 : vector<1x32xf32> to vector<16x32xf32>
    %118 = arith.addf %115, %117 : vector<16x32xf32>
    %119 = arith.addf %3, %118 : vector<16x32xf32>
    %120 = vector.extract_strided_slice %5 {offsets = [4, 0], sizes = [1, 32], strides = [1, 1]} : vector<9x32xf32> to vector<1x32xf32>
    %121 = vector.extract_strided_slice %5 {offsets = [5, 0], sizes = [1, 32], strides = [1, 1]} : vector<9x32xf32> to vector<1x32xf32>
    %cst_28 = arith.constant dense<0.000000e+00> : vector<16xf32>
    %122 = vector.multi_reduction <add>, %119, %cst_28 [1] : vector<16x32xf32> to vector<16xf32>
    %123 = vector.shape_cast %122 : vector<16xf32> to vector<16x1xf32>
    %cst_29 = arith.constant 3.200000e+01 : f32
    %124 = vector.broadcast %cst_29 : f32 to vector<16x1xf32>
    %125 = arith.divf %123, %124 : vector<16x1xf32>
    %126 = vector.broadcast %125 : vector<16x1xf32> to vector<16x32xf32>
    %127 = arith.subf %119, %126 : vector<16x32xf32>
    %128 = arith.mulf %127, %127 : vector<16x32xf32>
    %cst_30 = arith.constant dense<0.000000e+00> : vector<16xf32>
    %129 = vector.multi_reduction <add>, %128, %cst_30 [1] : vector<16x32xf32> to vector<16xf32>
    %130 = vector.shape_cast %129 : vector<16xf32> to vector<16x1xf32>
    %cst_31 = arith.constant 3.200000e+01 : f32
    %131 = vector.broadcast %cst_31 : f32 to vector<16x1xf32>
    %132 = arith.divf %130, %131 : vector<16x1xf32>
    %133 = vector.broadcast %125 : vector<16x1xf32> to vector<16x32xf32>
    %134 = arith.subf %119, %133 : vector<16x32xf32>
    %cst_32 = arith.constant 9.99999974E-6 : f32
    %135 = vector.broadcast %cst_32 : f32 to vector<16x1xf32>
    %136 = arith.addf %132, %135 : vector<16x1xf32>
    %137 = math.rsqrt %136 : vector<16x1xf32>
    %138 = vector.broadcast %137 : vector<16x1xf32> to vector<16x32xf32>
    %139 = arith.mulf %134, %138 : vector<16x32xf32>
    %140 = vector.broadcast %120 : vector<1x32xf32> to vector<16x32xf32>
    %141 = arith.mulf %139, %140 : vector<16x32xf32>
    %142 = vector.broadcast %121 : vector<1x32xf32> to vector<16x32xf32>
    %143 = arith.addf %141, %142 : vector<16x32xf32>
    %144 = arith.truncf %143 : vector<16x32xf32> to vector<16x32xbf16>
    %c0_33 = arith.constant 0 : index
    %c0_34 = arith.constant 0 : index
    %c0_35 = arith.constant 0 : index
    %145 = vector.load %arg4[%c0_33, %c0_34, %c0_35] : memref<1x32x64xbf16, #tpu.memory_space<vmem>>, vector<1x32x64xbf16>
    %146 = vector.shape_cast %145 : vector<1x32x64xbf16> to vector<32x64xbf16>
    %cst_36 = arith.constant dense<0.000000e+00> : vector<16x64xf32>
    %147 = tpu.matmul %144, %146, %cst_36 {dimension_numbers = #tpu.dot_dimension_numbers<[1], [0], [0], [1], [0, 0, 1, 1], [], []>} : vector<16x32xbf16>, vector<32x64xbf16>, vector<16x64xf32> -> vector<16x64xf32>
    %c0_37 = arith.constant 0 : index
    %c0_38 = arith.constant 0 : index
    %c0_39 = arith.constant 0 : index
    %148 = vector.load %arg6[%c0_37, %c0_38, %c0_39] : memref<1x1x64xf32, #tpu.memory_space<vmem>>, vector<1x1x64xf32>
    %149 = vector.shape_cast %148 : vector<1x1x64xf32> to vector<1x64xf32>
    %150 = vector.broadcast %149 : vector<1x64xf32> to vector<16x64xf32>
    %151 = arith.addf %147, %150 : vector<16x64xf32>
    %cst_40 = arith.constant 0.000000e+00 : f32
    %152 = vector.broadcast %cst_40 : f32 to vector<16x64xf32>
    %153 = arith.maximumf %151, %152 : vector<16x64xf32>
    %154 = arith.truncf %153 : vector<16x64xf32> to vector<16x64xbf16>
    %c0_41 = arith.constant 0 : index
    %c0_42 = arith.constant 0 : index
    %c0_43 = arith.constant 0 : index
    %155 = vector.load %arg5[%c0_41, %c0_42, %c0_43] : memref<1x64x32xbf16, #tpu.memory_space<vmem>>, vector<1x64x32xbf16>
    %156 = vector.shape_cast %155 : vector<1x64x32xbf16> to vector<64x32xbf16>
    %cst_44 = arith.constant dense<0.000000e+00> : vector<16x32xf32>
    %157 = tpu.matmul %154, %156, %cst_44 {dimension_numbers = #tpu.dot_dimension_numbers<[1], [0], [0], [1], [0, 0, 1, 1], [], []>} : vector<16x64xbf16>, vector<64x32xbf16>, vector<16x32xf32> -> vector<16x32xf32>
    %158 = vector.extract_strided_slice %5 {offsets = [6, 0], sizes = [1, 32], strides = [1, 1]} : vector<9x32xf32> to vector<1x32xf32>
    %159 = vector.broadcast %158 : vector<1x32xf32> to vector<16x32xf32>
    %160 = arith.addf %157, %159 : vector<16x32xf32>
    %161 = arith.addf %143, %160 : vector<16x32xf32>
    %162 = vector.extract_strided_slice %5 {offsets = [7, 0], sizes = [1, 32], strides = [1, 1]} : vector<9x32xf32> to vector<1x32xf32>
    %163 = vector.extract_strided_slice %5 {offsets = [8, 0], sizes = [1, 32], strides = [1, 1]} : vector<9x32xf32> to vector<1x32xf32>
    %cst_45 = arith.constant dense<0.000000e+00> : vector<16xf32>
    %164 = vector.multi_reduction <add>, %161, %cst_45 [1] : vector<16x32xf32> to vector<16xf32>
    %165 = vector.shape_cast %164 : vector<16xf32> to vector<16x1xf32>
    %cst_46 = arith.constant 3.200000e+01 : f32
    %166 = vector.broadcast %cst_46 : f32 to vector<16x1xf32>
    %167 = arith.divf %165, %166 : vector<16x1xf32>
    %168 = vector.broadcast %167 : vector<16x1xf32> to vector<16x32xf32>
    %169 = arith.subf %161, %168 : vector<16x32xf32>
    %170 = arith.mulf %169, %169 : vector<16x32xf32>
    %cst_47 = arith.constant dense<0.000000e+00> : vector<16xf32>
    %171 = vector.multi_reduction <add>, %170, %cst_47 [1] : vector<16x32xf32> to vector<16xf32>
    %172 = vector.shape_cast %171 : vector<16xf32> to vector<16x1xf32>
    %cst_48 = arith.constant 3.200000e+01 : f32
    %173 = vector.broadcast %cst_48 : f32 to vector<16x1xf32>
    %174 = arith.divf %172, %173 : vector<16x1xf32>
    %175 = vector.broadcast %167 : vector<16x1xf32> to vector<16x32xf32>
    %176 = arith.subf %161, %175 : vector<16x32xf32>
    %cst_49 = arith.constant 9.99999974E-6 : f32
    %177 = vector.broadcast %cst_49 : f32 to vector<16x1xf32>
    %178 = arith.addf %174, %177 : vector<16x1xf32>
    %179 = math.rsqrt %178 : vector<16x1xf32>
    %180 = vector.broadcast %179 : vector<16x1xf32> to vector<16x32xf32>
    %181 = arith.mulf %176, %180 : vector<16x32xf32>
    %182 = vector.broadcast %162 : vector<1x32xf32> to vector<16x32xf32>
    %183 = arith.mulf %181, %182 : vector<16x32xf32>
    %184 = vector.broadcast %163 : vector<1x32xf32> to vector<16x32xf32>
    %185 = arith.addf %183, %184 : vector<16x32xf32>
    %c0_50 = arith.constant 0 : index
    %c0_51 = arith.constant 0 : index
    %186 = vector.load %arg9[%c0_50, %c0_51] : memref<16x32xf32, #tpu.memory_space<vmem>>, vector<16x32xf32>
    tpu.vector_store %arg9[%c0_50, %c0_51], %185 {strides = array<i32>} : memref<16x32xf32, #tpu.memory_space<vmem>>, vector<16x32xf32>,
    %c1_i32 = arith.constant 1 : i32
    %187 = arith.cmpi eq, %arg0, %c1_i32 : i32
    %188 = arith.extui %187 : i1 to i32
    %c0_i32_52 = arith.constant 0 : i32
    %189 = arith.cmpi ne, %188, %c0_i32_52 : i32
    scf.if %189 {
      %c0_53 = arith.constant 0 : index
      %c0_54 = arith.constant 0 : index
      %190 = vector.load %arg8[%c0_53, %c0_54] : memref<16x32xf32, #tpu.memory_space<vmem>>, vector<16x32xf32>
      tpu.vector_store %arg8[%c0_53, %c0_54], %185 {strides = array<i32>} : memref<16x32xf32, #tpu.memory_space<vmem>>, vector<16x32xf32>,
    } else {
    }
    return
  }
  func.func @transform_0(%arg0: i32) -> (i32, i32) {
    %c0_i32 = arith.constant 0 : i32
    %c0_i32_0 = arith.constant 0 : i32
    %c0_i32_1 = arith.constant 0 : i32
    return %c0_i32, %c0_i32_0 : i32, i32
  }
  func.func @transform_1(%arg0: i32) -> (i32, i32, i32) {
    %c0_i32 = arith.constant 0 : i32
    %c0_i32_0 = arith.constant 0 : i32
    %c0_i32_1 = arith.constant 0 : i32
    return %arg0, %c0_i32, %c0_i32_0 : i32, i32, i32
  }
  func.func @transform_2(%arg0: i32) -> (i32, i32, i32) {
    %c0_i32 = arith.constant 0 : i32
    %c0_i32_0 = arith.constant 0 : i32
    %c0_i32_1 = arith.constant 0 : i32
    return %arg0, %c0_i32, %c0_i32_0 : i32, i32, i32
  }
  func.func @transform_3(%arg0: i32) -> (i32, i32, i32) {
    %c0_i32 = arith.constant 0 : i32
    %c0_i32_0 = arith.constant 0 : i32
    %c0_i32_1 = arith.constant 0 : i32
    return %arg0, %c0_i32, %c0_i32_0 : i32, i32, i32
  }
  func.func @transform_4(%arg0: i32) -> (i32, i32, i32) {
    %c0_i32 = arith.constant 0 : i32
    %c0_i32_0 = arith.constant 0 : i32
    %c0_i32_1 = arith.constant 0 : i32
    return %arg0, %c0_i32, %c0_i32_0 : i32, i32, i32
  }
  func.func @transform_5(%arg0: i32) -> (i32, i32, i32) {
    %c0_i32 = arith.constant 0 : i32
    %c0_i32_0 = arith.constant 0 : i32
    %c0_i32_1 = arith.constant 0 : i32
    return %arg0, %c0_i32, %c0_i32_0 : i32, i32, i32
  }
  func.func @transform_6(%arg0: i32) -> (i32, i32, i32) {
    %c0_i32 = arith.constant 0 : i32
    %c0_i32_0 = arith.constant 0 : i32
    %c0_i32_1 = arith.constant 0 : i32
    return %arg0, %c0_i32, %c0_i32_0 : i32, i32, i32
  }
  func.func @transform_7(%arg0: i32) -> (i32, i32) {
    %c0_i32 = arith.constant 0 : i32
    %c0_i32_0 = arith.constant 0 : i32
    %c0_i32_1 = arith.constant 0 : i32
    return %c0_i32, %c0_i32_0 : i32, i32
  }
}

module attributes {stable_mosaic.version = 11 : i64} {
  func.func @_decoder_layers_kernel(%arg0: i32, %arg1: memref<16x32xf32, #tpu.memory_space<vmem>>, %arg2: memref<16x32xf32, #tpu.memory_space<vmem>>, %arg3: memref<8x8xf32, #tpu.memory_space<vmem>>, %arg4: memref<1x32x96xbf16, #tpu.memory_space<vmem>>, %arg5: memref<1x32x32xbf16, #tpu.memory_space<vmem>>, %arg6: memref<1x32x32xbf16, #tpu.memory_space<vmem>>, %arg7: memref<1x32x64xbf16, #tpu.memory_space<vmem>>, %arg8: memref<1x32x32xbf16, #tpu.memory_space<vmem>>, %arg9: memref<1x32x64xbf16, #tpu.memory_space<vmem>>, %arg10: memref<1x64x32xbf16, #tpu.memory_space<vmem>>, %arg11: memref<1x1x64xf32, #tpu.memory_space<vmem>>, %arg12: memref<1x15x32xf32, #tpu.memory_space<vmem>>, %arg13: memref<16x32xf32, #tpu.memory_space<vmem>>, %arg14: memref<16x32xf32, #tpu.memory_space<vmem>>) attributes {dimension_semantics = [#tpu.dimension_semantics<arbitrary>], iteration_bounds = array<i64: 2>, scalar_prefetch = 0 : i64, scratch_operands = 1 : i64, tpu.core_type = #tpu.core_type<tc>, window_params = [{pipeline_mode = #tpu.pipeline_mode<synchronous>, transform_indices = @transform_0, window_bounds = array<i64: 16, 32>}, {pipeline_mode = #tpu.pipeline_mode<synchronous>, transform_indices = @transform_1, window_bounds = array<i64: 16, 32>}, {pipeline_mode = #tpu.pipeline_mode<synchronous>, transform_indices = @transform_2, window_bounds = array<i64: 8, 8>}, {transform_indices = @transform_3, window_bounds = array<i64: 1, 32, 96>}, {transform_indices = @transform_4, window_bounds = array<i64: 1, 32, 32>}, {transform_indices = @transform_5, window_bounds = array<i64: 1, 32, 32>}, {transform_indices = @transform_6, window_bounds = array<i64: 1, 32, 64>}, {transform_indices = @transform_7, window_bounds = array<i64: 1, 32, 32>}, {transform_indices = @transform_8, window_bounds = array<i64: 1, 32, 64>}, {transform_indices = @transform_9, window_bounds = array<i64: 1, 64, 32>}, {transform_indices = @transform_10, window_bounds = array<i64: 1, 1, 64>}, {transform_indices = @transform_11, window_bounds = array<i64: 1, 15, 32>}, {pipeline_mode = #tpu.pipeline_mode<synchronous>, transform_indices = @transform_12, window_bounds = array<i64: 16, 32>}]} {
    %c0_i32 = arith.constant 0 : i32
    %0 = arith.cmpi eq, %arg0, %c0_i32 : i32
    %1 = arith.extui %0 : i1 to i32
    %c0_i32_0 = arith.constant 0 : i32
    %2 = arith.cmpi ne, %1, %c0_i32_0 : i32
    scf.if %2 {
      %c0_90 = arith.constant 0 : index
      %c0_91 = arith.constant 0 : index
      %342 = vector.load %arg1[%c0_90, %c0_91] : memref<16x32xf32, #tpu.memory_space<vmem>>, vector<16x32xf32>
      %c0_92 = arith.constant 0 : index
      %c0_93 = arith.constant 0 : index
      %343 = vector.load %arg14[%c0_92, %c0_93] : memref<16x32xf32, #tpu.memory_space<vmem>>, vector<16x32xf32>
      tpu.vector_store %arg14[%c0_92, %c0_93], %342 {strides = array<i32>} : memref<16x32xf32, #tpu.memory_space<vmem>>, vector<16x32xf32>,
    } else {
    }
    %c0 = arith.constant 0 : index
    %c0_1 = arith.constant 0 : index
    %3 = vector.load %arg14[%c0, %c0_1] : memref<16x32xf32, #tpu.memory_space<vmem>>, vector<16x32xf32>
    %c0_2 = arith.constant 0 : index
    %c0_3 = arith.constant 0 : index
    %c0_4 = arith.constant 0 : index
    %4 = vector.load %arg12[%c0_2, %c0_3, %c0_4] : memref<1x15x32xf32, #tpu.memory_space<vmem>>, vector<1x15x32xf32>
    %5 = vector.shape_cast %4 : vector<1x15x32xf32> to vector<15x32xf32>
    %c0_5 = arith.constant 0 : index
    %c0_6 = arith.constant 0 : index
    %6 = vector.load %arg3[%c0_5, %c0_6] : memref<8x8xf32, #tpu.memory_space<vmem>>, vector<8x8xf32>
    %7 = arith.truncf %3 : vector<16x32xf32> to vector<16x32xbf16>
    %c0_7 = arith.constant 0 : index
    %c0_8 = arith.constant 0 : index
    %c0_9 = arith.constant 0 : index
    %8 = vector.load %arg4[%c0_7, %c0_8, %c0_9] : memref<1x32x96xbf16, #tpu.memory_space<vmem>>, vector<1x32x96xbf16>
    %9 = vector.shape_cast %8 : vector<1x32x96xbf16> to vector<32x96xbf16>
    %cst = arith.constant dense<0.000000e+00> : vector<16x96xf32>
    %10 = tpu.matmul %7, %9, %cst {dimension_numbers = #tpu.dot_dimension_numbers<[1], [0], [0], [1], [0, 0, 1, 1], [], []>} : vector<16x32xbf16>, vector<32x96xbf16>, vector<16x96xf32> -> vector<16x96xf32>
    %11 = vector.extract_strided_slice %10 {offsets = [0, 0], sizes = [16, 32], strides = [1, 1]} : vector<16x96xf32> to vector<16x32xf32>
    %12 = vector.extract_strided_slice %5 {offsets = [0, 0], sizes = [1, 32], strides = [1, 1]} : vector<15x32xf32> to vector<1x32xf32>
    %13 = vector.broadcast %12 : vector<1x32xf32> to vector<16x32xf32>
    %14 = arith.addf %11, %13 : vector<16x32xf32>
    %15 = vector.extract_strided_slice %10 {offsets = [0, 32], sizes = [16, 32], strides = [1, 1]} : vector<16x96xf32> to vector<16x32xf32>
    %16 = vector.extract_strided_slice %5 {offsets = [1, 0], sizes = [1, 32], strides = [1, 1]} : vector<15x32xf32> to vector<1x32xf32>
    %17 = vector.broadcast %16 : vector<1x32xf32> to vector<16x32xf32>
    %18 = arith.addf %15, %17 : vector<16x32xf32>
    %19 = vector.extract_strided_slice %10 {offsets = [0, 64], sizes = [16, 32], strides = [1, 1]} : vector<16x96xf32> to vector<16x32xf32>
    %20 = vector.extract_strided_slice %5 {offsets = [2, 0], sizes = [1, 32], strides = [1, 1]} : vector<15x32xf32> to vector<1x32xf32>
    %21 = vector.broadcast %20 : vector<1x32xf32> to vector<16x32xf32>
    %22 = arith.addf %19, %21 : vector<16x32xf32>
    %23 = vector.shape_cast %6 : vector<8x8xf32> to vector<1x8x8xf32>
    %24 = vector.extract_strided_slice %14 {offsets = [0, 0], sizes = [16, 8], strides = [1, 1]} : vector<16x32xf32> to vector<16x8xf32>
    %25 = vector.shape_cast %24 : vector<16x8xf32> to vector<2x8x8xf32>
    %26 = arith.truncf %25 : vector<2x8x8xf32> to vector<2x8x8xbf16>
    %27 = vector.extract_strided_slice %18 {offsets = [0, 0], sizes = [16, 8], strides = [1, 1]} : vector<16x32xf32> to vector<16x8xf32>
    %28 = vector.shape_cast %27 : vector<16x8xf32> to vector<2x8x8xf32>
    %29 = arith.truncf %28 : vector<2x8x8xf32> to vector<2x8x8xbf16>
    %30 = vector.extract_strided_slice %22 {offsets = [0, 0], sizes = [16, 8], strides = [1, 1]} : vector<16x32xf32> to vector<16x8xf32>
    %31 = vector.shape_cast %30 : vector<16x8xf32> to vector<2x8x8xf32>
    %32 = arith.truncf %31 : vector<2x8x8xf32> to vector<2x8x8xbf16>
    "tpu.trace_start"() <{level = 10 : i32, message = "bqd,bkd->bqk"}> : () -> ()
    %cst_10 = arith.constant dense<0.000000e+00> : vector<2x8x8xf32>
    %33 = tpu.matmul %26, %29, %cst_10 {dimension_numbers = #tpu.dot_dimension_numbers<[2], [2], [1], [1], [0, 0, 0, 1, 1, 1], [0], [0]>} : vector<2x8x8xbf16>, vector<2x8x8xbf16>, vector<2x8x8xf32> -> vector<2x8x8xf32>
    "tpu.trace_stop"() : () -> ()
    %34 = vector.broadcast %23 : vector<1x8x8xf32> to vector<2x8x8xf32>
    %35 = arith.addf %33, %34 : vector<2x8x8xf32>
    %cst_11 = arith.constant dense<0xFF800000> : vector<2x8xf32>
    %36 = vector.multi_reduction <maximumf>, %35, %cst_11 [2] : vector<2x8x8xf32> to vector<2x8xf32>
    %37 = vector.shape_cast %36 : vector<2x8xf32> to vector<2x8x1xf32>
    %38 = vector.broadcast %37 : vector<2x8x1xf32> to vector<2x8x8xf32>
    %39 = arith.subf %35, %38 : vector<2x8x8xf32>
    %40 = math.exp %39 : vector<2x8x8xf32>
    %cst_12 = arith.constant dense<0.000000e+00> : vector<2x8xf32>
    %41 = vector.multi_reduction <add>, %40, %cst_12 [2] : vector<2x8x8xf32> to vector<2x8xf32>
    %42 = vector.shape_cast %41 : vector<2x8xf32> to vector<2x8x1xf32>
    %43 = tpu.reciprocal %42 {approx = true} : vector<2x8x1xf32> -> vector<2x8x1xf32>
    %44 = vector.broadcast %43 : vector<2x8x1xf32> to vector<2x8x8xf32>
    %45 = arith.mulf %40, %44 : vector<2x8x8xf32>
    %46 = arith.truncf %45 : vector<2x8x8xf32> to vector<2x8x8xbf16>
    "tpu.trace_start"() <{level = 10 : i32, message = "bqk,bkd->bqd"}> : () -> ()
    %cst_13 = arith.constant dense<0.000000e+00> : vector<2x8x8xf32>
    %47 = tpu.matmul %46, %32, %cst_13 {dimension_numbers = #tpu.dot_dimension_numbers<[2], [1], [1], [2], [0, 0, 0, 1, 1, 2], [0], [0]>} : vector<2x8x8xbf16>, vector<2x8x8xbf16>, vector<2x8x8xf32> -> vector<2x8x8xf32>
    "tpu.trace_stop"() : () -> ()
    %48 = vector.extract_strided_slice %14 {offsets = [0, 8], sizes = [16, 8], strides = [1, 1]} : vector<16x32xf32> to vector<16x8xf32>
    %49 = vector.shape_cast %48 : vector<16x8xf32> to vector<2x8x8xf32>
    %50 = arith.truncf %49 : vector<2x8x8xf32> to vector<2x8x8xbf16>
    %51 = vector.extract_strided_slice %18 {offsets = [0, 8], sizes = [16, 8], strides = [1, 1]} : vector<16x32xf32> to vector<16x8xf32>
    %52 = vector.shape_cast %51 : vector<16x8xf32> to vector<2x8x8xf32>
    %53 = arith.truncf %52 : vector<2x8x8xf32> to vector<2x8x8xbf16>
    %54 = vector.extract_strided_slice %22 {offsets = [0, 8], sizes = [16, 8], strides = [1, 1]} : vector<16x32xf32> to vector<16x8xf32>
    %55 = vector.shape_cast %54 : vector<16x8xf32> to vector<2x8x8xf32>
    %56 = arith.truncf %55 : vector<2x8x8xf32> to vector<2x8x8xbf16>
    "tpu.trace_start"() <{level = 10 : i32, message = "bqd,bkd->bqk"}> : () -> ()
    %cst_14 = arith.constant dense<0.000000e+00> : vector<2x8x8xf32>
    %57 = tpu.matmul %50, %53, %cst_14 {dimension_numbers = #tpu.dot_dimension_numbers<[2], [2], [1], [1], [0, 0, 0, 1, 1, 1], [0], [0]>} : vector<2x8x8xbf16>, vector<2x8x8xbf16>, vector<2x8x8xf32> -> vector<2x8x8xf32>
    "tpu.trace_stop"() : () -> ()
    %58 = vector.broadcast %23 : vector<1x8x8xf32> to vector<2x8x8xf32>
    %59 = arith.addf %57, %58 : vector<2x8x8xf32>
    %cst_15 = arith.constant dense<0xFF800000> : vector<2x8xf32>
    %60 = vector.multi_reduction <maximumf>, %59, %cst_15 [2] : vector<2x8x8xf32> to vector<2x8xf32>
    %61 = vector.shape_cast %60 : vector<2x8xf32> to vector<2x8x1xf32>
    %62 = vector.broadcast %61 : vector<2x8x1xf32> to vector<2x8x8xf32>
    %63 = arith.subf %59, %62 : vector<2x8x8xf32>
    %64 = math.exp %63 : vector<2x8x8xf32>
    %cst_16 = arith.constant dense<0.000000e+00> : vector<2x8xf32>
    %65 = vector.multi_reduction <add>, %64, %cst_16 [2] : vector<2x8x8xf32> to vector<2x8xf32>
    %66 = vector.shape_cast %65 : vector<2x8xf32> to vector<2x8x1xf32>
    %67 = tpu.reciprocal %66 {approx = true} : vector<2x8x1xf32> -> vector<2x8x1xf32>
    %68 = vector.broadcast %67 : vector<2x8x1xf32> to vector<2x8x8xf32>
    %69 = arith.mulf %64, %68 : vector<2x8x8xf32>
    %70 = arith.truncf %69 : vector<2x8x8xf32> to vector<2x8x8xbf16>
    "tpu.trace_start"() <{level = 10 : i32, message = "bqk,bkd->bqd"}> : () -> ()
    %cst_17 = arith.constant dense<0.000000e+00> : vector<2x8x8xf32>
    %71 = tpu.matmul %70, %56, %cst_17 {dimension_numbers = #tpu.dot_dimension_numbers<[2], [1], [1], [2], [0, 0, 0, 1, 1, 2], [0], [0]>} : vector<2x8x8xbf16>, vector<2x8x8xbf16>, vector<2x8x8xf32> -> vector<2x8x8xf32>
    "tpu.trace_stop"() : () -> ()
    %72 = vector.extract_strided_slice %14 {offsets = [0, 16], sizes = [16, 8], strides = [1, 1]} : vector<16x32xf32> to vector<16x8xf32>
    %73 = vector.shape_cast %72 : vector<16x8xf32> to vector<2x8x8xf32>
    %74 = arith.truncf %73 : vector<2x8x8xf32> to vector<2x8x8xbf16>
    %75 = vector.extract_strided_slice %18 {offsets = [0, 16], sizes = [16, 8], strides = [1, 1]} : vector<16x32xf32> to vector<16x8xf32>
    %76 = vector.shape_cast %75 : vector<16x8xf32> to vector<2x8x8xf32>
    %77 = arith.truncf %76 : vector<2x8x8xf32> to vector<2x8x8xbf16>
    %78 = vector.extract_strided_slice %22 {offsets = [0, 16], sizes = [16, 8], strides = [1, 1]} : vector<16x32xf32> to vector<16x8xf32>
    %79 = vector.shape_cast %78 : vector<16x8xf32> to vector<2x8x8xf32>
    %80 = arith.truncf %79 : vector<2x8x8xf32> to vector<2x8x8xbf16>
    "tpu.trace_start"() <{level = 10 : i32, message = "bqd,bkd->bqk"}> : () -> ()
    %cst_18 = arith.constant dense<0.000000e+00> : vector<2x8x8xf32>
    %81 = tpu.matmul %74, %77, %cst_18 {dimension_numbers = #tpu.dot_dimension_numbers<[2], [2], [1], [1], [0, 0, 0, 1, 1, 1], [0], [0]>} : vector<2x8x8xbf16>, vector<2x8x8xbf16>, vector<2x8x8xf32> -> vector<2x8x8xf32>
    "tpu.trace_stop"() : () -> ()
    %82 = vector.broadcast %23 : vector<1x8x8xf32> to vector<2x8x8xf32>
    %83 = arith.addf %81, %82 : vector<2x8x8xf32>
    %cst_19 = arith.constant dense<0xFF800000> : vector<2x8xf32>
    %84 = vector.multi_reduction <maximumf>, %83, %cst_19 [2] : vector<2x8x8xf32> to vector<2x8xf32>
    %85 = vector.shape_cast %84 : vector<2x8xf32> to vector<2x8x1xf32>
    %86 = vector.broadcast %85 : vector<2x8x1xf32> to vector<2x8x8xf32>
    %87 = arith.subf %83, %86 : vector<2x8x8xf32>
    %88 = math.exp %87 : vector<2x8x8xf32>
    %cst_20 = arith.constant dense<0.000000e+00> : vector<2x8xf32>
    %89 = vector.multi_reduction <add>, %88, %cst_20 [2] : vector<2x8x8xf32> to vector<2x8xf32>
    %90 = vector.shape_cast %89 : vector<2x8xf32> to vector<2x8x1xf32>
    %91 = tpu.reciprocal %90 {approx = true} : vector<2x8x1xf32> -> vector<2x8x1xf32>
    %92 = vector.broadcast %91 : vector<2x8x1xf32> to vector<2x8x8xf32>
    %93 = arith.mulf %88, %92 : vector<2x8x8xf32>
    %94 = arith.truncf %93 : vector<2x8x8xf32> to vector<2x8x8xbf16>
    "tpu.trace_start"() <{level = 10 : i32, message = "bqk,bkd->bqd"}> : () -> ()
    %cst_21 = arith.constant dense<0.000000e+00> : vector<2x8x8xf32>
    %95 = tpu.matmul %94, %80, %cst_21 {dimension_numbers = #tpu.dot_dimension_numbers<[2], [1], [1], [2], [0, 0, 0, 1, 1, 2], [0], [0]>} : vector<2x8x8xbf16>, vector<2x8x8xbf16>, vector<2x8x8xf32> -> vector<2x8x8xf32>
    "tpu.trace_stop"() : () -> ()
    %96 = vector.extract_strided_slice %14 {offsets = [0, 24], sizes = [16, 8], strides = [1, 1]} : vector<16x32xf32> to vector<16x8xf32>
    %97 = vector.shape_cast %96 : vector<16x8xf32> to vector<2x8x8xf32>
    %98 = arith.truncf %97 : vector<2x8x8xf32> to vector<2x8x8xbf16>
    %99 = vector.extract_strided_slice %18 {offsets = [0, 24], sizes = [16, 8], strides = [1, 1]} : vector<16x32xf32> to vector<16x8xf32>
    %100 = vector.shape_cast %99 : vector<16x8xf32> to vector<2x8x8xf32>
    %101 = arith.truncf %100 : vector<2x8x8xf32> to vector<2x8x8xbf16>
    %102 = vector.extract_strided_slice %22 {offsets = [0, 24], sizes = [16, 8], strides = [1, 1]} : vector<16x32xf32> to vector<16x8xf32>
    %103 = vector.shape_cast %102 : vector<16x8xf32> to vector<2x8x8xf32>
    %104 = arith.truncf %103 : vector<2x8x8xf32> to vector<2x8x8xbf16>
    "tpu.trace_start"() <{level = 10 : i32, message = "bqd,bkd->bqk"}> : () -> ()
    %cst_22 = arith.constant dense<0.000000e+00> : vector<2x8x8xf32>
    %105 = tpu.matmul %98, %101, %cst_22 {dimension_numbers = #tpu.dot_dimension_numbers<[2], [2], [1], [1], [0, 0, 0, 1, 1, 1], [0], [0]>} : vector<2x8x8xbf16>, vector<2x8x8xbf16>, vector<2x8x8xf32> -> vector<2x8x8xf32>
    "tpu.trace_stop"() : () -> ()
    %106 = vector.broadcast %23 : vector<1x8x8xf32> to vector<2x8x8xf32>
    %107 = arith.addf %105, %106 : vector<2x8x8xf32>
    %cst_23 = arith.constant dense<0xFF800000> : vector<2x8xf32>
    %108 = vector.multi_reduction <maximumf>, %107, %cst_23 [2] : vector<2x8x8xf32> to vector<2x8xf32>
    %109 = vector.shape_cast %108 : vector<2x8xf32> to vector<2x8x1xf32>
    %110 = vector.broadcast %109 : vector<2x8x1xf32> to vector<2x8x8xf32>
    %111 = arith.subf %107, %110 : vector<2x8x8xf32>
    %112 = math.exp %111 : vector<2x8x8xf32>
    %cst_24 = arith.constant dense<0.000000e+00> : vector<2x8xf32>
    %113 = vector.multi_reduction <add>, %112, %cst_24 [2] : vector<2x8x8xf32> to vector<2x8xf32>
    %114 = vector.shape_cast %113 : vector<2x8xf32> to vector<2x8x1xf32>
    %115 = tpu.reciprocal %114 {approx = true} : vector<2x8x1xf32> -> vector<2x8x1xf32>
    %116 = vector.broadcast %115 : vector<2x8x1xf32> to vector<2x8x8xf32>
    %117 = arith.mulf %112, %116 : vector<2x8x8xf32>
    %118 = arith.truncf %117 : vector<2x8x8xf32> to vector<2x8x8xbf16>
    "tpu.trace_start"() <{level = 10 : i32, message = "bqk,bkd->bqd"}> : () -> ()
    %cst_25 = arith.constant dense<0.000000e+00> : vector<2x8x8xf32>
    %119 = tpu.matmul %118, %104, %cst_25 {dimension_numbers = #tpu.dot_dimension_numbers<[2], [1], [1], [2], [0, 0, 0, 1, 1, 2], [0], [0]>} : vector<2x8x8xbf16>, vector<2x8x8xbf16>, vector<2x8x8xf32> -> vector<2x8x8xf32>
    "tpu.trace_stop"() : () -> ()
    %120 = tpu.concatenate %47, %71, %95, %119 in 2 : vector<2x8x8xf32>, vector<2x8x8xf32>, vector<2x8x8xf32>, vector<2x8x8xf32> -> vector<2x8x32xf32>
    %121 = vector.shape_cast %120 : vector<2x8x32xf32> to vector<16x32xf32>
    %122 = arith.truncf %121 : vector<16x32xf32> to vector<16x32xbf16>
    %c0_26 = arith.constant 0 : index
    %c0_27 = arith.constant 0 : index
    %c0_28 = arith.constant 0 : index
    %123 = vector.load %arg5[%c0_26, %c0_27, %c0_28] : memref<1x32x32xbf16, #tpu.memory_space<vmem>>, vector<1x32x32xbf16>
    %124 = vector.shape_cast %123 : vector<1x32x32xbf16> to vector<32x32xbf16>
    %cst_29 = arith.constant dense<0.000000e+00> : vector<16x32xf32>
    %125 = tpu.matmul %122, %124, %cst_29 {dimension_numbers = #tpu.dot_dimension_numbers<[1], [0], [0], [1], [0, 0, 1, 1], [], []>} : vector<16x32xbf16>, vector<32x32xbf16>, vector<16x32xf32> -> vector<16x32xf32>
    %126 = vector.extract_strided_slice %5 {offsets = [3, 0], sizes = [1, 32], strides = [1, 1]} : vector<15x32xf32> to vector<1x32xf32>
    %127 = vector.broadcast %126 : vector<1x32xf32> to vector<16x32xf32>
    %128 = arith.addf %125, %127 : vector<16x32xf32>
    %129 = arith.addf %3, %128 : vector<16x32xf32>
    %130 = vector.extract_strided_slice %5 {offsets = [4, 0], sizes = [1, 32], strides = [1, 1]} : vector<15x32xf32> to vector<1x32xf32>
    %131 = vector.extract_strided_slice %5 {offsets = [5, 0], sizes = [1, 32], strides = [1, 1]} : vector<15x32xf32> to vector<1x32xf32>
    %cst_30 = arith.constant dense<0.000000e+00> : vector<16xf32>
    %132 = vector.multi_reduction <add>, %129, %cst_30 [1] : vector<16x32xf32> to vector<16xf32>
    %133 = vector.shape_cast %132 : vector<16xf32> to vector<16x1xf32>
    %cst_31 = arith.constant 3.200000e+01 : f32
    %134 = vector.broadcast %cst_31 : f32 to vector<16x1xf32>
    %135 = arith.divf %133, %134 : vector<16x1xf32>
    %136 = vector.broadcast %135 : vector<16x1xf32> to vector<16x32xf32>
    %137 = arith.subf %129, %136 : vector<16x32xf32>
    %138 = arith.mulf %137, %137 : vector<16x32xf32>
    %cst_32 = arith.constant dense<0.000000e+00> : vector<16xf32>
    %139 = vector.multi_reduction <add>, %138, %cst_32 [1] : vector<16x32xf32> to vector<16xf32>
    %140 = vector.shape_cast %139 : vector<16xf32> to vector<16x1xf32>
    %cst_33 = arith.constant 3.200000e+01 : f32
    %141 = vector.broadcast %cst_33 : f32 to vector<16x1xf32>
    %142 = arith.divf %140, %141 : vector<16x1xf32>
    %143 = vector.broadcast %135 : vector<16x1xf32> to vector<16x32xf32>
    %144 = arith.subf %129, %143 : vector<16x32xf32>
    %cst_34 = arith.constant 9.99999974E-6 : f32
    %145 = vector.broadcast %cst_34 : f32 to vector<16x1xf32>
    %146 = arith.addf %142, %145 : vector<16x1xf32>
    %147 = math.rsqrt %146 : vector<16x1xf32>
    %148 = vector.broadcast %147 : vector<16x1xf32> to vector<16x32xf32>
    %149 = arith.mulf %144, %148 : vector<16x32xf32>
    %150 = vector.broadcast %130 : vector<1x32xf32> to vector<16x32xf32>
    %151 = arith.mulf %149, %150 : vector<16x32xf32>
    %152 = vector.broadcast %131 : vector<1x32xf32> to vector<16x32xf32>
    %153 = arith.addf %151, %152 : vector<16x32xf32>
    %154 = arith.truncf %153 : vector<16x32xf32> to vector<16x32xbf16>
    %c0_35 = arith.constant 0 : index
    %c0_36 = arith.constant 0 : index
    %c0_37 = arith.constant 0 : index
    %155 = vector.load %arg6[%c0_35, %c0_36, %c0_37] : memref<1x32x32xbf16, #tpu.memory_space<vmem>>, vector<1x32x32xbf16>
    %156 = vector.shape_cast %155 : vector<1x32x32xbf16> to vector<32x32xbf16>
    %cst_38 = arith.constant dense<0.000000e+00> : vector<16x32xf32>
    %157 = tpu.matmul %154, %156, %cst_38 {dimension_numbers = #tpu.dot_dimension_numbers<[1], [0], [0], [1], [0, 0, 1, 1], [], []>} : vector<16x32xbf16>, vector<32x32xbf16>, vector<16x32xf32> -> vector<16x32xf32>
    %158 = vector.extract_strided_slice %5 {offsets = [6, 0], sizes = [1, 32], strides = [1, 1]} : vector<15x32xf32> to vector<1x32xf32>
    %159 = vector.broadcast %158 : vector<1x32xf32> to vector<16x32xf32>
    %160 = arith.addf %157, %159 : vector<16x32xf32>
    %c0_39 = arith.constant 0 : index
    %c0_40 = arith.constant 0 : index
    %161 = vector.load %arg2[%c0_39, %c0_40] : memref<16x32xf32, #tpu.memory_space<vmem>>, vector<16x32xf32>
    %162 = arith.truncf %161 : vector<16x32xf32> to vector<16x32xbf16>
    %c0_41 = arith.constant 0 : index
    %c0_42 = arith.constant 0 : index
    %c0_43 = arith.constant 0 : index
    %163 = vector.load %arg7[%c0_41, %c0_42, %c0_43] : memref<1x32x64xbf16, #tpu.memory_space<vmem>>, vector<1x32x64xbf16>
    %164 = vector.shape_cast %163 : vector<1x32x64xbf16> to vector<32x64xbf16>
    %cst_44 = arith.constant dense<0.000000e+00> : vector<16x64xf32>
    %165 = tpu.matmul %162, %164, %cst_44 {dimension_numbers = #tpu.dot_dimension_numbers<[1], [0], [0], [1], [0, 0, 1, 1], [], []>} : vector<16x32xbf16>, vector<32x64xbf16>, vector<16x64xf32> -> vector<16x64xf32>
    %166 = vector.extract_strided_slice %165 {offsets = [0, 0], sizes = [16, 32], strides = [1, 1]} : vector<16x64xf32> to vector<16x32xf32>
    %167 = vector.extract_strided_slice %5 {offsets = [7, 0], sizes = [1, 32], strides = [1, 1]} : vector<15x32xf32> to vector<1x32xf32>
    %168 = vector.broadcast %167 : vector<1x32xf32> to vector<16x32xf32>
    %169 = arith.addf %166, %168 : vector<16x32xf32>
    %170 = vector.extract_strided_slice %165 {offsets = [0, 32], sizes = [16, 32], strides = [1, 1]} : vector<16x64xf32> to vector<16x32xf32>
    %171 = vector.extract_strided_slice %5 {offsets = [8, 0], sizes = [1, 32], strides = [1, 1]} : vector<15x32xf32> to vector<1x32xf32>
    %172 = vector.broadcast %171 : vector<1x32xf32> to vector<16x32xf32>
    %173 = arith.addf %170, %172 : vector<16x32xf32>
    %174 = vector.extract_strided_slice %160 {offsets = [0, 0], sizes = [16, 8], strides = [1, 1]} : vector<16x32xf32> to vector<16x8xf32>
    %175 = vector.shape_cast %174 : vector<16x8xf32> to vector<2x8x8xf32>
    %176 = arith.truncf %175 : vector<2x8x8xf32> to vector<2x8x8xbf16>
    %177 = vector.extract_strided_slice %169 {offsets = [0, 0], sizes = [16, 8], strides = [1, 1]} : vector<16x32xf32> to vector<16x8xf32>
    %178 = vector.shape_cast %177 : vector<16x8xf32> to vector<2x8x8xf32>
    %179 = arith.truncf %178 : vector<2x8x8xf32> to vector<2x8x8xbf16>
    %180 = vector.extract_strided_slice %173 {offsets = [0, 0], sizes = [16, 8], strides = [1, 1]} : vector<16x32xf32> to vector<16x8xf32>
    %181 = vector.shape_cast %180 : vector<16x8xf32> to vector<2x8x8xf32>
    %182 = arith.truncf %181 : vector<2x8x8xf32> to vector<2x8x8xbf16>
    "tpu.trace_start"() <{level = 10 : i32, message = "bqd,bkd->bqk"}> : () -> ()
    %cst_45 = arith.constant dense<0.000000e+00> : vector<2x8x8xf32>
    %183 = tpu.matmul %176, %179, %cst_45 {dimension_numbers = #tpu.dot_dimension_numbers<[2], [2], [1], [1], [0, 0, 0, 1, 1, 1], [0], [0]>} : vector<2x8x8xbf16>, vector<2x8x8xbf16>, vector<2x8x8xf32> -> vector<2x8x8xf32>
    "tpu.trace_stop"() : () -> ()
    %cst_46 = arith.constant dense<0xFF800000> : vector<2x8xf32>
    %184 = vector.multi_reduction <maximumf>, %183, %cst_46 [2] : vector<2x8x8xf32> to vector<2x8xf32>
    %185 = vector.shape_cast %184 : vector<2x8xf32> to vector<2x8x1xf32>
    %186 = vector.broadcast %185 : vector<2x8x1xf32> to vector<2x8x8xf32>
    %187 = arith.subf %183, %186 : vector<2x8x8xf32>
    %188 = math.exp %187 : vector<2x8x8xf32>
    %cst_47 = arith.constant dense<0.000000e+00> : vector<2x8xf32>
    %189 = vector.multi_reduction <add>, %188, %cst_47 [2] : vector<2x8x8xf32> to vector<2x8xf32>
    %190 = vector.shape_cast %189 : vector<2x8xf32> to vector<2x8x1xf32>
    %191 = tpu.reciprocal %190 {approx = true} : vector<2x8x1xf32> -> vector<2x8x1xf32>
    %192 = vector.broadcast %191 : vector<2x8x1xf32> to vector<2x8x8xf32>
    %193 = arith.mulf %188, %192 : vector<2x8x8xf32>
    %194 = arith.truncf %193 : vector<2x8x8xf32> to vector<2x8x8xbf16>
    "tpu.trace_start"() <{level = 10 : i32, message = "bqk,bkd->bqd"}> : () -> ()
    %cst_48 = arith.constant dense<0.000000e+00> : vector<2x8x8xf32>
    %195 = tpu.matmul %194, %182, %cst_48 {dimension_numbers = #tpu.dot_dimension_numbers<[2], [1], [1], [2], [0, 0, 0, 1, 1, 2], [0], [0]>} : vector<2x8x8xbf16>, vector<2x8x8xbf16>, vector<2x8x8xf32> -> vector<2x8x8xf32>
    "tpu.trace_stop"() : () -> ()
    %196 = vector.extract_strided_slice %160 {offsets = [0, 8], sizes = [16, 8], strides = [1, 1]} : vector<16x32xf32> to vector<16x8xf32>
    %197 = vector.shape_cast %196 : vector<16x8xf32> to vector<2x8x8xf32>
    %198 = arith.truncf %197 : vector<2x8x8xf32> to vector<2x8x8xbf16>
    %199 = vector.extract_strided_slice %169 {offsets = [0, 8], sizes = [16, 8], strides = [1, 1]} : vector<16x32xf32> to vector<16x8xf32>
    %200 = vector.shape_cast %199 : vector<16x8xf32> to vector<2x8x8xf32>
    %201 = arith.truncf %200 : vector<2x8x8xf32> to vector<2x8x8xbf16>
    %202 = vector.extract_strided_slice %173 {offsets = [0, 8], sizes = [16, 8], strides = [1, 1]} : vector<16x32xf32> to vector<16x8xf32>
    %203 = vector.shape_cast %202 : vector<16x8xf32> to vector<2x8x8xf32>
    %204 = arith.truncf %203 : vector<2x8x8xf32> to vector<2x8x8xbf16>
    "tpu.trace_start"() <{level = 10 : i32, message = "bqd,bkd->bqk"}> : () -> ()
    %cst_49 = arith.constant dense<0.000000e+00> : vector<2x8x8xf32>
    %205 = tpu.matmul %198, %201, %cst_49 {dimension_numbers = #tpu.dot_dimension_numbers<[2], [2], [1], [1], [0, 0, 0, 1, 1, 1], [0], [0]>} : vector<2x8x8xbf16>, vector<2x8x8xbf16>, vector<2x8x8xf32> -> vector<2x8x8xf32>
    "tpu.trace_stop"() : () -> ()
    %cst_50 = arith.constant dense<0xFF800000> : vector<2x8xf32>
    %206 = vector.multi_reduction <maximumf>, %205, %cst_50 [2] : vector<2x8x8xf32> to vector<2x8xf32>
    %207 = vector.shape_cast %206 : vector<2x8xf32> to vector<2x8x1xf32>
    %208 = vector.broadcast %207 : vector<2x8x1xf32> to vector<2x8x8xf32>
    %209 = arith.subf %205, %208 : vector<2x8x8xf32>
    %210 = math.exp %209 : vector<2x8x8xf32>
    %cst_51 = arith.constant dense<0.000000e+00> : vector<2x8xf32>
    %211 = vector.multi_reduction <add>, %210, %cst_51 [2] : vector<2x8x8xf32> to vector<2x8xf32>
    %212 = vector.shape_cast %211 : vector<2x8xf32> to vector<2x8x1xf32>
    %213 = tpu.reciprocal %212 {approx = true} : vector<2x8x1xf32> -> vector<2x8x1xf32>
    %214 = vector.broadcast %213 : vector<2x8x1xf32> to vector<2x8x8xf32>
    %215 = arith.mulf %210, %214 : vector<2x8x8xf32>
    %216 = arith.truncf %215 : vector<2x8x8xf32> to vector<2x8x8xbf16>
    "tpu.trace_start"() <{level = 10 : i32, message = "bqk,bkd->bqd"}> : () -> ()
    %cst_52 = arith.constant dense<0.000000e+00> : vector<2x8x8xf32>
    %217 = tpu.matmul %216, %204, %cst_52 {dimension_numbers = #tpu.dot_dimension_numbers<[2], [1], [1], [2], [0, 0, 0, 1, 1, 2], [0], [0]>} : vector<2x8x8xbf16>, vector<2x8x8xbf16>, vector<2x8x8xf32> -> vector<2x8x8xf32>
    "tpu.trace_stop"() : () -> ()
    %218 = vector.extract_strided_slice %160 {offsets = [0, 16], sizes = [16, 8], strides = [1, 1]} : vector<16x32xf32> to vector<16x8xf32>
    %219 = vector.shape_cast %218 : vector<16x8xf32> to vector<2x8x8xf32>
    %220 = arith.truncf %219 : vector<2x8x8xf32> to vector<2x8x8xbf16>
    %221 = vector.extract_strided_slice %169 {offsets = [0, 16], sizes = [16, 8], strides = [1, 1]} : vector<16x32xf32> to vector<16x8xf32>
    %222 = vector.shape_cast %221 : vector<16x8xf32> to vector<2x8x8xf32>
    %223 = arith.truncf %222 : vector<2x8x8xf32> to vector<2x8x8xbf16>
    %224 = vector.extract_strided_slice %173 {offsets = [0, 16], sizes = [16, 8], strides = [1, 1]} : vector<16x32xf32> to vector<16x8xf32>
    %225 = vector.shape_cast %224 : vector<16x8xf32> to vector<2x8x8xf32>
    %226 = arith.truncf %225 : vector<2x8x8xf32> to vector<2x8x8xbf16>
    "tpu.trace_start"() <{level = 10 : i32, message = "bqd,bkd->bqk"}> : () -> ()
    %cst_53 = arith.constant dense<0.000000e+00> : vector<2x8x8xf32>
    %227 = tpu.matmul %220, %223, %cst_53 {dimension_numbers = #tpu.dot_dimension_numbers<[2], [2], [1], [1], [0, 0, 0, 1, 1, 1], [0], [0]>} : vector<2x8x8xbf16>, vector<2x8x8xbf16>, vector<2x8x8xf32> -> vector<2x8x8xf32>
    "tpu.trace_stop"() : () -> ()
    %cst_54 = arith.constant dense<0xFF800000> : vector<2x8xf32>
    %228 = vector.multi_reduction <maximumf>, %227, %cst_54 [2] : vector<2x8x8xf32> to vector<2x8xf32>
    %229 = vector.shape_cast %228 : vector<2x8xf32> to vector<2x8x1xf32>
    %230 = vector.broadcast %229 : vector<2x8x1xf32> to vector<2x8x8xf32>
    %231 = arith.subf %227, %230 : vector<2x8x8xf32>
    %232 = math.exp %231 : vector<2x8x8xf32>
    %cst_55 = arith.constant dense<0.000000e+00> : vector<2x8xf32>
    %233 = vector.multi_reduction <add>, %232, %cst_55 [2] : vector<2x8x8xf32> to vector<2x8xf32>
    %234 = vector.shape_cast %233 : vector<2x8xf32> to vector<2x8x1xf32>
    %235 = tpu.reciprocal %234 {approx = true} : vector<2x8x1xf32> -> vector<2x8x1xf32>
    %236 = vector.broadcast %235 : vector<2x8x1xf32> to vector<2x8x8xf32>
    %237 = arith.mulf %232, %236 : vector<2x8x8xf32>
    %238 = arith.truncf %237 : vector<2x8x8xf32> to vector<2x8x8xbf16>
    "tpu.trace_start"() <{level = 10 : i32, message = "bqk,bkd->bqd"}> : () -> ()
    %cst_56 = arith.constant dense<0.000000e+00> : vector<2x8x8xf32>
    %239 = tpu.matmul %238, %226, %cst_56 {dimension_numbers = #tpu.dot_dimension_numbers<[2], [1], [1], [2], [0, 0, 0, 1, 1, 2], [0], [0]>} : vector<2x8x8xbf16>, vector<2x8x8xbf16>, vector<2x8x8xf32> -> vector<2x8x8xf32>
    "tpu.trace_stop"() : () -> ()
    %240 = vector.extract_strided_slice %160 {offsets = [0, 24], sizes = [16, 8], strides = [1, 1]} : vector<16x32xf32> to vector<16x8xf32>
    %241 = vector.shape_cast %240 : vector<16x8xf32> to vector<2x8x8xf32>
    %242 = arith.truncf %241 : vector<2x8x8xf32> to vector<2x8x8xbf16>
    %243 = vector.extract_strided_slice %169 {offsets = [0, 24], sizes = [16, 8], strides = [1, 1]} : vector<16x32xf32> to vector<16x8xf32>
    %244 = vector.shape_cast %243 : vector<16x8xf32> to vector<2x8x8xf32>
    %245 = arith.truncf %244 : vector<2x8x8xf32> to vector<2x8x8xbf16>
    %246 = vector.extract_strided_slice %173 {offsets = [0, 24], sizes = [16, 8], strides = [1, 1]} : vector<16x32xf32> to vector<16x8xf32>
    %247 = vector.shape_cast %246 : vector<16x8xf32> to vector<2x8x8xf32>
    %248 = arith.truncf %247 : vector<2x8x8xf32> to vector<2x8x8xbf16>
    "tpu.trace_start"() <{level = 10 : i32, message = "bqd,bkd->bqk"}> : () -> ()
    %cst_57 = arith.constant dense<0.000000e+00> : vector<2x8x8xf32>
    %249 = tpu.matmul %242, %245, %cst_57 {dimension_numbers = #tpu.dot_dimension_numbers<[2], [2], [1], [1], [0, 0, 0, 1, 1, 1], [0], [0]>} : vector<2x8x8xbf16>, vector<2x8x8xbf16>, vector<2x8x8xf32> -> vector<2x8x8xf32>
    "tpu.trace_stop"() : () -> ()
    %cst_58 = arith.constant dense<0xFF800000> : vector<2x8xf32>
    %250 = vector.multi_reduction <maximumf>, %249, %cst_58 [2] : vector<2x8x8xf32> to vector<2x8xf32>
    %251 = vector.shape_cast %250 : vector<2x8xf32> to vector<2x8x1xf32>
    %252 = vector.broadcast %251 : vector<2x8x1xf32> to vector<2x8x8xf32>
    %253 = arith.subf %249, %252 : vector<2x8x8xf32>
    %254 = math.exp %253 : vector<2x8x8xf32>
    %cst_59 = arith.constant dense<0.000000e+00> : vector<2x8xf32>
    %255 = vector.multi_reduction <add>, %254, %cst_59 [2] : vector<2x8x8xf32> to vector<2x8xf32>
    %256 = vector.shape_cast %255 : vector<2x8xf32> to vector<2x8x1xf32>
    %257 = tpu.reciprocal %256 {approx = true} : vector<2x8x1xf32> -> vector<2x8x1xf32>
    %258 = vector.broadcast %257 : vector<2x8x1xf32> to vector<2x8x8xf32>
    %259 = arith.mulf %254, %258 : vector<2x8x8xf32>
    %260 = arith.truncf %259 : vector<2x8x8xf32> to vector<2x8x8xbf16>
    "tpu.trace_start"() <{level = 10 : i32, message = "bqk,bkd->bqd"}> : () -> ()
    %cst_60 = arith.constant dense<0.000000e+00> : vector<2x8x8xf32>
    %261 = tpu.matmul %260, %248, %cst_60 {dimension_numbers = #tpu.dot_dimension_numbers<[2], [1], [1], [2], [0, 0, 0, 1, 1, 2], [0], [0]>} : vector<2x8x8xbf16>, vector<2x8x8xbf16>, vector<2x8x8xf32> -> vector<2x8x8xf32>
    "tpu.trace_stop"() : () -> ()
    %262 = tpu.concatenate %195, %217, %239, %261 in 2 : vector<2x8x8xf32>, vector<2x8x8xf32>, vector<2x8x8xf32>, vector<2x8x8xf32> -> vector<2x8x32xf32>
    %263 = vector.shape_cast %262 : vector<2x8x32xf32> to vector<16x32xf32>
    %264 = arith.truncf %263 : vector<16x32xf32> to vector<16x32xbf16>
    %c0_61 = arith.constant 0 : index
    %c0_62 = arith.constant 0 : index
    %c0_63 = arith.constant 0 : index
    %265 = vector.load %arg8[%c0_61, %c0_62, %c0_63] : memref<1x32x32xbf16, #tpu.memory_space<vmem>>, vector<1x32x32xbf16>
    %266 = vector.shape_cast %265 : vector<1x32x32xbf16> to vector<32x32xbf16>
    %cst_64 = arith.constant dense<0.000000e+00> : vector<16x32xf32>
    %267 = tpu.matmul %264, %266, %cst_64 {dimension_numbers = #tpu.dot_dimension_numbers<[1], [0], [0], [1], [0, 0, 1, 1], [], []>} : vector<16x32xbf16>, vector<32x32xbf16>, vector<16x32xf32> -> vector<16x32xf32>
    %268 = vector.extract_strided_slice %5 {offsets = [9, 0], sizes = [1, 32], strides = [1, 1]} : vector<15x32xf32> to vector<1x32xf32>
    %269 = vector.broadcast %268 : vector<1x32xf32> to vector<16x32xf32>
    %270 = arith.addf %267, %269 : vector<16x32xf32>
    %271 = arith.addf %153, %270 : vector<16x32xf32>
    %272 = vector.extract_strided_slice %5 {offsets = [10, 0], sizes = [1, 32], strides = [1, 1]} : vector<15x32xf32> to vector<1x32xf32>
    %273 = vector.extract_strided_slice %5 {offsets = [11, 0], sizes = [1, 32], strides = [1, 1]} : vector<15x32xf32> to vector<1x32xf32>
    %cst_65 = arith.constant dense<0.000000e+00> : vector<16xf32>
    %274 = vector.multi_reduction <add>, %271, %cst_65 [1] : vector<16x32xf32> to vector<16xf32>
    %275 = vector.shape_cast %274 : vector<16xf32> to vector<16x1xf32>
    %cst_66 = arith.constant 3.200000e+01 : f32
    %276 = vector.broadcast %cst_66 : f32 to vector<16x1xf32>
    %277 = arith.divf %275, %276 : vector<16x1xf32>
    %278 = vector.broadcast %277 : vector<16x1xf32> to vector<16x32xf32>
    %279 = arith.subf %271, %278 : vector<16x32xf32>
    %280 = arith.mulf %279, %279 : vector<16x32xf32>
    %cst_67 = arith.constant dense<0.000000e+00> : vector<16xf32>
    %281 = vector.multi_reduction <add>, %280, %cst_67 [1] : vector<16x32xf32> to vector<16xf32>
    %282 = vector.shape_cast %281 : vector<16xf32> to vector<16x1xf32>
    %cst_68 = arith.constant 3.200000e+01 : f32
    %283 = vector.broadcast %cst_68 : f32 to vector<16x1xf32>
    %284 = arith.divf %282, %283 : vector<16x1xf32>
    %285 = vector.broadcast %277 : vector<16x1xf32> to vector<16x32xf32>
    %286 = arith.subf %271, %285 : vector<16x32xf32>
    %cst_69 = arith.constant 9.99999974E-6 : f32
    %287 = vector.broadcast %cst_69 : f32 to vector<16x1xf32>
    %288 = arith.addf %284, %287 : vector<16x1xf32>
    %289 = math.rsqrt %288 : vector<16x1xf32>
    %290 = vector.broadcast %289 : vector<16x1xf32> to vector<16x32xf32>
    %291 = arith.mulf %286, %290 : vector<16x32xf32>
    %292 = vector.broadcast %272 : vector<1x32xf32> to vector<16x32xf32>
    %293 = arith.mulf %291, %292 : vector<16x32xf32>
    %294 = vector.broadcast %273 : vector<1x32xf32> to vector<16x32xf32>
    %295 = arith.addf %293, %294 : vector<16x32xf32>
    %296 = arith.truncf %295 : vector<16x32xf32> to vector<16x32xbf16>
    %c0_70 = arith.constant 0 : index
    %c0_71 = arith.constant 0 : index
    %c0_72 = arith.constant 0 : index
    %297 = vector.load %arg9[%c0_70, %c0_71, %c0_72] : memref<1x32x64xbf16, #tpu.memory_space<vmem>>, vector<1x32x64xbf16>
    %298 = vector.shape_cast %297 : vector<1x32x64xbf16> to vector<32x64xbf16>
    %cst_73 = arith.constant dense<0.000000e+00> : vector<16x64xf32>
    %299 = tpu.matmul %296, %298, %cst_73 {dimension_numbers = #tpu.dot_dimension_numbers<[1], [0], [0], [1], [0, 0, 1, 1], [], []>} : vector<16x32xbf16>, vector<32x64xbf16>, vector<16x64xf32> -> vector<16x64xf32>
    %c0_74 = arith.constant 0 : index
    %c0_75 = arith.constant 0 : index
    %c0_76 = arith.constant 0 : index
    %300 = vector.load %arg11[%c0_74, %c0_75, %c0_76] : memref<1x1x64xf32, #tpu.memory_space<vmem>>, vector<1x1x64xf32>
    %301 = vector.shape_cast %300 : vector<1x1x64xf32> to vector<1x64xf32>
    %302 = vector.broadcast %301 : vector<1x64xf32> to vector<16x64xf32>
    %303 = arith.addf %299, %302 : vector<16x64xf32>
    %cst_77 = arith.constant 0.000000e+00 : f32
    %304 = vector.broadcast %cst_77 : f32 to vector<16x64xf32>
    %305 = arith.maximumf %303, %304 : vector<16x64xf32>
    %306 = arith.truncf %305 : vector<16x64xf32> to vector<16x64xbf16>
    %c0_78 = arith.constant 0 : index
    %c0_79 = arith.constant 0 : index
    %c0_80 = arith.constant 0 : index
    %307 = vector.load %arg10[%c0_78, %c0_79, %c0_80] : memref<1x64x32xbf16, #tpu.memory_space<vmem>>, vector<1x64x32xbf16>
    %308 = vector.shape_cast %307 : vector<1x64x32xbf16> to vector<64x32xbf16>
    %cst_81 = arith.constant dense<0.000000e+00> : vector<16x32xf32>
    %309 = tpu.matmul %306, %308, %cst_81 {dimension_numbers = #tpu.dot_dimension_numbers<[1], [0], [0], [1], [0, 0, 1, 1], [], []>} : vector<16x64xbf16>, vector<64x32xbf16>, vector<16x32xf32> -> vector<16x32xf32>
    %310 = vector.extract_strided_slice %5 {offsets = [12, 0], sizes = [1, 32], strides = [1, 1]} : vector<15x32xf32> to vector<1x32xf32>
    %311 = vector.broadcast %310 : vector<1x32xf32> to vector<16x32xf32>
    %312 = arith.addf %309, %311 : vector<16x32xf32>
    %313 = arith.addf %295, %312 : vector<16x32xf32>
    %314 = vector.extract_strided_slice %5 {offsets = [13, 0], sizes = [1, 32], strides = [1, 1]} : vector<15x32xf32> to vector<1x32xf32>
    %315 = vector.extract_strided_slice %5 {offsets = [14, 0], sizes = [1, 32], strides = [1, 1]} : vector<15x32xf32> to vector<1x32xf32>
    %cst_82 = arith.constant dense<0.000000e+00> : vector<16xf32>
    %316 = vector.multi_reduction <add>, %313, %cst_82 [1] : vector<16x32xf32> to vector<16xf32>
    %317 = vector.shape_cast %316 : vector<16xf32> to vector<16x1xf32>
    %cst_83 = arith.constant 3.200000e+01 : f32
    %318 = vector.broadcast %cst_83 : f32 to vector<16x1xf32>
    %319 = arith.divf %317, %318 : vector<16x1xf32>
    %320 = vector.broadcast %319 : vector<16x1xf32> to vector<16x32xf32>
    %321 = arith.subf %313, %320 : vector<16x32xf32>
    %322 = arith.mulf %321, %321 : vector<16x32xf32>
    %cst_84 = arith.constant dense<0.000000e+00> : vector<16xf32>
    %323 = vector.multi_reduction <add>, %322, %cst_84 [1] : vector<16x32xf32> to vector<16xf32>
    %324 = vector.shape_cast %323 : vector<16xf32> to vector<16x1xf32>
    %cst_85 = arith.constant 3.200000e+01 : f32
    %325 = vector.broadcast %cst_85 : f32 to vector<16x1xf32>
    %326 = arith.divf %324, %325 : vector<16x1xf32>
    %327 = vector.broadcast %319 : vector<16x1xf32> to vector<16x32xf32>
    %328 = arith.subf %313, %327 : vector<16x32xf32>
    %cst_86 = arith.constant 9.99999974E-6 : f32
    %329 = vector.broadcast %cst_86 : f32 to vector<16x1xf32>
    %330 = arith.addf %326, %329 : vector<16x1xf32>
    %331 = math.rsqrt %330 : vector<16x1xf32>
    %332 = vector.broadcast %331 : vector<16x1xf32> to vector<16x32xf32>
    %333 = arith.mulf %328, %332 : vector<16x32xf32>
    %334 = vector.broadcast %314 : vector<1x32xf32> to vector<16x32xf32>
    %335 = arith.mulf %333, %334 : vector<16x32xf32>
    %336 = vector.broadcast %315 : vector<1x32xf32> to vector<16x32xf32>
    %337 = arith.addf %335, %336 : vector<16x32xf32>
    %c0_87 = arith.constant 0 : index
    %c0_88 = arith.constant 0 : index
    %338 = vector.load %arg14[%c0_87, %c0_88] : memref<16x32xf32, #tpu.memory_space<vmem>>, vector<16x32xf32>
    tpu.vector_store %arg14[%c0_87, %c0_88], %337 {strides = array<i32>} : memref<16x32xf32, #tpu.memory_space<vmem>>, vector<16x32xf32>,
    %c1_i32 = arith.constant 1 : i32
    %339 = arith.cmpi eq, %arg0, %c1_i32 : i32
    %340 = arith.extui %339 : i1 to i32
    %c0_i32_89 = arith.constant 0 : i32
    %341 = arith.cmpi ne, %340, %c0_i32_89 : i32
    scf.if %341 {
      %c0_90 = arith.constant 0 : index
      %c0_91 = arith.constant 0 : index
      %342 = vector.load %arg13[%c0_90, %c0_91] : memref<16x32xf32, #tpu.memory_space<vmem>>, vector<16x32xf32>
      tpu.vector_store %arg13[%c0_90, %c0_91], %337 {strides = array<i32>} : memref<16x32xf32, #tpu.memory_space<vmem>>, vector<16x32xf32>,
    } else {
    }
    return
  }
  func.func @transform_0(%arg0: i32) -> (i32, i32) {
    %c0_i32 = arith.constant 0 : i32
    %c0_i32_0 = arith.constant 0 : i32
    %c0_i32_1 = arith.constant 0 : i32
    return %c0_i32, %c0_i32_0 : i32, i32
  }
  func.func @transform_1(%arg0: i32) -> (i32, i32) {
    %c0_i32 = arith.constant 0 : i32
    %c0_i32_0 = arith.constant 0 : i32
    %c0_i32_1 = arith.constant 0 : i32
    return %c0_i32, %c0_i32_0 : i32, i32
  }
  func.func @transform_2(%arg0: i32) -> (i32, i32) {
    %c0_i32 = arith.constant 0 : i32
    %c0_i32_0 = arith.constant 0 : i32
    %c0_i32_1 = arith.constant 0 : i32
    return %c0_i32, %c0_i32_0 : i32, i32
  }
  func.func @transform_3(%arg0: i32) -> (i32, i32, i32) {
    %c0_i32 = arith.constant 0 : i32
    %c0_i32_0 = arith.constant 0 : i32
    %c0_i32_1 = arith.constant 0 : i32
    return %arg0, %c0_i32, %c0_i32_0 : i32, i32, i32
  }
  func.func @transform_4(%arg0: i32) -> (i32, i32, i32) {
    %c0_i32 = arith.constant 0 : i32
    %c0_i32_0 = arith.constant 0 : i32
    %c0_i32_1 = arith.constant 0 : i32
    return %arg0, %c0_i32, %c0_i32_0 : i32, i32, i32
  }
  func.func @transform_5(%arg0: i32) -> (i32, i32, i32) {
    %c0_i32 = arith.constant 0 : i32
    %c0_i32_0 = arith.constant 0 : i32
    %c0_i32_1 = arith.constant 0 : i32
    return %arg0, %c0_i32, %c0_i32_0 : i32, i32, i32
  }
  func.func @transform_6(%arg0: i32) -> (i32, i32, i32) {
    %c0_i32 = arith.constant 0 : i32
    %c0_i32_0 = arith.constant 0 : i32
    %c0_i32_1 = arith.constant 0 : i32
    return %arg0, %c0_i32, %c0_i32_0 : i32, i32, i32
  }
  func.func @transform_7(%arg0: i32) -> (i32, i32, i32) {
    %c0_i32 = arith.constant 0 : i32
    %c0_i32_0 = arith.constant 0 : i32
    %c0_i32_1 = arith.constant 0 : i32
    return %arg0, %c0_i32, %c0_i32_0 : i32, i32, i32
  }
  func.func @transform_8(%arg0: i32) -> (i32, i32, i32) {
    %c0_i32 = arith.constant 0 : i32
    %c0_i32_0 = arith.constant 0 : i32
    %c0_i32_1 = arith.constant 0 : i32
    return %arg0, %c0_i32, %c0_i32_0 : i32, i32, i32
  }
  func.func @transform_9(%arg0: i32) -> (i32, i32, i32) {
    %c0_i32 = arith.constant 0 : i32
    %c0_i32_0 = arith.constant 0 : i32
    %c0_i32_1 = arith.constant 0 : i32
    return %arg0, %c0_i32, %c0_i32_0 : i32, i32, i32
  }
  func.func @transform_10(%arg0: i32) -> (i32, i32, i32) {
    %c0_i32 = arith.constant 0 : i32
    %c0_i32_0 = arith.constant 0 : i32
    %c0_i32_1 = arith.constant 0 : i32
    return %arg0, %c0_i32, %c0_i32_0 : i32, i32, i32
  }
  func.func @transform_11(%arg0: i32) -> (i32, i32, i32) {
    %c0_i32 = arith.constant 0 : i32
    %c0_i32_0 = arith.constant 0 : i32
    %c0_i32_1 = arith.constant 0 : i32
    return %arg0, %c0_i32, %c0_i32_0 : i32, i32, i32
  }
  func.func @transform_12(%arg0: i32) -> (i32, i32) {
    %c0_i32 = arith.constant 0 : i32
    %c0_i32_0 = arith.constant 0 : i32
    %c0_i32_1 = arith.constant 0 : i32
    return %c0_i32, %c0_i32_0 : i32, i32
  }
}

</mosaic_0001>

<bundles_post_ra>
// kernel: transformer_forward.2
= control target key start
LH: loop header
LB: loop body
LE: loop exit
PB: predicated region body
PF: predicated region fallthrough
CT: control target
= control target key end

     0   :  { %s2161_s24 = smov 0   ;;  %s2446_s0 = inlined_call_operand.vmem [shape: f32[16,32], index: 0, kind: input, shape index: {}]   ;;  %s2447_s1 = inlined_call_operand.vmem [shape: bf16[2,32,96], index: 1, kind: input, shape index: {}]   ;;  %s2448_s2 = inlined_call_operand.vmem [shape: bf16[2,32,32], index: 2, kind: input, shape index: {}]   ;;  %s2449_s3 = inlined_call_operand.vmem [shape: bf16[2,32,64], index: 3, kind: input, shape index: {}]   ;;  %s2450_s4 = inlined_call_operand.vmem [shape: bf16[2,64,32], index: 4, kind: input, shape index: {}]   ;;  %s2451_s5 = inlined_call_operand.vmem [shape: f32[2,1,64], index: 5, kind: input, shape index: {}]   ;;  %s2452_s6 = inlined_call_operand.vmem [shape: f32[2,9,32], index: 6, kind: input, shape index: {}]   ;;  %s2453_s7 = inlined_call_operand.vmem [shape: f32[16,32], index: 7, kind: output, shape index: {}]  }
   0x1 LB: > { %s2167_s25 = sadd.s32 4294967295, %s2102_s24   ;;  %p1776_p0 = scmp.ge.s32.totalorder %s2102_s24, 1  ;;  %s2102_s24 = sphi %s2161_s24, %s17_s24  }
   0x2   : > { %p280_p1 = scmp.lt.s32.totalorder %s2102_s24, 3 }
   0x4   : > { %p281_p2 = pnand %p1776_p0, %p280_p1 }
   0x5   : > { %p330_p3 = scmp.lt.s32.totalorder (!%p281_p2), %s2167_s25, 1  ;;  %p1787_p4 = scmp.ne.s32.totalorder (!%p281_p2), %s2167_s25, 0 }
   0x6   : > { %284 = sbr.rel (%p281_p2) target bundleno = 4158 (0x103e), region = 48 }
   0xd   : > { %s2173_s26 = scalar_select %p330_p3, %s2167_s25, 1 }
   0xe   : > { %362 = sbr.rel (%p1787_p4) target bundleno = 21 (0x15), region = 52  ;;  %v363_v0 = vld [vmem:[%s2446_s0] sm:$0xff] (!%p1787_p4)  ;;  %vm365_vm0 = vcmask (!%p1787_p4), 261120   ;;  %v364_v1 = vld [vmem:[%s2446_s0 + $0x8] sm:$0xff] (!%p1787_p4) }
   0xf   : > { %s1823_s27 = sshll.u32 %s2173_s26, 4  ;;  %s1826_s28 = sshll.u32 %s2173_s26, 5  ;;  %366 = vst.msk [vmem:[#allocation2] sm:$0xff] (!%p1787_p4), %vm365_vm0, %v363_v0  ;;  %367 = vst.msk [vmem:[#allocation2 + $0x8] sm:$0xff] (!%p1787_p4), %vm365_vm0, %v364_v1 }
  0x10   : > { %s334_s8 = scalar_lea.vmem %s2447_s1, %s1823_s27  ;;  %s2183_s11 = scalar_lea.vmem %s2448_s2, %s1823_s27 }
  0x11   : > { %s2188_s14 = scalar_lea.vmem %s2449_s3, %s1823_s27  ;;  %s2193_s17 = scalar_lea.vmem %s2450_s4, %s1826_s28 }
  0x12   : > { %s352_s20 = scalar_lea.vmem %s2451_s5, %s2173_s26  ;;  %s2202_s23 = scalar_lea.vmem %s2452_s6, %s1823_s27 }
  0x15 PF: > { %v2046_v2 = vld [vmem:[%s334_s8] sm:$0xff]   ;;  %v434_v3 = vlaneseq  ;;  %v2104_v4 = vmov 0.0   ;;  %v2047_v5 = vld [vmem:[%s334_s8 + $0x8] sm:$0xff]   ;;  %vm2105_vm1 = vmmov 0   ;;  %vm389_vm2 = vcmask 261120   ;;  %s2106_s27 = smov 32  }
  0x16   : > { %1874 = vmatprep.subr.bf16.mxu0 %v2104_v4  ;;  %1882 = vmatprep.subr.bf16.mxu1 %v2104_v4  ;;  %v2215_v6 = vld [vmem:[#allocation2] sm:$0xff]  ;;  %v2217_v7 = vld [vmem:[#allocation2 + $0x8] sm:$0xff]  ;;  %s2107_s8 = smov 96   ;;  %vm469_vm3 = vcmask 64512   ;;  %s2108_s10 = smov 64   ;;  %vm595_vm4 = vcmask 1043456  }
  0x17   : > { %1875 = vmatpush3.bf16.msra.mxu0 %v2046_v2  ;;  %1878 = vmatprep.mubr.msk.bf16.mxu0 %vm2105_vm1, %v2104_v4  ;;  %v2220_v8 = vld [vmem:[%s2202_s23] sm:$0xff]  ;;  %v2222_v9 = vshrl.u32 %v434_v3, 7  ;;  %v372_v11 = vpack.c.bf16 %v2217_v7, %v2215_v6  ;;  %s2109_s12 = smov 88   ;;  %s2110_s13 = smov 120   ;;  %vm1376_vm5 = vcmask 130048   ;;  %vm1379_vm6 = vcmask 195584  }
  0x18   : > { %1876 = vmatprep.subr.bf16.mxu0 %v2104_v4  ;;  %1884 = vmatprep.mubr.msk.bf16.mxu1 %vm2105_vm1, %v2104_v4  ;;  %s2111_s15 = smov 56   ;;  %s2112_s16 = smov 80   ;;  %vm1595_vm7 = vcmask 523264  }
  0x19   : > { %v442_v10 = vsub.s32 1, %v2222_v9  ;;  %v436_v22 = vsub.s32 0, %v2222_v9  ;;  %v452_v42 = vsub.s32 2, %v2222_v9  ;;  %s2113_s18 = smov 112   ;;  %s2114_s19 = smov 48  }
  0x1a   : > { %s2115_s21 = smov 72   ;;  %s2116_s22 = smov 104  }
  0x1b   : > { %1877 = vmatpush3.bf16.msra.mxu0 %v2047_v5  ;;  %v443_v12 = vrot.slane %v2220_v8, %v442_v10  ;;  %v437_v23 = vrot.slane %v2220_v8, %v436_v22  ;;  %v453_v43 = vrot.slane %v2220_v8, %v452_v42  ;;  %s2117_s29 = smov 40   ;;  %s2118_s30 = smov 8  }
  0x1c   : > { %1888 = vmatprep.subr.bf16.mxu0 %v2104_v4  ;;  %s2119_s9 = smov 16   ;;  %s2120_s28 = smov 24  }
  0x1d   : > { %445 = vrot.lane.b32.xlu0 %v443_v12, %s2106_s27  ;;  %p1820_p5 = scmp.ne.s32.totalorder %s2167_s25, 1 }
  0x1e   : > { %1879 = vmatmul.mubr.msk.bf16.vlgmr.msra.gmra.mrb[0].mxu0 %vm389_vm2, %v372_v11 }
  0x1f   : > { %1890 = vmatprep.mubr.msk.bf16.mxu0 %vm2105_vm1, %v2104_v4 }
  0x8f   : > { %v446_v13 = vpop.permute.xlu0 %445 }
  0xf1   : > { %v427_v14 = vpop.f32.mrb[0].mxu0 }
  0xf2   : > { %v448_v15 = vadd.f32 %v446_v13, %v427_v14  ;;  %v1880_v16 = vpop.f32.mrb[1].mxu0  ;;  %v438_v27 = vadd.f32 %v437_v23, %v427_v14 }
  0xf3   : > { %v430_v17 = vpop.f32.mrb[2].mxu0 }
  0xf4   : > { %v2235_v18 = vpack.c.bf16 %v448_v15, %v448_v15  ;;  %v449_v19 = vadd.f32 %v446_v13, %v430_v17  ;;  %v1881_v20 = vpop.f32.mrb[3].mxu0  ;;  %v439_v29 = vadd.f32 %v437_v23, %v430_v17  ;;  %v2247_v30 = vpack.c.bf16 %v438_v27, %v438_v27 }
  0xf6   : > { %v2237_v21 = vpack.c.bf16 %v449_v19, %v449_v19  ;;  %467 = vrot.lane.b32.xlu0 %v2235_v18, %s2107_s8  ;;  %v2249_v31 = vpack.c.bf16 %v439_v29, %v439_v29 }
  0xf8   : > { %517 = vrot.lane.b32.xlu1 %v2237_v21, %s2107_s8 }
 0x168   : > { %v468_v24 = vpop.permute.xlu0 %467 }
 0x169   : > { %v474_v25 = vsel %vm469_vm3, %v468_v24, 0 }
 0x16a   : > { %1883 = vmatpush3.bf16.xpose.msra.mxu1 %v474_v25  ;;  %v518_v26 = vpop.permute.xlu1 %517 }
 0x16b   : > { %v523_v28 = vsel %vm469_vm3, %v518_v26, 0  ;;  %1894 = vmatprep.subr.bf16.mxu1 %v2104_v4 }
 0x16c   : > { %1889 = vmatpush3.bf16.xpose.msra.mxu0 %v523_v28 }
 0x16d   : > { %1900 = vmatprep.subr.bf16.mxu0 %v2104_v4 }
 0x171   : > { %1885 = vmatmul.mubr.msk.bf16.vlgmr.msra.gmra.mrb[0].mxu1 %vm469_vm3, %v2247_v30 }
 0x172   : > { %1896 = vmatprep.mubr.msk.bf16.mxu1 %vm2105_vm1, %v2104_v4 }
 0x173   : > { %1891 = vmatmul.mubr.msk.bf16.vlgmr.msra.gmra.mrb[4].mxu0 %vm469_vm3, %v2249_v31 }
 0x174   : > { %1902 = vmatprep.mubr.msk.bf16.mxu0 %vm2105_vm1, %v2104_v4 }
 0x244   : > { %v510_v32 = vpop.f32.mrb[0].mxu1 }
 0x245   : > { %v1886_v33 = vpop.f32.mrb[1].mxu1  ;;  %v565_v34 = vsel %vm469_vm3, %v510_v32, -inf }
 0x246   : > { %v513_v35 = vpop.f32.mrb[2].mxu1  ;;  %566 = vmax.xlane.f32.xlu1 %v565_v34  ;;  %v559_v36 = vpop.f32.mrb[4].mxu0 }
 0x247   : > { %v1887_v37 = vpop.f32.mrb[3].mxu1  ;;  %v1892_v38 = vpop.f32.mrb[5].mxu0  ;;  %v568_v39 = vsel %vm469_vm3, %v559_v36, -inf }
 0x248   : > { %569 = vmax.xlane.f32.xlu0 %v568_v39  ;;  %v562_v40 = vpop.f32.mrb[6].mxu0 }
 0x249   : > { %v1893_v41 = vpop.f32.mrb[7].mxu0 }
 0x25e   : > { %455 = vrot.lane.b32.xlu0 %v453_v43, %s2108_s10 }
 0x2d3   : > { %v567_v50 = vpop.xlane.xlu1 %566 }
 0x2d4   : > { %v571_v51 = vsub.f32 %v510_v32, %v567_v50 }
 0x2d5   : > { %v570_v44 = vpop.xlane.xlu0 %569 }
 0x2d6   : > { %v573_v52 = vmul.f32 1.442695, %v571_v51  ;;  %v572_v53 = vsub.f32 %v559_v36, %v570_v44 }
 0x2d8   : > { %2056 = vpow2.f32 %v573_v52  ;;  %v575_v54 = vmul.f32 1.442695, %v572_v53 }
 0x2d9   : > { %v456_v45 = vpop.permute.xlu0 %455 }
 0x2da   : > { %v458_v46 = vadd.f32 %v456_v45, %v427_v14  ;;  %v459_v47 = vadd.f32 %v456_v45, %v430_v17  ;;  %2058 = vpow2.f32 %v575_v54 }
 0x2dc   : > { %v2263_v48 = vpack.c.bf16 %v458_v46, %v458_v46  ;;  %v2265_v49 = vpack.c.bf16 %v459_v47, %v459_v47 }
 0x2de   : > { %640 = vrot.lane.b32.xlu0 %v2265_v49, %s2108_s10  ;;  %590 = vrot.lane.b32.xlu1 %v2263_v48, %s2108_s10 }
 0x2e2   : > { %691 = vrot.lane.b32.xlu0 %v2235_v18, %s2109_s12  ;;  %v2057_v55 = vpop.eup %2056 }
 0x2e3   : > { %v577_v56 = vsel %vm469_vm3, %v2057_v55, 0.0 }
 0x2e4   : > { %v2059_v57 = vpop.eup %2058 }
 0x2e5   : > { %v580_v58 = vsel %vm469_vm3, %v2059_v57, 0.0 }
 0x2e6   : > { %689 = vrot.lane.b32.xlu0 %v2247_v30, %s2110_s13 }
 0x302   : > { %578 = vadd.xlane.f32.xlu1 %v577_v56 }
 0x306   : > { %581 = vadd.xlane.f32.xlu1 %v580_v58 }
 0x317   : > { %742 = vrot.lane.b32.xlu1 %v2237_v21, %s2109_s12 }
 0x31b   : > { %740 = vrot.lane.b32.xlu1 %v2249_v31, %s2110_s13 }
 0x350   : > { %v641_v59 = vpop.permute.xlu0 %640  ;;  %v591_v60 = vpop.permute.xlu1 %590 }
 0x351   : > { %v646_v61 = vsel %vm595_vm4, %v641_v59, 0  ;;  %v597_v62 = vsel %vm595_vm4, %v591_v60, 0 }
 0x352   : > { %1895 = vmatpush3.bf16.msra.mxu1 %v597_v62  ;;  %1901 = vmatpush3.bf16.msra.mxu0 %v646_v61 }
 0x353   : > { %1906 = vmatprep.subr.bf16.mxu1 %v2104_v4  ;;  %1912 = vmatprep.subr.bf16.mxu0 %v2104_v4 }
 0x354   : > { %v692_v3 = vpop.permute.xlu0 %691 }
 0x355   : > { %v697_v11 = vsel %vm469_vm3, %v692_v3, 0 }
 0x358   : > { %v690_v16 = vpop.permute.xlu0 %689 }
 0x38f   : > { %v579_v63 = vpop.xlane.xlu1 %578 }
 0x390   : > { %2060 = vrcp.f32 %v579_v63 }
 0x393   : > { %v582_v0 = vpop.xlane.xlu1 %581 }
 0x394   : > { %2062 = vrcp.f32 %v582_v0 }
 0x397   : > { %v743_v13 = vpop.permute.xlu1 %742 }
 0x398   : > { %v748_v15 = vsel %vm469_vm3, %v743_v13, 0 }
 0x39a   : > { %v2061_v1 = vpop.eup %2060 }
 0x39b   : > { %v585_v2 = vmul.f32 %v2061_v1, %v2057_v55  ;;  %v741_v17 = vpop.permute.xlu1 %740 }
 0x39d   : > { %v587_v5 = vpack.c.bf16 %v585_v2, %v585_v2 }
 0x39e   : > { %v2063_v10 = vpop.eup %2062 }
 0x39f   : > { %v586_v12 = vmul.f32 %v2063_v10, %v2059_v57  ;;  %1897 = vmatmul.mubr.msk.bf16.vlgmr.msra.gmra.mrb[4].mxu1 %vm469_vm3, %v587_v5 }
 0x3a0   : > { %1907 = vmatpush3.bf16.xpose.msra.mxu1 %v697_v11  ;;  %1908 = vmatprep.mubr.msk.bf16.mxu1 %vm2105_vm1, %v2104_v4 }
 0x3a1   : > { %v588_v14 = vpack.c.bf16 %v586_v12, %v586_v12  ;;  %1918 = vmatprep.subr.bf16.mxu1 %v2104_v4 }
 0x3a3   : > { %1903 = vmatmul.mubr.msk.bf16.vlgmr.msra.gmra.mrb[8].mxu0 %vm469_vm3, %v588_v14 }
 0x3a4   : > { %1913 = vmatpush3.bf16.xpose.msra.mxu0 %v748_v15  ;;  %1914 = vmatprep.mubr.msk.bf16.mxu0 %vm2105_vm1, %v2104_v4 }
 0x3a5   : > { %1924 = vmatprep.subr.bf16.mxu0 %v2104_v4 }
 0x3a7   : > { %1909 = vmatmul.mubr.msk.bf16.vlgmr.msra.gmra.mrb[8].mxu1 %vm469_vm3, %v690_v16 }
 0x3a8   : > { %1920 = vmatprep.mubr.msk.bf16.mxu1 %vm2105_vm1, %v2104_v4 }
 0x3ab   : > { %1915 = vmatmul.mubr.msk.bf16.vlgmr.msra.gmra.mrb[12].mxu0 %vm469_vm3, %v741_v17 }
 0x3ac   : > { %1926 = vmatprep.mubr.msk.bf16.mxu0 %vm2105_vm1, %v2104_v4 }
 0x472   : > { %v2295_v19 = vpop.f32.mrb[4].mxu1 }
 0x473   : > { %v1898_v20 = vpop.f32.mrb[5].mxu1 }
 0x474   : > { %v636_v22 = vpop.f32.mrb[6].mxu1 }
 0x475   : > { %v1899_v23 = vpop.f32.mrb[7].mxu1 }
 0x476   : > { %v2297_v24 = vpop.f32.mrb[8].mxu0 }
 0x477   : > { %v1904_v25 = vpop.f32.mrb[9].mxu0 }
 0x478   : > { %v685_v26 = vpop.f32.mrb[10].mxu0 }
 0x479   : > { %v1905_v27 = vpop.f32.mrb[11].mxu0 }
 0x47a   : > { %v733_v28 = vpop.f32.mrb[8].mxu1 }
 0x47b   : > { %v1910_v29 = vpop.f32.mrb[9].mxu1  ;;  %v790_v32 = vsel %vm469_vm3, %v733_v28, -inf }
 0x47c   : > { %791 = vmax.xlane.f32.xlu0 %v790_v32  ;;  %v736_v33 = vpop.f32.mrb[10].mxu1 }
 0x47d   : > { %v1911_v34 = vpop.f32.mrb[11].mxu1 }
 0x47e   : > { %v784_v35 = vpop.f32.mrb[12].mxu0 }
 0x47f   : > { %v1916_v36 = vpop.f32.mrb[13].mxu0  ;;  %v793_v37 = vsel %vm469_vm3, %v784_v35, -inf }
 0x480   : > { %794 = vmax.xlane.f32.xlu1 %v793_v37  ;;  %v787_v38 = vpop.f32.mrb[14].mxu0 }
 0x481   : > { %v1917_v39 = vpop.f32.mrb[15].mxu0 }
 0x491   : > { %814 = vrot.lane.b32.xlu1 %v2263_v48, %s2111_s15 }
 0x495   : > { %912 = vrot.lane.b32.xlu1 %v2235_v18, %s2112_s16 }
 0x499   : > { %962 = vrot.lane.b32.xlu1 %v2237_v21, %s2112_s16 }
 0x49d   : > { %960 = vrot.lane.b32.xlu1 %v2249_v31, %s2113_s18 }
 0x509   : > { %v792_v40 = vpop.xlane.xlu0 %791 }
 0x50a   : > { %v796_v41 = vsub.f32 %v733_v28, %v792_v40 }
 0x50c   : > { %v798_v42 = vmul.f32 1.442695, %v796_v41 }
 0x50d   : > { %v795_v43 = vpop.xlane.xlu1 %794 }
 0x50e   : > { %2064 = vpow2.f32 %v798_v42  ;;  %v797_v44 = vsub.f32 %v784_v35, %v795_v43 }
 0x510   : > { %v800_v45 = vmul.f32 1.442695, %v797_v44 }
 0x511   : > { %v815_v46 = vpop.permute.xlu1 %814 }
 0x512   : > { %2066 = vpow2.f32 %v800_v45  ;;  %v820_v47 = vsel %vm595_vm4, %v815_v46, 0 }
 0x513   : > { %1919 = vmatpush3.bf16.msra.mxu1 %v820_v47 }
 0x514   : > { %1930 = vmatprep.subr.bf16.mxu1 %v2104_v4 }
 0x515   : > { %v913_v59 = vpop.permute.xlu1 %912 }
 0x516   : > { %v918_v63 = vsel %vm469_vm3, %v913_v59, 0 }
 0x518   : > { %v2065_v50 = vpop.eup %2064 }
 0x519   : > { %v802_v51 = vsel %vm469_vm3, %v2065_v50, 0.0  ;;  %v963_v1 = vpop.permute.xlu1 %962 }
 0x51a   : > { %803 = vadd.xlane.f32.xlu0 %v802_v51  ;;  %v968_v3 = vsel %vm469_vm3, %v963_v1, 0 }
 0x51c   : > { %v2067_v52 = vpop.eup %2066 }
 0x51d   : > { %v805_v53 = vsel %vm469_vm3, %v2067_v52, 0.0  ;;  %v961_v10 = vpop.permute.xlu1 %960 }
 0x51e   : > { %806 = vadd.xlane.f32.xlu0 %v805_v53 }
 0x534   : > { %862 = vrot.lane.b32.xlu0 %v2265_v49, %s2111_s15 }
 0x538   : > { %910 = vrot.lane.b32.xlu0 %v2247_v30, %s2113_s18 }
 0x5a7   : > { %v804_v54 = vpop.xlane.xlu0 %803 }
 0x5a8   : > { %2068 = vrcp.f32 %v804_v54 }
 0x5ab   : > { %v807_v55 = vpop.xlane.xlu0 %806 }
 0x5ac   : > { %2070 = vrcp.f32 %v807_v55 }
 0x5af   : > { %v863_v56 = vpop.permute.xlu0 %862 }
 0x5b0   : > { %v868_v57 = vsel %vm595_vm4, %v863_v56, 0 }
 0x5b1   : > { %1925 = vmatpush3.bf16.msra.mxu0 %v868_v57 }
 0x5b2   : > { %v2069_v58 = vpop.eup %2068  ;;  %1936 = vmatprep.subr.bf16.mxu0 %v2104_v4 }
 0x5b3   : > { %v810_v60 = vmul.f32 %v2069_v58, %v2065_v50  ;;  %v911_v5 = vpop.permute.xlu0 %910 }
 0x5b5   : > { %v812_v61 = vpack.c.bf16 %v810_v60, %v810_v60 }
 0x5b6   : > { %v2071_v62 = vpop.eup %2070 }
 0x5b7   : > { %v811_v0 = vmul.f32 %v2071_v62, %v2067_v52  ;;  %1921 = vmatmul.mubr.msk.bf16.vlgmr.msra.gmra.mrb[12].mxu1 %vm469_vm3, %v812_v61 }
 0x5b8   : > { %1931 = vmatpush3.bf16.xpose.msra.mxu1 %v918_v63  ;;  %1932 = vmatprep.mubr.msk.bf16.mxu1 %vm2105_vm1, %v2104_v4 }
 0x5b9   : > { %v813_v2 = vpack.c.bf16 %v811_v0, %v811_v0  ;;  %1942 = vmatprep.subr.bf16.mxu1 %v2104_v4 }
 0x5bb   : > { %1927 = vmatmul.mubr.msk.bf16.vlgmr.msra.gmra.mrb[16].mxu0 %vm469_vm3, %v813_v2 }
 0x5bc   : > { %1937 = vmatpush3.bf16.xpose.msra.mxu0 %v968_v3  ;;  %1938 = vmatprep.mubr.msk.bf16.mxu0 %vm2105_vm1, %v2104_v4 }
 0x5bd   : > { %1948 = vmatprep.subr.bf16.mxu0 %v2104_v4 }
 0x5bf   : > { %1933 = vmatmul.mubr.msk.bf16.vlgmr.msra.gmra.mrb[16].mxu1 %vm469_vm3, %v911_v5 }
 0x5c0   : > { %1944 = vmatprep.mubr.msk.bf16.mxu1 %vm2105_vm1, %v2104_v4 }
 0x5c3   : > { %1939 = vmatmul.mubr.msk.bf16.vlgmr.msra.gmra.mrb[20].mxu0 %vm469_vm3, %v961_v10 }
 0x5c4   : > { %1950 = vmatprep.mubr.msk.bf16.mxu0 %vm2105_vm1, %v2104_v4 }
 0x68a   : > { %v2329_v11 = vpop.f32.mrb[12].mxu1 }
 0x68b   : > { %v1922_v12 = vpop.f32.mrb[13].mxu1 }
 0x68c   : > { %v859_v13 = vpop.f32.mrb[14].mxu1 }
 0x68d   : > { %v1923_v14 = vpop.f32.mrb[15].mxu1 }
 0x68e   : > { %v2331_v15 = vpop.f32.mrb[16].mxu0 }
 0x68f   : > { %v2031_v16 = vpack.i.bf16 %v2331_v15, %v2329_v11  ;;  %v1928_v17 = vpop.f32.mrb[17].mxu0 }
 0x690   : > { %v907_v20 = vpop.f32.mrb[18].mxu0 }
 0x691   : > { %v1929_v22 = vpop.f32.mrb[19].mxu0 }
 0x692   : > { %v954_v23 = vpop.f32.mrb[16].mxu1 }
 0x693   : > { %v1934_v25 = vpop.f32.mrb[17].mxu1  ;;  %v1010_v26 = vsel %vm469_vm3, %v954_v23, -inf }
 0x694   : > { %1011 = vmax.xlane.f32.xlu0 %v1010_v26  ;;  %v957_v27 = vpop.f32.mrb[18].mxu1 }
 0x695   : > { %v1935_v28 = vpop.f32.mrb[19].mxu1 }
 0x696   : > { %v1004_v29 = vpop.f32.mrb[20].mxu0 }
 0x697   : > { %v1940_v32 = vpop.f32.mrb[21].mxu0  ;;  %v1013_v33 = vsel %vm469_vm3, %v1004_v29, -inf }
 0x698   : > { %1014 = vmax.xlane.f32.xlu1 %v1013_v33  ;;  %v1007_v34 = vpop.f32.mrb[22].mxu0 }
 0x699   : > { %v1941_v35 = vpop.f32.mrb[23].mxu0 }
 0x6a9   : > { %1034 = vrot.lane.b32.xlu1 %v2263_v48, %s2114_s19 }
 0x6ad   : > { %1132 = vrot.lane.b32.xlu1 %v2235_v18, %s2115_s21 }
 0x6b1   : > { %1182 = vrot.lane.b32.xlu1 %v2237_v21, %s2115_s21 }
 0x6b5   : > { %1180 = vrot.lane.b32.xlu1 %v2249_v31, %s2116_s22 }
 0x721   : > { %v1012_v36 = vpop.xlane.xlu0 %1011 }
 0x722   : > { %v1016_v37 = vsub.f32 %v954_v23, %v1012_v36 }
 0x724   : > { %v1018_v38 = vmul.f32 1.442695, %v1016_v37 }
 0x725   : > { %v1015_v39 = vpop.xlane.xlu1 %1014 }
 0x726   : > { %2072 = vpow2.f32 %v1018_v38  ;;  %v1017_v40 = vsub.f32 %v1004_v29, %v1015_v39 }
 0x728   : > { %v1020_v41 = vmul.f32 1.442695, %v1017_v40 }
 0x729   : > { %v1035_v42 = vpop.permute.xlu1 %1034 }
 0x72a   : > { %2074 = vpow2.f32 %v1020_v41  ;;  %v1040_v43 = vsel %vm595_vm4, %v1035_v42, 0 }
 0x72b   : > { %1943 = vmatpush3.bf16.msra.mxu1 %v1040_v43 }
 0x72c   : > { %1954 = vmatprep.subr.bf16.mxu1 %v2104_v4 }
 0x72d   : > { %v1133_v52 = vpop.permute.xlu1 %1132 }
 0x72e   : > { %v1138_v56 = vsel %vm469_vm3, %v1133_v52, 0 }
 0x730   : > { %v2073_v18 = vpop.eup %2072 }
 0x731   : > { %v1022_v21 = vsel %vm469_vm3, %v2073_v18, 0.0 }
 0x732   : > { %1023 = vadd.xlane.f32.xlu0 %v1022_v21 }
 0x734   : > { %v2075_v44 = vpop.eup %2074 }
 0x735   : > { %v1025_v31 = vsel %vm469_vm3, %v2075_v44, 0.0 }
 0x736   : > { %1026 = vadd.xlane.f32.xlu0 %v1025_v31 }
 0x74c   : > { %1082 = vrot.lane.b32.xlu0 %v2265_v49, %s2114_s19 }
 0x750   : > { %1130 = vrot.lane.b32.xlu0 %v2247_v30, %s2116_s22  ;;  %v1183_v30 = vpop.permute.xlu1 %1182 }
 0x751   : > { %v1188_v59 = vsel %vm469_vm3, %v1183_v30, 0 }
 0x754   : > { %v1181_v61 = vpop.permute.xlu1 %1180 }
 0x7bf   : > { %v1024_v45 = vpop.xlane.xlu0 %1023 }
 0x7c0   : > { %2076 = vrcp.f32 %v1024_v45  ;;  %v2048_v45 = vld [vmem:[%s2183_s11] sm:$0xff]  }
 0x7c3   : > { %v1027_v46 = vpop.xlane.xlu0 %1026 }
 0x7c4   : > { %2078 = vrcp.f32 %v1027_v46  ;;  %v2049_v46 = vld [vmem:[%s2183_s11 + $0x8] sm:$0xff]  }
 0x7c7   : > { %v1083_v47 = vpop.permute.xlu0 %1082 }
 0x7c8   : > { %v1088_v50 = vsel %vm595_vm4, %v1083_v47, 0 }
 0x7c9   : > { %1949 = vmatpush3.bf16.msra.mxu0 %v1088_v50 }
 0x7ca   : > { %v2077_v51 = vpop.eup %2076  ;;  %1960 = vmatprep.subr.bf16.mxu0 %v2104_v4 }
 0x7cb   : > { %v1030_v53 = vmul.f32 %v2077_v51, %v2073_v18  ;;  %v1131_v60 = vpop.permute.xlu0 %1130 }
 0x7cd   : > { %v1032_v54 = vpack.c.bf16 %v1030_v53, %v1030_v53 }
 0x7ce   : > { %v2079_v55 = vpop.eup %2078 }
 0x7cf   : > { %v1031_v57 = vmul.f32 %v2079_v55, %v2075_v44  ;;  %1945 = vmatmul.mubr.msk.bf16.vlgmr.msra.gmra.mrb[20].mxu1 %vm469_vm3, %v1032_v54 }
 0x7d0   : > { %1955 = vmatpush3.bf16.xpose.msra.mxu1 %v1138_v56  ;;  %1956 = vmatprep.mubr.msk.bf16.mxu1 %vm2105_vm1, %v2104_v4 }
 0x7d1   : > { %v1033_v58 = vpack.c.bf16 %v1031_v57, %v1031_v57  ;;  %1966 = vmatprep.subr.bf16.mxu1 %v2104_v4 }
 0x7d3   : > { %1951 = vmatmul.mubr.msk.bf16.vlgmr.msra.gmra.mrb[24].mxu0 %vm469_vm3, %v1033_v58 }
 0x7d4   : > { %1961 = vmatpush3.bf16.xpose.msra.mxu0 %v1188_v59  ;;  %1962 = vmatprep.mubr.msk.bf16.mxu0 %vm2105_vm1, %v2104_v4 }
 0x7d5   : > { %1972 = vmatprep.subr.bf16.mxu0 %v2104_v4 }
 0x7d7   : > { %1957 = vmatmul.mubr.msk.bf16.vlgmr.msra.gmra.mrb[24].mxu1 %vm469_vm3, %v1131_v60 }
 0x7d8   : > { %1968 = vmatprep.mubr.msk.bf16.mxu1 %vm2105_vm1, %v2104_v4 }
 0x7db   : > { %1963 = vmatmul.mubr.msk.bf16.vlgmr.msra.gmra.mrb[28].mxu0 %vm469_vm3, %v1181_v61 }
 0x7dc   : > { %1974 = vmatprep.mubr.msk.bf16.mxu0 %vm2105_vm1, %v2104_v4 }
 0x8a2   : > { %v1076_v62 = vpop.f32.mrb[20].mxu1 }
 0x8a3   : > { %v1946_v63 = vpop.f32.mrb[21].mxu1 }
 0x8a4   : > { %v1079_v0 = vpop.f32.mrb[22].mxu1 }
 0x8a5   : > { %v1947_v1 = vpop.f32.mrb[23].mxu1 }
 0x8a6   : > { %v1124_v2 = vpop.f32.mrb[24].mxu0 }
 0x8a7   : > { %v2036_v3 = vpack.i.bf16 %v1124_v2, %v1076_v62  ;;  %v1952_v5 = vpop.f32.mrb[25].mxu0 }
 0x8a8   : > { %v1127_v10 = vpop.f32.mrb[26].mxu0 }
 0x8a9   : > { %v1953_v12 = vpop.f32.mrb[27].mxu0 }
 0x8aa   : > { %v1174_v13 = vpop.f32.mrb[24].mxu1 }
 0x8ab   : > { %v1958_v14 = vpop.f32.mrb[25].mxu1  ;;  %v1230_v17 = vsel %vm469_vm3, %v1174_v13, -inf }
 0x8ac   : > { %1231 = vmax.xlane.f32.xlu0 %v1230_v17  ;;  %v1177_v20 = vpop.f32.mrb[26].mxu1  ;;  %v1389_v17 = vsub.s32 3, %v2222_v9 }
 0x8ad   : > { %v1959_v22 = vpop.f32.mrb[27].mxu1 }
 0x8ae   : > { %v1224_v23 = vpop.f32.mrb[28].mxu0  ;;  %v1390_v20 = vrot.slane %v2220_v8, %v1389_v17 }
 0x8af   : > { %v1964_v25 = vpop.f32.mrb[29].mxu0  ;;  %v1233_v26 = vsel %vm469_vm3, %v1224_v23, -inf }
 0x8b0   : > { %1234 = vmax.xlane.f32.xlu1 %v1233_v26  ;;  %v1227_v27 = vpop.f32.mrb[30].mxu0 }
 0x8b1   : > { %v1965_v28 = vpop.f32.mrb[31].mxu0 }
 0x8c1   : > { %1254 = vrot.lane.b32.xlu1 %v2263_v48, %s2117_s29 }
 0x8c5   : > { %2032 = vrot.lane.b32.xlu1 %v2031_v16, %s2118_s30 }
 0x8c9   : > { %2037 = vrot.lane.b32.xlu1 %v2036_v3, %s2119_s9 }
 0x939   : > { %v1232_v29 = vpop.xlane.xlu0 %1231 }
 0x93a   : > { %v1236_v32 = vsub.f32 %v1174_v13, %v1232_v29 }
 0x93c   : > { %v1238_v33 = vmul.f32 1.442695, %v1236_v32 }
 0x93d   : > { %v1235_v34 = vpop.xlane.xlu1 %1234 }
 0x93e   : > { %2080 = vpow2.f32 %v1238_v33  ;;  %v1237_v35 = vsub.f32 %v1224_v23, %v1235_v34 }
 0x940   : > { %v1240_v36 = vmul.f32 1.442695, %v1237_v35 }
 0x941   : > { %v1255_v37 = vpop.permute.xlu1 %1254 }
 0x942   : > { %2082 = vpow2.f32 %v1240_v36  ;;  %v1260_v38 = vsel %vm595_vm4, %v1255_v37, 0 }
 0x943   : > { %1967 = vmatpush3.bf16.msra.mxu1 %v1260_v38 }
 0x944   : > { %1978 = vmatprep.subr.bf16.mxu1 %v2104_v4 }
 0x945   : > { %v2033_v30 = vpop.permute.xlu1 %2032 }
 0x946   : > { %v2035_v59 = vunpack.i.h.bf16 %v2033_v30  ;;  %v2034_v60 = vunpack.i.l.bf16 %v2033_v30  ;;  %v2054_v30 = vld [vmem:[%s2193_s17 + $0x10] sm:$0xff]  }
 0x948   : > { %v2081_v48 = vpop.eup %2080  ;;  %v1375_v0 = vsel %vm469_vm3, %v2297_v24, %v2035_v59  ;;  %v1374_v1 = vsel %vm469_vm3, %v2295_v19, %v2034_v60  ;;  %v1810_v59 = vld [vmem:[%s352_s20] ss:$0 sm:$0xff] }
 0x949   : > { %v1242_v11 = vsel %vm469_vm3, %v2081_v48, 0.0  ;;  %v2038_v58 = vpop.permute.xlu1 %2037 }
 0x94a   : > { %1243 = vadd.xlane.f32.xlu0 %v1242_v11  ;;  %v2040_v61 = vunpack.i.h.bf16 %v2038_v58  ;;  %v2039_v62 = vunpack.i.l.bf16 %v2038_v58  ;;  %v2055_v58 = vld [vmem:[%s2193_s17 + $0x18] sm:$0xff]  }
 0x94c   : > { %v2083_v15 = vpop.eup %2082  ;;  %v1377_v5 = vsel %vm1376_vm5, %v1374_v1, %v2039_v62  ;;  %v1378_v10 = vsel %vm1376_vm5, %v1375_v0, %v2040_v61 }
 0x94d   : > { %v1245_v16 = vsel %vm469_vm3, %v2083_v15, 0.0 }
 0x94e   : > { %1246 = vadd.xlane.f32.xlu0 %v1245_v16  ;;  %v2051_v16 = vld [vmem:[%s2188_s14 + $0x8] sm:$0xff]  }
 0x964   : > { %1302 = vrot.lane.b32.xlu0 %v2265_v49, %s2117_s29 }
 0x9d7   : > { %v1244_v39 = vpop.xlane.xlu0 %1243 }
 0x9d8   : > { %2084 = vrcp.f32 %v1244_v39  ;;  %v2052_v39 = vld [vmem:[%s2193_s17] sm:$0xff]  }
 0x9db   : > { %v1247_v40 = vpop.xlane.xlu0 %1246 }
 0x9dc   : > { %2086 = vrcp.f32 %v1247_v40  ;;  %v2053_v40 = vld [vmem:[%s2193_s17 + $0x8] sm:$0xff]  }
 0x9df   : > { %v1303_v41 = vpop.permute.xlu0 %1302 }
 0x9e0   : > { %v1308_v42 = vsel %vm595_vm4, %v1303_v41, 0 }
 0x9e1   : > { %1973 = vmatpush3.bf16.msra.mxu0 %v1308_v42 }
 0x9e2   : > { %v2085_v43 = vpop.eup %2084  ;;  %1986 = vmatprep.subr.bf16.mxu0 %v2104_v4 }
 0x9e3   : > { %v1250_v18 = vmul.f32 %v2085_v43, %v2081_v48 }
 0x9e5   : > { %v1252_v21 = vpack.c.bf16 %v1250_v18, %v1250_v18 }
 0x9e6   : > { %v2087_v44 = vpop.eup %2086 }
 0x9e7   : > { %v1251_v31 = vmul.f32 %v2087_v44, %v2083_v15  ;;  %1969 = vmatmul.mubr.msk.bf16.vlgmr.msra.gmra.mrb[28].mxu1 %vm469_vm3, %v1252_v21  ;;  %v2050_v15 = vld [vmem:[%s2188_s14] sm:$0xff]  }
 0x9e8   : > { %1982 = vmatprep.mubr.msk.bf16.mxu1 %vm2105_vm1, %v2104_v4  ;;  %1979 = vmatpush3.bf16.msra.mxu1 %v2048_v45  ;;  %v1484_v45 = vsub.s32 5, %v2222_v9 }
 0x9e9   : > { %v1253_v49 = vpack.c.bf16 %v1251_v31, %v1251_v31  ;;  %1980 = vmatprep.subr.bf16.mxu1 %v2104_v4  ;;  %v1478_v31 = vsub.s32 4, %v2222_v9 }
 0x9eb   : > { %1975 = vmatmul.mubr.msk.bf16.vlgmr.msra.gmra.mrb[32].mxu0 %vm469_vm3, %v1253_v49  ;;  %v1479_v49 = vrot.slane %v2220_v8, %v1478_v31 }
 0x9ec   : > { %1990 = vmatprep.mubr.msk.bf16.mxu0 %vm2105_vm1, %v2104_v4  ;;  %1981 = vmatpush3.bf16.msra.mxu1 %v2049_v46 }
 0x9ed   : > { %1994 = vmatprep.subr.bf16.mxu1 %v2104_v4  ;;  %1987 = vmatpush3.bf16.msra.mxu0 %v2050_v15 }
 0x9ee   : > { %1988 = vmatprep.subr.bf16.mxu0 %v2104_v4 }
 0x9f1   : > { %1989 = vmatpush3.bf16.msra.mxu0 %v2051_v16  ;;  %v1670_v16 = vsub.s32 7, %v2222_v9 }
 0xaba   : > { %v1296_v47 = vpop.f32.mrb[28].mxu1 }
 0xabb   : > { %v1970_v50 = vpop.f32.mrb[29].mxu1 }
 0xabc   : > { %v1299_v51 = vpop.f32.mrb[30].mxu1 }
 0xabd   : > { %v1971_v52 = vpop.f32.mrb[31].mxu1 }
 0xabe   : > { %v1344_v53 = vpop.f32.mrb[32].mxu0 }
 0xabf   : > { %v2041_v54 = vpack.i.bf16 %v1344_v53, %v1296_v47  ;;  %v1976_v55 = vpop.f32.mrb[33].mxu0  ;;  %v1485_v53 = vrot.slane %v2220_v8, %v1484_v45 }
 0xac0   : > { %v1347_v56 = vpop.f32.mrb[34].mxu0 }
 0xac1   : > { %2042 = vrot.lane.b32.xlu0 %v2041_v54, %s2120_s28  ;;  %v1977_v57 = vpop.f32.mrb[35].mxu0 }
 0xb33   : > { %v2043_v63 = vpop.permute.xlu0 %2042 }
 0xb34   : > { %v2045_v2 = vunpack.i.h.bf16 %v2043_v63  ;;  %v2044_v3 = vunpack.i.l.bf16 %v2043_v63 }
 0xb36   : > { %v1381_v12 = vsel %vm1379_vm6, %v1378_v10, %v2045_v2  ;;  %v1380_v13 = vsel %vm1379_vm6, %v1377_v5, %v2044_v3 }
 0xb37   : > { %v1382_v14 = vpack.c.bf16 %v1381_v12, %v1380_v13 }
 0xb39   : > { %1983 = vmatmul.mubr.msk.bf16.vlgmr.msra.gmra.mrb[32].mxu1 %vm389_vm2, %v1382_v14 }
 0xb3a   : > { %2002 = vmatprep.mubr.msk.bf16.mxu1 %vm2105_vm1, %v2104_v4  ;;  %1995 = vmatpush3.bf16.msra.mxu1 %v2052_v39  ;;  %v1671_v39 = vrot.slane %v2220_v8, %v1670_v16 }
 0xb3b   : > { %1996 = vmatprep.subr.bf16.mxu1 %v2104_v4 }
 0xb3e   : > { %1997 = vmatpush3.bf16.msra.mxu1 %v2053_v40 }
 0xb3f   : > { %1998 = vmatprep.subr.bf16.mxu1 %v2104_v4 }
 0xb42   : > { %1999 = vmatpush3.bf16.msra.mxu1 %v2054_v30 }
 0xb43   : > { %2000 = vmatprep.subr.bf16.mxu1 %v2104_v4  ;;  %v1569_v4 = vsub.s32 6, %v2222_v9 }
 0xb45   : > { %v1570_v10 = vrot.slane %v2220_v8, %v1569_v4 }
 0xb46   : > { %2001 = vmatpush3.bf16.msra.mxu1 %v2055_v58 }
 0xc0c   : > { %v1440_v24 = vpop.f32.mrb[32].mxu1 }
 0xc0d   : > { %v1441_v22 = vadd.f32 %v1440_v24, %v1390_v20  ;;  %v1984_v23 = vpop.f32.mrb[33].mxu1 }
 0xc0e   : > { %v1443_v19 = vpop.f32.mrb[34].mxu1 }
 0xc0f   : > { %v1444_v25 = vadd.f32 %v1443_v19, %v1390_v20  ;;  %v1985_v26 = vpop.f32.mrb[35].mxu1  ;;  %v1447_v27 = vadd.f32 %v1441_v22, %v2215_v6 }
 0xc11   : > { %v1449_v28 = vsel %vm389_vm2, %v1447_v27, 0.0  ;;  %v1448_v29 = vadd.f32 %v1444_v25, %v2217_v7 }
 0xc12   : > { %1450 = vadd.xlane.f32.xlu1 %v1449_v28 }
 0xc13   : > { %v1452_v32 = vsel %vm389_vm2, %v1448_v29, 0.0 }
 0xc14   : > { %1453 = vadd.xlane.f32.xlu0 %v1452_v32 }
 0xc9f   : > { %v1451_v33 = vpop.xlane.xlu1 %1450 }
 0xca0   : > { %v1456_v34 = vmul.f32 0.03125, %v1451_v33 }
 0xca1   : > { %v1454_v35 = vpop.xlane.xlu0 %1453 }
 0xca2   : > { %v1458_v36 = vsub.f32 %v1447_v27, %v1456_v34  ;;  %v1457_v37 = vmul.f32 0.03125, %v1454_v35 }
 0xca4   : > { %v1459_v38 = vsub.f32 %v1448_v29, %v1457_v37  ;;  %v1460_v48 = vmul.f32 %v1458_v36, %v1458_v36 }
 0xca6   : > { %v1462_v6 = vsel %vm389_vm2, %v1460_v48, 0.0  ;;  %v1461_v11 = vmul.f32 %v1459_v38, %v1459_v38 }
 0xca7   : > { %1463 = vadd.xlane.f32.xlu0 %v1462_v6 }
 0xca8   : > { %v1465_v7 = vsel %vm389_vm2, %v1461_v11, 0.0 }
 0xca9   : > { %1466 = vadd.xlane.f32.xlu1 %v1465_v7 }
 0xd34   : > { %v1464_v41 = vpop.xlane.xlu0 %1463 }
 0xd35   : > { %v1468_v42 = vmul.f32 0.03125, %v1464_v41 }
 0xd36   : > { %v1467_v43 = vpop.xlane.xlu1 %1466 }
 0xd37   : > { %v1470_v18 = vadd.f32 1e-05, %v1468_v42  ;;  %v1469_v21 = vmul.f32 0.03125, %v1467_v43  ;;  %v1819_v43 = vld [vmem:[%s2202_s23 + $0x8] ss:$0 sm:$0xff] }
 0xd39   : > { %2088 = vrsqrt.f32 %v1470_v18  ;;  %v1471_v44 = vadd.f32 1e-05, %v1469_v21 }
 0xd3b   : > { %2090 = vrsqrt.f32 %v1471_v44 }
 0xd43   : > { %v2089_v46 = vpop.eup %2088 }
 0xd44   : > { %v1474_v47 = vmul.f32 %v2089_v46, %v1458_v36 }
 0xd45   : > { %v2091_v50 = vpop.eup %2090 }
 0xd46   : > { %v1480_v51 = vmul.f32 %v1479_v49, %v1474_v47  ;;  %v1475_v52 = vmul.f32 %v2091_v50, %v1459_v38 }
 0xd48   : > { %v1481_v54 = vmul.f32 %v1479_v49, %v1475_v52  ;;  %v1486_v55 = vadd.f32 %v1485_v53, %v1480_v51 }
 0xd4a   : > { %v1487_v56 = vadd.f32 %v1485_v53, %v1481_v54 }
 0xd4c   : > { %v1488_v57 = vpack.c.bf16 %v1487_v56, %v1486_v55 }
 0xd4e   : > { %1991 = vmatmul.mubr.msk.bf16.vlgmr.msra.gmra.mrb[36].mxu0 %vm389_vm2, %v1488_v57 }
 0xe21   : > { %v1549_v60 = vpop.f32.mrb[36].mxu0 }
 0xe22   : > { %v1550_v61 = vadd.f32 %v1810_v59, %v1549_v60  ;;  %v1992_v62 = vpop.f32.mrb[37].mxu0 }
 0xe23   : > { %v1552_v63 = vpop.f32.mrb[38].mxu0 }
 0xe24   : > { %v1553_v0 = vadd.f32 %v1810_v59, %v1552_v63  ;;  %v1993_v1 = vpop.f32.mrb[39].mxu0  ;;  %v1556_v2 = vmax.f32 %v1550_v61, 0.0 }
 0xe26   : > { %v1557_v3 = vmax.f32 %v1553_v0, 0.0 }
 0xe28   : > { %v1558_v5 = vpack.c.bf16 %v1557_v3, %v1556_v2 }
 0xe2a   : > { %2003 = vmatmul.mubr.msk.bf16.vlgmr.msra.gmra.mrb[36].mxu1 %vm1595_vm7, %v1558_v5 }
 0xefd   : > { %v1633_v12 = vpop.f32.mrb[36].mxu1 }
 0xefe   : > { %v1634_v13 = vadd.f32 %v1633_v12, %v1570_v10  ;;  %v2004_v14 = vpop.f32.mrb[37].mxu1 }
 0xeff   : > { %v1636_v17 = vpop.f32.mrb[38].mxu1 }
 0xf00   : > { %v1637_v20 = vadd.f32 %v1636_v17, %v1570_v10  ;;  %v2005_v24 = vpop.f32.mrb[39].mxu1  ;;  %v1640_v22 = vadd.f32 %v1634_v13, %v1486_v55 }
 0xf02   : > { %v1642_v23 = vsel %vm389_vm2, %v1640_v22, 0.0  ;;  %v1641_v19 = vadd.f32 %v1637_v20, %v1487_v56 }
 0xf03   : > { %1643 = vadd.xlane.f32.xlu0 %v1642_v23 }
 0xf04   : > { %v1645_v25 = vsel %vm389_vm2, %v1641_v19, 0.0 }
 0xf05   : > { %1646 = vadd.xlane.f32.xlu1 %v1645_v25 }
 0xf90   : > { %v1644_v26 = vpop.xlane.xlu0 %1643 }
 0xf91   : > { %v1648_v27 = vmul.f32 0.03125, %v1644_v26 }
 0xf92   : > { %v1647_v28 = vpop.xlane.xlu1 %1646 }
 0xf93   : > { %v1650_v29 = vsub.f32 %v1640_v22, %v1648_v27  ;;  %v1649_v32 = vmul.f32 0.03125, %v1647_v28 }
 0xf95   : > { %v1651_v33 = vsub.f32 %v1641_v19, %v1649_v32  ;;  %v1652_v34 = vmul.f32 %v1650_v29, %v1650_v29 }
 0xf97   : > { %v1654_v35 = vsel %vm389_vm2, %v1652_v34, 0.0  ;;  %v1653_v36 = vmul.f32 %v1651_v33, %v1651_v33 }
 0xf98   : > { %1655 = vadd.xlane.f32.xlu0 %v1654_v35 }
 0xf99   : > { %v1657_v37 = vsel %vm389_vm2, %v1653_v36, 0.0 }
 0xf9a   : > { %1658 = vadd.xlane.f32.xlu1 %v1657_v37 }
0x1025   : > { %v1656_v38 = vpop.xlane.xlu0 %1655 }
0x1026   : > { %v1660_v48 = vmul.f32 0.03125, %v1656_v38 }
0x1027   : > { %v1659_v6 = vpop.xlane.xlu1 %1658 }
0x1028   : > { %v1662_v11 = vadd.f32 1e-05, %v1660_v48  ;;  %v1661_v7 = vmul.f32 0.03125, %v1659_v6 }
0x102a   : > { %2092 = vrsqrt.f32 %v1662_v11  ;;  %v1663_v15 = vadd.f32 1e-05, %v1661_v7 }
0x102c   : > { %2094 = vrsqrt.f32 %v1663_v15 }
0x1034   : > { %v2093_v40 = vpop.eup %2092 }
0x1035   : > { %v1666_v41 = vmul.f32 %v2093_v40, %v1650_v29 }
0x1036   : > { %v2095_v42 = vpop.eup %2094 }
0x1037   : > { %v1672_v18 = vmul.f32 %v1671_v39, %v1666_v41  ;;  %v1667_v21 = vmul.f32 %v2095_v42, %v1651_v33  ;;  %1685 = sbr.rel (%p1820_p5) target bundleno = 4158 (0x103e), region = 56 }
0x1039   : > { %v1678_v44 = vadd.f32 %v1819_v43, %v1672_v18  ;;  %v1673_v31 = vmul.f32 %v1671_v39, %v1667_v21 }
0x103b   : > { %1680 = vst.msk [vmem:[#allocation2] sm:$0xff] %vm389_vm2, %v1678_v44  ;;  %v1679_v49 = vadd.f32 %v1819_v43, %v1673_v31  ;;  %1686 = vst.msk [vmem:[%s2453_s7] sm:$0xff] (!%p1820_p5), %vm389_vm2, %v1678_v44 }
0x103d   : > { %1681 = vst.msk [vmem:[#allocation2 + $0x8] sm:$0xff] %vm389_vm2, %v1679_v49  ;;  %1687 = vst.msk [vmem:[%s2453_s7 + $0x8] sm:$0xff] (!%p1820_p5), %vm389_vm2, %v1679_v49 }
0x103e PF: > { %s17_s24 = sadd.s32 1, %s2102_s24  }
0x103f   : > { %p14_p6 = scmp.ge.s32.totalorder %s17_s24, 4  }
0x1041   :  { %16 = sbr.rel (!%p14_p6) target bundleno = 1 (0x1), region = 97 }

// kernel: transformer_forward.3
= control target key start
LH: loop header
LB: loop body
LE: loop exit
PB: predicated region body
PF: predicated region fallthrough
CT: control target
= control target key end

     0   :  { %s4501_s0 = inlined_call_operand.vmem [shape: f32[16,32], index: 0, kind: input, shape index: {}]   ;;  %s4502_s1 = inlined_call_operand.vmem [shape: f32[16,32], index: 1, kind: input, shape index: {}]   ;;  %s4503_s2 = inlined_call_operand.vmem [shape: f32[8,8], index: 2, kind: input, shape index: {}]   ;;  %s4504_s3 = inlined_call_operand.vmem [shape: bf16[2,32,96], index: 3, kind: input, shape index: {}]   ;;  %s4505_s4 = inlined_call_operand.vmem [shape: bf16[2,32,32], index: 4, kind: input, shape index: {}]   ;;  %s4506_s5 = inlined_call_operand.vmem [shape: bf16[2,32,32], index: 5, kind: input, shape index: {}]   ;;  %s4507_s6 = inlined_call_operand.vmem [shape: bf16[2,32,64], index: 6, kind: input, shape index: {}]   ;;  %s4508_s7 = inlined_call_operand.vmem [shape: bf16[2,32,32], index: 7, kind: input, shape index: {}]   ;;  %s4509_s8 = inlined_call_operand.vmem [shape: bf16[2,32,64], index: 8, kind: input, shape index: {}]   ;;  %s4510_s9 = inlined_call_operand.vmem [shape: bf16[2,64,32], index: 9, kind: input, shape index: {}]   ;;  %s4511_s10 = inlined_call_operand.vmem [shape: f32[2,1,64], index: 10, kind: input, shape index: {}]   ;;  %s4512_s11 = inlined_call_operand.vmem [shape: f32[2,15,32], index: 11, kind: input, shape index: {}]   ;;  %s4513_s12 = inlined_call_operand.hbm [shape: f32[16,32], index: 12, kind: output, shape index: {}]  }
   0x1   :  { %4516 = sst [smem:[#allocation7_spill]] %s4504_s3 }
   0x2   :  { %4517 = sst [smem:[#allocation8_spill]] %s4505_s4 }
   0x3   :  { %4518 = sst [smem:[#allocation9_spill]] %s4506_s5 }
   0x4   :  { %4519 = sst [smem:[#allocation10_spill]] %s4507_s6 }
   0x5   :  { %17 = vsyncpa [#allocation4], 0  ;;  %s3895_s21 = smov 0  }
   0x6 LB: > { %4520 = sst [smem:[#allocation6_spill]] %s3809_s21  ;;  %s3901_s22 = sadd.s32 4294967295, %s3809_s21   ;;  %s3809_s21 = sphi %s3895_s21, %s23_s21  }
   0x7   : > { %p3192_p0 = scmp.ge.s32.totalorder %s3809_s21, 1  ;;  %p436_p1 = scmp.lt.s32.totalorder %s3809_s21, 3 }
   0x9   : > { %p437_p2 = pnand %p3192_p0, %p436_p1 }
   0xa   : > { %p511_p3 = scmp.lt.s32.totalorder (!%p437_p2), %s3901_s22, 1  ;;  %s4521_s3 = sld [smem:[#allocation7_spill]] (!%p437_p2) }
   0xb   : > { %440 = sbr.rel (%p437_p2) target bundleno = 7448 (0x1d18), region = 68  ;;  %s4522_s4 = sld [smem:[#allocation8_spill]] (!%p437_p2) }
   0xc   : > { %s4523_s5 = sld [smem:[#allocation9_spill]] (!%p437_p2)  ;;  %s4524_s6 = sld [smem:[#allocation10_spill]] (!%p437_p2) }
   0xd   : > { %p3209_p4 = scmp.ne.s32.totalorder (!%p437_p2), %s3901_s22, 0 }
  0x12   : > { %s3907_s23 = scalar_select %p511_p3, %s3901_s22, 1 }
  0x13   : > { %558 = sbr.rel (%p3209_p4) target bundleno = 26 (0x1a), region = 72  ;;  %v559_v0 = vld [vmem:[%s4501_s0] sm:$0xff] (!%p3209_p4)  ;;  %vm561_vm0 = vcmask (!%p3209_p4), 261120   ;;  %v560_v1 = vld [vmem:[%s4501_s0 + $0x8] sm:$0xff] (!%p3209_p4) }
  0x14   : > { %s3271_s24 = sshll.u32 %s3907_s23, 4  ;;  %s3277_s25 = sshll.u32 %s3907_s23, 5  ;;  %562 = vst.msk [vmem:[#allocation2] sm:$0xff] (!%p3209_p4), %vm561_vm0, %v559_v0  ;;  %563 = vst.msk [vmem:[#allocation2 + $0x8] sm:$0xff] (!%p3209_p4), %vm561_vm0, %v560_v1 }
  0x15   : > { %s515_s28 = scalar_lea.vmem %s4521_s3, %s3271_s24  ;;  %s3917_s13 = scalar_lea.vmem %s4522_s4, %s3271_s24 }
  0x16   : > { %s3922_s16 = scalar_lea.vmem %s4523_s5, %s3271_s24  ;;  %s3927_s19 = scalar_lea.vmem %s4524_s6, %s3271_s24 }
  0x17   : > { %s3932_s26 = scalar_lea.vmem %s4508_s7, %s3271_s24  ;;  %s3937_s29 = scalar_lea.vmem %s4509_s8, %s3271_s24 }
  0x18   : > { %s3942_s14 = scalar_lea.vmem %s4510_s9, %s3277_s25  ;;  %s3951_s21 = scalar_lea.vmem %s4512_s11, %s3271_s24 }
  0x1a PF: > { %v3681_v2 = vld [vmem:[%s515_s28] sm:$0xff]   ;;  %v631_v3 = vlaneseq  ;;  %v3811_v4 = vmov 0.0   ;;  %v3682_v5 = vld [vmem:[%s515_s28 + $0x8] sm:$0xff]   ;;  %vm3812_vm1 = vmmov 0   ;;  %vm586_vm2 = vcmask 261120   ;;  %s3813_s5 = smov 32  }
  0x1b   : > { %3366 = vmatprep.subr.bf16.mxu1 %v3811_v4  ;;  %3380 = vmatprep.subr.bf16.mxu0 %v3811_v4  ;;  %v3964_v6 = vld [vmem:[#allocation2] sm:$0xff]  ;;  %v3966_v7 = vld [vmem:[#allocation2 + $0x8] sm:$0xff]  ;;  %s3814_s6 = smov 96   ;;  %vm666_vm3 = vcmask 64512   ;;  %s3815_s27 = smov 64   ;;  %vm792_vm4 = vcmask 1043456  }
  0x1c   : > { %3367 = vmatpush3.bf16.msra.mxu1 %v3681_v2  ;;  %3370 = vmatprep.mubr.msk.bf16.mxu1 %vm3812_vm1, %v3811_v4  ;;  %v3969_v8 = vld [vmem:[%s3951_s21] sm:$0xff]  ;;  %v3971_v9 = vshrl.u32 %v631_v3, 7  ;;  %v569_v11 = vpack.c.bf16 %v3966_v7, %v3964_v6  ;;  %s3816_s30 = smov 88   ;;  %s3817_s15 = smov 120   ;;  %vm1573_vm5 = vcmask 130048   ;;  %vm1576_vm6 = vcmask 195584  }
  0x1d   : > { %3368 = vmatprep.subr.bf16.mxu1 %v3811_v4  ;;  %3382 = vmatprep.mubr.msk.bf16.mxu0 %vm3812_vm1, %v3811_v4  ;;  %v4018_v32 = vld [vmem:[%s4503_s2] sm:$0xff]  ;;  %s3818_s18 = smov 56   ;;  %s3819_s3 = smov 80   ;;  %vm2955_vm7 = vcmask 523264  }
  0x1e   : > { %v639_v10 = vsub.s32 1, %v3971_v9  ;;  %v633_v22 = vsub.s32 0, %v3971_v9  ;;  %v649_v45 = vsub.s32 2, %v3971_v9  ;;  %s3820_s20 = smov 112   ;;  %s3821_s4 = smov 48  }
  0x1f   : > { %s3822_s25 = smov 72   ;;  %s3823_s24 = smov 104  }
  0x20   : > { %3369 = vmatpush3.bf16.msra.mxu1 %v3682_v5  ;;  %v640_v12 = vrot.slane %v3969_v8, %v639_v10  ;;  %v634_v23 = vrot.slane %v3969_v8, %v633_v22  ;;  %v650_v46 = vrot.slane %v3969_v8, %v649_v45  ;;  %s3824_s28 = smov 40   ;;  %p3266_p5 = scmp.ne.s32.totalorder %s3901_s22, 1 }
  0x21   : > { %3374 = vmatprep.subr.bf16.mxu1 %v3811_v4 }
  0x22   : > { %642 = vrot.lane.b32.xlu0 %v640_v12, %s3813_s5 }
  0x23   : > { %3371 = vmatmul.mubr.msk.bf16.vlgmr.msra.gmra.mrb[0].mxu1 %vm586_vm2, %v569_v11 }
  0x24   : > { %3376 = vmatprep.mubr.msk.bf16.mxu1 %vm3812_vm1, %v3811_v4 }
  0x94   : > { %v643_v13 = vpop.permute.xlu0 %642 }
  0xf6   : > { %v624_v14 = vpop.f32.mrb[0].mxu1 }
  0xf7   : > { %v645_v15 = vadd.f32 %v643_v13, %v624_v14  ;;  %v3372_v16 = vpop.f32.mrb[1].mxu1  ;;  %v635_v27 = vadd.f32 %v634_v23, %v624_v14 }
  0xf8   : > { %v627_v17 = vpop.f32.mrb[2].mxu1 }
  0xf9   : > { %v3987_v18 = vpack.c.bf16 %v645_v15, %v645_v15  ;;  %v646_v19 = vadd.f32 %v643_v13, %v627_v17  ;;  %v3373_v20 = vpop.f32.mrb[3].mxu1  ;;  %v636_v29 = vadd.f32 %v634_v23, %v627_v17  ;;  %v4003_v30 = vpack.c.bf16 %v635_v27, %v635_v27 }
  0xfb   : > { %v3989_v21 = vpack.c.bf16 %v646_v19, %v646_v19  ;;  %664 = vrot.lane.b32.xlu0 %v3987_v18, %s3814_s6  ;;  %v4005_v31 = vpack.c.bf16 %v636_v29, %v636_v29 }
  0xfd   : > { %714 = vrot.lane.b32.xlu1 %v3989_v21, %s3814_s6 }
 0x16d   : > { %v665_v24 = vpop.permute.xlu0 %664 }
 0x16e   : > { %v671_v25 = vsel %vm666_vm3, %v665_v24, 0 }
 0x16f   : > { %3375 = vmatpush3.bf16.xpose.msra.mxu1 %v671_v25  ;;  %v715_v26 = vpop.permute.xlu1 %714 }
 0x170   : > { %v720_v28 = vsel %vm666_vm3, %v715_v26, 0  ;;  %3386 = vmatprep.subr.bf16.mxu1 %v3811_v4 }
 0x171   : > { %3381 = vmatpush3.bf16.xpose.msra.mxu0 %v720_v28 }
 0x172   : > { %3392 = vmatprep.subr.bf16.mxu0 %v3811_v4 }
 0x176   : > { %3377 = vmatmul.mubr.msk.bf16.vlgmr.msra.gmra.mrb[4].mxu1 %vm666_vm3, %v4003_v30 }
 0x177   : > { %3388 = vmatprep.mubr.msk.bf16.mxu1 %vm3812_vm1, %v3811_v4 }
 0x178   : > { %3383 = vmatmul.mubr.msk.bf16.vlgmr.msra.gmra.mrb[0].mxu0 %vm666_vm3, %v4005_v31 }
 0x179   : > { %3394 = vmatprep.mubr.msk.bf16.mxu0 %vm3812_vm1, %v3811_v4 }
 0x249   : > { %v707_v33 = vpop.f32.mrb[4].mxu1 }
 0x24a   : > { %v708_v34 = vadd.f32 %v707_v33, %v4018_v32  ;;  %v3378_v35 = vpop.f32.mrb[5].mxu1 }
 0x24b   : > { %v710_v36 = vpop.f32.mrb[6].mxu1  ;;  %v756_v37 = vpop.f32.mrb[0].mxu0 }
 0x24c   : > { %v757_v38 = vadd.f32 %v756_v37, %v4018_v32  ;;  %v3379_v39 = vpop.f32.mrb[7].mxu1  ;;  %v3384_v40 = vpop.f32.mrb[1].mxu0  ;;  %v762_v41 = vsel %vm666_vm3, %v708_v34, -inf }
 0x24d   : > { %v759_v42 = vpop.f32.mrb[2].mxu0  ;;  %763 = vmax.xlane.f32.xlu1 %v762_v41 }
 0x24e   : > { %v3385_v43 = vpop.f32.mrb[3].mxu0  ;;  %v765_v44 = vsel %vm666_vm3, %v757_v38, -inf }
 0x24f   : > { %766 = vmax.xlane.f32.xlu0 %v765_v44 }
 0x265   : > { %652 = vrot.lane.b32.xlu0 %v650_v46, %s3815_s27 }
 0x2da   : > { %v764_v53 = vpop.xlane.xlu1 %763 }
 0x2db   : > { %v768_v54 = vsub.f32 %v708_v34, %v764_v53 }
 0x2dc   : > { %v767_v47 = vpop.xlane.xlu0 %766 }
 0x2dd   : > { %v770_v55 = vmul.f32 1.442695, %v768_v54  ;;  %v769_v56 = vsub.f32 %v757_v38, %v767_v47 }
 0x2df   : > { %3697 = vpow2.f32 %v770_v55  ;;  %v772_v57 = vmul.f32 1.442695, %v769_v56 }
 0x2e0   : > { %v653_v48 = vpop.permute.xlu0 %652 }
 0x2e1   : > { %v655_v49 = vadd.f32 %v653_v48, %v624_v14  ;;  %v656_v50 = vadd.f32 %v653_v48, %v627_v17  ;;  %3699 = vpow2.f32 %v772_v57 }
 0x2e3   : > { %v4028_v51 = vpack.c.bf16 %v655_v49, %v655_v49  ;;  %v4030_v52 = vpack.c.bf16 %v656_v50, %v656_v50 }
 0x2e5   : > { %837 = vrot.lane.b32.xlu0 %v4030_v52, %s3815_s27  ;;  %787 = vrot.lane.b32.xlu1 %v4028_v51, %s3815_s27  ;;  %s3825_s27 = smov 8  }
 0x2e9   : > { %888 = vrot.lane.b32.xlu0 %v3987_v18, %s3816_s30  ;;  %v3698_v58 = vpop.eup %3697 }
 0x2ea   : > { %v774_v59 = vsel %vm666_vm3, %v3698_v58, 0.0 }
 0x2eb   : > { %v3700_v60 = vpop.eup %3699 }
 0x2ec   : > { %v777_v61 = vsel %vm666_vm3, %v3700_v60, 0.0 }
 0x2ed   : > { %886 = vrot.lane.b32.xlu0 %v4003_v30, %s3817_s15 }
 0x309   : > { %775 = vadd.xlane.f32.xlu1 %v774_v59 }
 0x30d   : > { %778 = vadd.xlane.f32.xlu1 %v777_v61 }
 0x31e   : > { %939 = vrot.lane.b32.xlu1 %v3989_v21, %s3816_s30 }
 0x322   : > { %937 = vrot.lane.b32.xlu1 %v4005_v31, %s3817_s15 }
 0x357   : > { %v838_v62 = vpop.permute.xlu0 %837  ;;  %v788_v63 = vpop.permute.xlu1 %787 }
 0x358   : > { %v843_v0 = vsel %vm792_vm4, %v838_v62, 0  ;;  %v794_v1 = vsel %vm792_vm4, %v788_v63, 0 }
 0x359   : > { %3387 = vmatpush3.bf16.msra.mxu1 %v794_v1  ;;  %3393 = vmatpush3.bf16.msra.mxu0 %v843_v0 }
 0x35a   : > { %3398 = vmatprep.subr.bf16.mxu1 %v3811_v4  ;;  %3404 = vmatprep.subr.bf16.mxu0 %v3811_v4 }
 0x35b   : > { %v889_v12 = vpop.permute.xlu0 %888 }
 0x35c   : > { %v894_v15 = vsel %vm666_vm3, %v889_v12, 0 }
 0x35f   : > { %v887_v23 = vpop.permute.xlu0 %886 }
 0x396   : > { %v776_v2 = vpop.xlane.xlu1 %775 }
 0x397   : > { %3701 = vrcp.f32 %v776_v2 }
 0x39a   : > { %v779_v3 = vpop.xlane.xlu1 %778 }
 0x39b   : > { %3703 = vrcp.f32 %v779_v3 }
 0x39e   : > { %v940_v17 = vpop.permute.xlu1 %939 }
 0x39f   : > { %v945_v20 = vsel %vm666_vm3, %v940_v17, 0 }
 0x3a1   : > { %v3702_v5 = vpop.eup %3701 }
 0x3a2   : > { %v782_v11 = vmul.f32 %v3702_v5, %v3698_v58  ;;  %v938_v24 = vpop.permute.xlu1 %937 }
 0x3a4   : > { %v784_v13 = vpack.c.bf16 %v782_v11, %v782_v11 }
 0x3a5   : > { %v3704_v14 = vpop.eup %3703 }
 0x3a6   : > { %v783_v16 = vmul.f32 %v3704_v14, %v3700_v60  ;;  %3389 = vmatmul.mubr.msk.bf16.vlgmr.msra.gmra.mrb[8].mxu1 %vm666_vm3, %v784_v13 }
 0x3a7   : > { %3399 = vmatpush3.bf16.xpose.msra.mxu1 %v894_v15  ;;  %3400 = vmatprep.mubr.msk.bf16.mxu1 %vm3812_vm1, %v3811_v4 }
 0x3a8   : > { %v785_v19 = vpack.c.bf16 %v783_v16, %v783_v16  ;;  %3410 = vmatprep.subr.bf16.mxu1 %v3811_v4 }
 0x3aa   : > { %3395 = vmatmul.mubr.msk.bf16.vlgmr.msra.gmra.mrb[4].mxu0 %vm666_vm3, %v785_v19 }
 0x3ab   : > { %3405 = vmatpush3.bf16.xpose.msra.mxu0 %v945_v20  ;;  %3406 = vmatprep.mubr.msk.bf16.mxu0 %vm3812_vm1, %v3811_v4 }
 0x3ac   : > { %3416 = vmatprep.subr.bf16.mxu0 %v3811_v4 }
 0x3ae   : > { %3401 = vmatmul.mubr.msk.bf16.vlgmr.msra.gmra.mrb[12].mxu1 %vm666_vm3, %v887_v23 }
 0x3af   : > { %3412 = vmatprep.mubr.msk.bf16.mxu1 %vm3812_vm1, %v3811_v4 }
 0x3b2   : > { %3407 = vmatmul.mubr.msk.bf16.vlgmr.msra.gmra.mrb[8].mxu0 %vm666_vm3, %v938_v24 }
 0x3b3   : > { %3418 = vmatprep.mubr.msk.bf16.mxu0 %vm3812_vm1, %v3811_v4 }
 0x479   : > { %v4064_v25 = vpop.f32.mrb[8].mxu1 }
 0x47a   : > { %v3390_v26 = vpop.f32.mrb[9].mxu1 }
 0x47b   : > { %v833_v27 = vpop.f32.mrb[10].mxu1 }
 0x47c   : > { %v3391_v28 = vpop.f32.mrb[11].mxu1 }
 0x47d   : > { %v4066_v29 = vpop.f32.mrb[4].mxu0 }
 0x47e   : > { %v3396_v33 = vpop.f32.mrb[5].mxu0 }
 0x47f   : > { %v882_v34 = vpop.f32.mrb[6].mxu0 }
 0x480   : > { %v3397_v35 = vpop.f32.mrb[7].mxu0 }
 0x481   : > { %v930_v36 = vpop.f32.mrb[12].mxu1 }
 0x482   : > { %v931_v37 = vadd.f32 %v930_v36, %v4018_v32  ;;  %v3402_v38 = vpop.f32.mrb[13].mxu1 }
 0x483   : > { %v933_v39 = vpop.f32.mrb[14].mxu1 }
 0x484   : > { %v3403_v40 = vpop.f32.mrb[15].mxu1  ;;  %v987_v41 = vsel %vm666_vm3, %v931_v37, -inf }
 0x485   : > { %v981_v42 = vpop.f32.mrb[8].mxu0  ;;  %988 = vmax.xlane.f32.xlu0 %v987_v41 }
 0x486   : > { %v982_v43 = vadd.f32 %v981_v42, %v4018_v32  ;;  %v3408_v44 = vpop.f32.mrb[9].mxu0 }
 0x487   : > { %v984_v46 = vpop.f32.mrb[10].mxu0 }
 0x488   : > { %v3409_v47 = vpop.f32.mrb[11].mxu0  ;;  %v990_v48 = vsel %vm666_vm3, %v982_v43, -inf }
 0x489   : > { %991 = vmax.xlane.f32.xlu1 %v990_v48 }
 0x49a   : > { %1011 = vrot.lane.b32.xlu1 %v4028_v51, %s3818_s18 }
 0x49e   : > { %1109 = vrot.lane.b32.xlu1 %v3987_v18, %s3819_s3 }
 0x4a2   : > { %1159 = vrot.lane.b32.xlu1 %v3989_v21, %s3819_s3 }
 0x4a6   : > { %1157 = vrot.lane.b32.xlu1 %v4005_v31, %s3820_s20 }
 0x512   : > { %v989_v49 = vpop.xlane.xlu0 %988 }
 0x513   : > { %v993_v50 = vsub.f32 %v931_v37, %v989_v49 }
 0x515   : > { %v995_v53 = vmul.f32 1.442695, %v993_v50 }
 0x516   : > { %v992_v54 = vpop.xlane.xlu1 %991 }
 0x517   : > { %3705 = vpow2.f32 %v995_v53  ;;  %v994_v55 = vsub.f32 %v982_v43, %v992_v54 }
 0x519   : > { %v997_v56 = vmul.f32 1.442695, %v994_v55 }
 0x51a   : > { %v1012_v57 = vpop.permute.xlu1 %1011 }
 0x51b   : > { %3707 = vpow2.f32 %v997_v56  ;;  %v1017_v58 = vsel %vm792_vm4, %v1012_v57, 0 }
 0x51c   : > { %3411 = vmatpush3.bf16.msra.mxu1 %v1017_v58 }
 0x51d   : > { %3422 = vmatprep.subr.bf16.mxu1 %v3811_v4 }
 0x51e   : > { %v1110_v5 = vpop.permute.xlu1 %1109 }
 0x51f   : > { %v1115_v14 = vsel %vm666_vm3, %v1110_v5, 0 }
 0x521   : > { %v3706_v59 = vpop.eup %3705 }
 0x522   : > { %v999_v60 = vsel %vm666_vm3, %v3706_v59, 0.0  ;;  %v1160_v16 = vpop.permute.xlu1 %1159 }
 0x523   : > { %1000 = vadd.xlane.f32.xlu0 %v999_v60  ;;  %v1165_v19 = vsel %vm666_vm3, %v1160_v16, 0 }
 0x525   : > { %v3708_v61 = vpop.eup %3707 }
 0x526   : > { %v1002_v62 = vsel %vm666_vm3, %v3708_v61, 0.0  ;;  %v1158_v23 = vpop.permute.xlu1 %1157 }
 0x527   : > { %1003 = vadd.xlane.f32.xlu0 %v1002_v62 }
 0x53d   : > { %1059 = vrot.lane.b32.xlu0 %v4030_v52, %s3818_s18  ;;  %s3826_s18 = smov 16  }
 0x541   : > { %1107 = vrot.lane.b32.xlu0 %v4003_v30, %s3820_s20 }
 0x5b0   : > { %v1001_v63 = vpop.xlane.xlu0 %1000 }
 0x5b1   : > { %3709 = vrcp.f32 %v1001_v63 }
 0x5b4   : > { %v1004_v0 = vpop.xlane.xlu0 %1003 }
 0x5b5   : > { %3711 = vrcp.f32 %v1004_v0 }
 0x5b8   : > { %v1060_v1 = vpop.permute.xlu0 %1059 }
 0x5b9   : > { %v1065_v2 = vsel %vm792_vm4, %v1060_v1, 0 }
 0x5ba   : > { %3417 = vmatpush3.bf16.msra.mxu0 %v1065_v2 }
 0x5bb   : > { %v3710_v3 = vpop.eup %3709  ;;  %3428 = vmatprep.subr.bf16.mxu0 %v3811_v4 }
 0x5bc   : > { %v1007_v11 = vmul.f32 %v3710_v3, %v3706_v59  ;;  %v1108_v20 = vpop.permute.xlu0 %1107 }
 0x5be   : > { %v1009_v12 = vpack.c.bf16 %v1007_v11, %v1007_v11 }
 0x5bf   : > { %v3712_v13 = vpop.eup %3711 }
 0x5c0   : > { %v1008_v15 = vmul.f32 %v3712_v13, %v3708_v61  ;;  %3413 = vmatmul.mubr.msk.bf16.vlgmr.msra.gmra.mrb[16].mxu1 %vm666_vm3, %v1009_v12 }
 0x5c1   : > { %3423 = vmatpush3.bf16.xpose.msra.mxu1 %v1115_v14  ;;  %3424 = vmatprep.mubr.msk.bf16.mxu1 %vm3812_vm1, %v3811_v4 }
 0x5c2   : > { %v1010_v17 = vpack.c.bf16 %v1008_v15, %v1008_v15  ;;  %3434 = vmatprep.subr.bf16.mxu1 %v3811_v4 }
 0x5c4   : > { %3419 = vmatmul.mubr.msk.bf16.vlgmr.msra.gmra.mrb[12].mxu0 %vm666_vm3, %v1010_v17 }
 0x5c5   : > { %3429 = vmatpush3.bf16.xpose.msra.mxu0 %v1165_v19  ;;  %3430 = vmatprep.mubr.msk.bf16.mxu0 %vm3812_vm1, %v3811_v4 }
 0x5c6   : > { %3440 = vmatprep.subr.bf16.mxu0 %v3811_v4 }
 0x5c8   : > { %3425 = vmatmul.mubr.msk.bf16.vlgmr.msra.gmra.mrb[20].mxu1 %vm666_vm3, %v1108_v20 }
 0x5c9   : > { %3436 = vmatprep.mubr.msk.bf16.mxu1 %vm3812_vm1, %v3811_v4 }
 0x5cc   : > { %3431 = vmatmul.mubr.msk.bf16.vlgmr.msra.gmra.mrb[16].mxu0 %vm666_vm3, %v1158_v23 }
 0x5cd   : > { %3442 = vmatprep.mubr.msk.bf16.mxu0 %vm3812_vm1, %v3811_v4 }
 0x693   : > { %v4104_v24 = vpop.f32.mrb[16].mxu1 }
 0x694   : > { %v3414_v26 = vpop.f32.mrb[17].mxu1 }
 0x695   : > { %v1056_v27 = vpop.f32.mrb[18].mxu1 }
 0x696   : > { %v3415_v28 = vpop.f32.mrb[19].mxu1 }
 0x697   : > { %v4106_v33 = vpop.f32.mrb[12].mxu0 }
 0x698   : > { %v3651_v34 = vpack.i.bf16 %v4106_v33, %v4104_v24  ;;  %v3420_v35 = vpop.f32.mrb[13].mxu0 }
 0x699   : > { %v1104_v36 = vpop.f32.mrb[14].mxu0 }
 0x69a   : > { %v3421_v37 = vpop.f32.mrb[15].mxu0 }
 0x69b   : > { %v1151_v38 = vpop.f32.mrb[20].mxu1 }
 0x69c   : > { %v1152_v39 = vadd.f32 %v1151_v38, %v4018_v32  ;;  %v3426_v40 = vpop.f32.mrb[21].mxu1 }
 0x69d   : > { %v1154_v41 = vpop.f32.mrb[22].mxu1 }
 0x69e   : > { %v3427_v42 = vpop.f32.mrb[23].mxu1  ;;  %v1207_v43 = vsel %vm666_vm3, %v1152_v39, -inf }
 0x69f   : > { %v1201_v44 = vpop.f32.mrb[16].mxu0  ;;  %1208 = vmax.xlane.f32.xlu0 %v1207_v43 }
 0x6a0   : > { %v1202_v46 = vadd.f32 %v1201_v44, %v4018_v32  ;;  %v3432_v47 = vpop.f32.mrb[17].mxu0 }
 0x6a1   : > { %v1204_v48 = vpop.f32.mrb[18].mxu0 }
 0x6a2   : > { %v3433_v49 = vpop.f32.mrb[19].mxu0  ;;  %v1210_v50 = vsel %vm666_vm3, %v1202_v46, -inf }
 0x6a3   : > { %1211 = vmax.xlane.f32.xlu1 %v1210_v50 }
 0x6b4   : > { %1231 = vrot.lane.b32.xlu1 %v4028_v51, %s3821_s4 }
 0x6b8   : > { %1329 = vrot.lane.b32.xlu1 %v3987_v18, %s3822_s25 }
 0x6bc   : > { %1379 = vrot.lane.b32.xlu1 %v3989_v21, %s3822_s25 }
 0x6c0   : > { %1377 = vrot.lane.b32.xlu1 %v4005_v31, %s3823_s24 }
 0x72c   : > { %v1209_v53 = vpop.xlane.xlu0 %1208 }
 0x72d   : > { %v1213_v54 = vsub.f32 %v1152_v39, %v1209_v53 }
 0x72f   : > { %v1215_v55 = vmul.f32 1.442695, %v1213_v54 }
 0x730   : > { %v1212_v56 = vpop.xlane.xlu1 %1211 }
 0x731   : > { %3713 = vpow2.f32 %v1215_v55  ;;  %v1214_v57 = vsub.f32 %v1202_v46, %v1212_v56 }
 0x733   : > { %v1217_v58 = vmul.f32 1.442695, %v1214_v57 }
 0x734   : > { %v1232_v59 = vpop.permute.xlu1 %1231 }
 0x735   : > { %3715 = vpow2.f32 %v1217_v58  ;;  %v1237_v60 = vsel %vm792_vm4, %v1232_v59, 0 }
 0x736   : > { %3435 = vmatpush3.bf16.msra.mxu1 %v1237_v60 }
 0x737   : > { %3446 = vmatprep.subr.bf16.mxu1 %v3811_v4 }
 0x738   : > { %v1330_v3 = vpop.permute.xlu1 %1329 }
 0x739   : > { %v1335_v13 = vsel %vm666_vm3, %v1330_v3, 0  ;;  %v3683_v3 = vld [vmem:[%s3917_s13] sm:$0xff]  }
 0x73b   : > { %v3714_v18 = vpop.eup %3713 }
 0x73c   : > { %v1219_v21 = vsel %vm666_vm3, %v3714_v18, 0.0 }
 0x73d   : > { %1220 = vadd.xlane.f32.xlu0 %v1219_v21 }
 0x73f   : > { %v3716_v61 = vpop.eup %3715 }
 0x740   : > { %v1222_v31 = vsel %vm666_vm3, %v3716_v61, 0.0 }
 0x741   : > { %1223 = vadd.xlane.f32.xlu0 %v1222_v31 }
 0x757   : > { %1279 = vrot.lane.b32.xlu0 %v4030_v52, %s3821_s4  ;;  %s4515_s4 = smov 24  }
 0x75b   : > { %1327 = vrot.lane.b32.xlu0 %v4003_v30, %s3823_s24  ;;  %v1380_v30 = vpop.permute.xlu1 %1379 }
 0x75c   : > { %v1385_v16 = vsel %vm666_vm3, %v1380_v30, 0 }
 0x75f   : > { %v1378_v19 = vpop.permute.xlu1 %1377 }
 0x7ca   : > { %v1221_v62 = vpop.xlane.xlu0 %1220 }
 0x7cb   : > { %3717 = vrcp.f32 %v1221_v62 }
 0x7ce   : > { %v1224_v63 = vpop.xlane.xlu0 %1223 }
 0x7cf   : > { %3719 = vrcp.f32 %v1224_v63 }
 0x7d2   : > { %v1280_v0 = vpop.permute.xlu0 %1279 }
 0x7d3   : > { %v1285_v1 = vsel %vm792_vm4, %v1280_v0, 0 }
 0x7d4   : > { %3441 = vmatpush3.bf16.msra.mxu0 %v1285_v1 }
 0x7d5   : > { %v3718_v2 = vpop.eup %3717  ;;  %3452 = vmatprep.subr.bf16.mxu0 %v3811_v4 }
 0x7d6   : > { %v1227_v5 = vmul.f32 %v3718_v2, %v3714_v18  ;;  %v1328_v17 = vpop.permute.xlu0 %1327 }
 0x7d8   : > { %v1229_v11 = vpack.c.bf16 %v1227_v5, %v1227_v5  ;;  %v3684_v5 = vld [vmem:[%s3917_s13 + $0x8] sm:$0xff]  }
 0x7d9   : > { %v3720_v12 = vpop.eup %3719 }
 0x7da   : > { %v1228_v14 = vmul.f32 %v3720_v12, %v3716_v61  ;;  %3437 = vmatmul.mubr.msk.bf16.vlgmr.msra.gmra.mrb[24].mxu1 %vm666_vm3, %v1229_v11 }
 0x7db   : > { %3447 = vmatpush3.bf16.xpose.msra.mxu1 %v1335_v13  ;;  %3448 = vmatprep.mubr.msk.bf16.mxu1 %vm3812_vm1, %v3811_v4 }
 0x7dc   : > { %v1230_v15 = vpack.c.bf16 %v1228_v14, %v1228_v14  ;;  %3458 = vmatprep.subr.bf16.mxu1 %v3811_v4 }
 0x7de   : > { %3443 = vmatmul.mubr.msk.bf16.vlgmr.msra.gmra.mrb[20].mxu0 %vm666_vm3, %v1230_v15 }
 0x7df   : > { %3453 = vmatpush3.bf16.xpose.msra.mxu0 %v1385_v16  ;;  %3454 = vmatprep.mubr.msk.bf16.mxu0 %vm3812_vm1, %v3811_v4 }
 0x7e0   : > { %3464 = vmatprep.subr.bf16.mxu0 %v3811_v4 }
 0x7e2   : > { %3449 = vmatmul.mubr.msk.bf16.vlgmr.msra.gmra.mrb[28].mxu1 %vm666_vm3, %v1328_v17 }
 0x7e3   : > { %3460 = vmatprep.mubr.msk.bf16.mxu1 %vm3812_vm1, %v3811_v4 }
 0x7e6   : > { %3455 = vmatmul.mubr.msk.bf16.vlgmr.msra.gmra.mrb[24].mxu0 %vm666_vm3, %v1378_v19 }
 0x7e7   : > { %3466 = vmatprep.mubr.msk.bf16.mxu0 %vm3812_vm1, %v3811_v4 }
 0x8ad   : > { %v1273_v20 = vpop.f32.mrb[24].mxu1 }
 0x8ae   : > { %v3438_v23 = vpop.f32.mrb[25].mxu1 }
 0x8af   : > { %v1276_v26 = vpop.f32.mrb[26].mxu1 }
 0x8b0   : > { %v3439_v27 = vpop.f32.mrb[27].mxu1 }
 0x8b1   : > { %v1321_v28 = vpop.f32.mrb[20].mxu0 }
 0x8b2   : > { %v3656_v35 = vpack.i.bf16 %v1321_v28, %v1273_v20  ;;  %v3444_v36 = vpop.f32.mrb[21].mxu0 }
 0x8b3   : > { %v1324_v37 = vpop.f32.mrb[22].mxu0 }
 0x8b4   : > { %v3445_v38 = vpop.f32.mrb[23].mxu0 }
 0x8b5   : > { %v1371_v39 = vpop.f32.mrb[28].mxu1 }
 0x8b6   : > { %v1372_v40 = vadd.f32 %v1371_v39, %v4018_v32  ;;  %v3450_v41 = vpop.f32.mrb[29].mxu1 }
 0x8b7   : > { %v1374_v42 = vpop.f32.mrb[30].mxu1 }
 0x8b8   : > { %v3451_v43 = vpop.f32.mrb[31].mxu1  ;;  %v1427_v44 = vsel %vm666_vm3, %v1372_v40, -inf }
 0x8b9   : > { %v1421_v46 = vpop.f32.mrb[24].mxu0  ;;  %1428 = vmax.xlane.f32.xlu0 %v1427_v44 }
 0x8ba   : > { %v1422_v47 = vadd.f32 %v1421_v46, %v4018_v32  ;;  %v3456_v48 = vpop.f32.mrb[25].mxu0 }
 0x8bb   : > { %v1424_v49 = vpop.f32.mrb[26].mxu0 }
 0x8bc   : > { %v3457_v50 = vpop.f32.mrb[27].mxu0  ;;  %v1430_v53 = vsel %vm666_vm3, %v1422_v47, -inf }
 0x8bd   : > { %1431 = vmax.xlane.f32.xlu1 %v1430_v53 }
 0x8ce   : > { %1451 = vrot.lane.b32.xlu1 %v4028_v51, %s3824_s28 }
 0x8d2   : > { %3652 = vrot.lane.b32.xlu1 %v3651_v34, %s3825_s27 }
 0x8d6   : > { %3657 = vrot.lane.b32.xlu1 %v3656_v35, %s3826_s18 }
 0x946   : > { %v1429_v54 = vpop.xlane.xlu0 %1428 }
 0x947   : > { %v1433_v32 = vsub.f32 %v1372_v40, %v1429_v54 }
 0x949   : > { %v1435_v55 = vmul.f32 1.442695, %v1433_v32 }
 0x94a   : > { %v1432_v56 = vpop.xlane.xlu1 %1431 }
 0x94b   : > { %3721 = vpow2.f32 %v1435_v55  ;;  %v1434_v57 = vsub.f32 %v1422_v47, %v1432_v56 }
 0x94d   : > { %v1437_v58 = vmul.f32 1.442695, %v1434_v57 }
 0x94e   : > { %v1452_v59 = vpop.permute.xlu1 %1451 }
 0x94f   : > { %3723 = vpow2.f32 %v1437_v58  ;;  %v1457_v51 = vsel %vm792_vm4, %v1452_v59, 0 }
 0x950   : > { %3459 = vmatpush3.bf16.msra.mxu1 %v1457_v51 }
 0x951   : > { %3470 = vmatprep.subr.bf16.mxu1 %v3811_v4 }
 0x952   : > { %v3653_v20 = vpop.permute.xlu1 %3652 }
 0x953   : > { %v3655_v26 = vunpack.i.h.bf16 %v3653_v20  ;;  %v3654_v27 = vunpack.i.l.bf16 %v3653_v20 }
 0x955   : > { %v3722_v60 = vpop.eup %3721  ;;  %v1572_v37 = vsel %vm666_vm3, %v4066_v29, %v3655_v26  ;;  %v1571_v38 = vsel %vm666_vm3, %v4064_v25, %v3654_v27  ;;  %v1586_v29 = vsub.s32 3, %v3971_v9 }
 0x956   : > { %v1439_v24 = vsel %vm666_vm3, %v3722_v60, 0.0  ;;  %v3658_v23 = vpop.permute.xlu1 %3657 }
 0x957   : > { %1440 = vadd.xlane.f32.xlu0 %v1439_v24  ;;  %v3660_v28 = vunpack.i.h.bf16 %v3658_v23  ;;  %v3659_v35 = vunpack.i.l.bf16 %v3658_v23  ;;  %v1587_v25 = vrot.slane %v3969_v8, %v1586_v29 }
 0x959   : > { %v3724_v33 = vpop.eup %3723  ;;  %v1575_v41 = vsel %vm1573_vm5, %v1572_v37, %v3660_v28  ;;  %v1574_v42 = vsel %vm1573_vm5, %v1571_v38, %v3659_v35 }
 0x95a   : > { %v1442_v34 = vsel %vm666_vm3, %v3724_v33, 0.0 }
 0x95b   : > { %1443 = vadd.xlane.f32.xlu0 %v1442_v34 }
 0x971   : > { %1499 = vrot.lane.b32.xlu0 %v4030_v52, %s3824_s28 }
 0x9e4   : > { %v1441_v18 = vpop.xlane.xlu0 %1440 }
 0x9e5   : > { %3725 = vrcp.f32 %v1441_v18 }
 0x9e8   : > { %v1444_v21 = vpop.xlane.xlu0 %1443 }
 0x9e9   : > { %3727 = vrcp.f32 %v1444_v21  ;;  %v3685_v21 = vld [vmem:[%s3927_s19] sm:$0xff]  }
 0x9ec   : > { %v1500_v61 = vpop.permute.xlu0 %1499 }
 0x9ed   : > { %v1505_v31 = vsel %vm792_vm4, %v1500_v61, 0  ;;  %v3686_v61 = vld [vmem:[%s3927_s19 + $0x8] sm:$0xff]  }
 0x9ee   : > { %3465 = vmatpush3.bf16.msra.mxu0 %v1505_v31  ;;  %v1750_v31 = vld [vmem:[%s4502_s1] sm:$0xff] }
 0x9ef   : > { %v3726_v62 = vpop.eup %3725  ;;  %3478 = vmatprep.subr.bf16.mxu0 %v3811_v4 }
 0x9f0   : > { %v1447_v63 = vmul.f32 %v3726_v62, %v3722_v60  ;;  %v1751_v62 = vld [vmem:[%s4502_s1 + $0x8] sm:$0xff] }
 0x9f2   : > { %v1449_v0 = vpack.c.bf16 %v1447_v63, %v1447_v63  ;;  %v1752_v63 = vpack.c.bf16 %v1751_v62, %v1750_v31 }
 0x9f3   : > { %v3728_v1 = vpop.eup %3727 }
 0x9f4   : > { %v1448_v2 = vmul.f32 %v3728_v1, %v3724_v33  ;;  %3461 = vmatmul.mubr.msk.bf16.vlgmr.msra.gmra.mrb[32].mxu1 %vm666_vm3, %v1449_v0  ;;  %v3687_v0 = vld [vmem:[%s3922_s16] sm:$0xff]   ;;  %v3688_v1 = vld [vmem:[%s3922_s16 + $0x8] sm:$0xff]   ;;  %s4525_s16 = smov 24  }
 0x9f5   : > { %3474 = vmatprep.mubr.msk.bf16.mxu1 %vm3812_vm1, %v3811_v4  ;;  %3471 = vmatpush3.bf16.msra.mxu1 %v3683_v3 }
 0x9f6   : > { %v1450_v52 = vpack.c.bf16 %v1448_v2, %v1448_v2  ;;  %3472 = vmatprep.subr.bf16.mxu1 %v3811_v4 }
 0x9f8   : > { %3467 = vmatmul.mubr.msk.bf16.vlgmr.msra.gmra.mrb[28].mxu0 %vm666_vm3, %v1450_v52 }
 0x9f9   : > { %3482 = vmatprep.mubr.msk.bf16.mxu0 %vm3812_vm1, %v3811_v4  ;;  %3473 = vmatpush3.bf16.msra.mxu1 %v3684_v5 }
 0x9fa   : > { %3486 = vmatprep.subr.bf16.mxu1 %v3811_v4  ;;  %3479 = vmatpush3.bf16.msra.mxu0 %v3687_v0 }
 0x9fb   : > { %3480 = vmatprep.subr.bf16.mxu0 %v3811_v4 }
 0x9fe   : > { %3481 = vmatpush3.bf16.msra.mxu0 %v3688_v1 }
 0x9ff   : > { %3494 = vmatprep.subr.bf16.mxu0 %v3811_v4 }
 0xac7   : > { %v1493_v11 = vpop.f32.mrb[32].mxu1 }
 0xac8   : > { %v3462_v12 = vpop.f32.mrb[33].mxu1 }
 0xac9   : > { %v1496_v13 = vpop.f32.mrb[34].mxu1 }
 0xaca   : > { %v3463_v14 = vpop.f32.mrb[35].mxu1  ;;  %v1675_v13 = vsub.s32 4, %v3971_v9 }
 0xacb   : > { %v1541_v30 = vpop.f32.mrb[28].mxu0 }
 0xacc   : > { %v3661_v15 = vpack.i.bf16 %v1541_v30, %v1493_v11  ;;  %v3468_v16 = vpop.f32.mrb[29].mxu0  ;;  %v1676_v14 = vrot.slane %v3969_v8, %v1675_v13  ;;  %v1681_v30 = vsub.s32 5, %v3971_v9 }
 0xacd   : > { %v1544_v17 = vpop.f32.mrb[30].mxu0 }
 0xace   : > { %v3469_v19 = vpop.f32.mrb[31].mxu0  ;;  %3662 = vrot.lane.b32.xlu0 %v3661_v15, %s4515_s4  ;;  %v1682_v23 = vrot.slane %v3969_v8, %v1681_v30 }
 0xb40   : > { %v3663_v36 = vpop.permute.xlu0 %3662 }
 0xb41   : > { %v3665_v39 = vunpack.i.h.bf16 %v3663_v36  ;;  %v3664_v40 = vunpack.i.l.bf16 %v3663_v36  ;;  %v1815_v36 = vsub.s32 7, %v3971_v9 }
 0xb43   : > { %v1578_v43 = vsel %vm1576_vm6, %v1575_v41, %v3665_v39  ;;  %v1577_v44 = vsel %vm1576_vm6, %v1574_v42, %v3664_v40  ;;  %v1816_v37 = vrot.slane %v3969_v8, %v1815_v36 }
 0xb44   : > { %v1579_v46 = vpack.c.bf16 %v1578_v43, %v1577_v44 }
 0xb46   : > { %3475 = vmatmul.mubr.msk.bf16.vlgmr.msra.gmra.mrb[36].mxu1 %vm586_vm2, %v1579_v46 }
 0xb47   : > { %3490 = vmatprep.mubr.msk.bf16.mxu1 %vm3812_vm1, %v3811_v4  ;;  %3487 = vmatpush3.bf16.msra.mxu1 %v3685_v21  ;;  %v4260_v21 = vld [vmem:[%s3951_s21 + $0x8] sm:$0x7f] }
 0xb48   : > { %3488 = vmatprep.subr.bf16.mxu1 %v3811_v4 }
 0xb4b   : > { %3489 = vmatpush3.bf16.msra.mxu1 %v3686_v61  ;;  %v1822_v61 = vrot.slane %v4260_v21, %v633_v22 }
 0xb4c   : > { %3500 = vmatprep.subr.bf16.mxu1 %v3811_v4 }
 0xb4e   : > { %3491 = vmatmul.mubr.msk.bf16.vlgmr.msra.gmra.mrb[40].mxu1 %vm586_vm2, %v1752_v63 }
 0xb4f   : > { %3502 = vmatprep.mubr.msk.bf16.mxu1 %vm3812_vm1, %v3811_v4 }
 0xc19   : > { %v1637_v47 = vpop.f32.mrb[36].mxu1 }
 0xc1a   : > { %v1638_v48 = vadd.f32 %v1637_v47, %v1587_v25  ;;  %v3476_v49 = vpop.f32.mrb[37].mxu1 }
 0xc1b   : > { %v1640_v50 = vpop.f32.mrb[38].mxu1 }
 0xc1c   : > { %v1641_v53 = vadd.f32 %v1640_v50, %v1587_v25  ;;  %v3477_v54 = vpop.f32.mrb[39].mxu1  ;;  %v1644_v32 = vadd.f32 %v1638_v48, %v3964_v6  ;;  %v1692_v48 = vsub.s32 6, %v3971_v9 }
 0xc1e   : > { %v1646_v55 = vsel %vm586_vm2, %v1644_v32, 0.0  ;;  %v1645_v56 = vadd.f32 %v1641_v53, %v3966_v7  ;;  %v1693_v49 = vrot.slane %v3969_v8, %v1692_v48 }
 0xc1f   : > { %1647 = vadd.xlane.f32.xlu1 %v1646_v55 }
 0xc20   : > { %v1649_v57 = vsel %vm586_vm2, %v1645_v56, 0.0 }
 0xc21   : > { %1650 = vadd.xlane.f32.xlu0 %v1649_v57  ;;  %v1806_v38 = vpop.f32.mrb[40].mxu1 }
 0xc22   : > { %v1817_v39 = vadd.f32 %v1816_v37, %v1806_v38  ;;  %v3492_v40 = vpop.f32.mrb[41].mxu1 }
 0xc23   : > { %v1809_v41 = vpop.f32.mrb[42].mxu1 }
 0xc24   : > { %v4231_v42 = vpack.c.bf16 %v1817_v39, %v1817_v39  ;;  %v1818_v43 = vadd.f32 %v1816_v37, %v1809_v41  ;;  %v3493_v44 = vpop.f32.mrb[43].mxu1 }
 0xc26   : > { %v4233_v46 = vpack.c.bf16 %v1818_v43, %v1818_v43  ;;  %v1839_v25 = vsel %vm666_vm3, %v4231_v42, 0 }
 0xc28   : > { %v1885_v47 = vsel %vm666_vm3, %v4233_v46, 0 }
 0xc29   : > { %3501 = vmatpush3.bf16.xpose.msra.mxu1 %v1885_v47 }
 0xc2a   : > { %3512 = vmatprep.subr.bf16.mxu1 %v3811_v4 }
 0xcac   : > { %v1648_v58 = vpop.xlane.xlu1 %1647 }
 0xcad   : > { %v1653_v59 = vmul.f32 0.03125, %v1648_v58 }
 0xcae   : > { %v1651_v51 = vpop.xlane.xlu0 %1650 }
 0xcaf   : > { %v1655_v60 = vsub.f32 %v1644_v32, %v1653_v59  ;;  %v1654_v24 = vmul.f32 0.03125, %v1651_v51 }
 0xcb1   : > { %v1656_v33 = vsub.f32 %v1645_v56, %v1654_v24  ;;  %v1657_v34 = vmul.f32 %v1655_v60, %v1655_v60 }
 0xcb3   : > { %v1659_v18 = vsel %vm586_vm2, %v1657_v34, 0.0  ;;  %v1658_v6 = vmul.f32 %v1656_v33, %v1656_v33 }
 0xcb4   : > { %1660 = vadd.xlane.f32.xlu0 %v1659_v18 }
 0xcb5   : > { %v1662_v7 = vsel %vm586_vm2, %v1658_v6, 0.0 }
 0xcb6   : > { %1663 = vadd.xlane.f32.xlu1 %v1662_v7 }
 0xd41   : > { %v1661_v2 = vpop.xlane.xlu0 %1660 }
 0xd42   : > { %v1665_v52 = vmul.f32 0.03125, %v1661_v2 }
 0xd43   : > { %v1664_v3 = vpop.xlane.xlu1 %1663 }
 0xd44   : > { %v1667_v5 = vadd.f32 1e-05, %v1665_v52  ;;  %v1666_v11 = vmul.f32 0.03125, %v1664_v3 }
 0xd46   : > { %3729 = vrsqrt.f32 %v1667_v5  ;;  %v1668_v12 = vadd.f32 1e-05, %v1666_v11 }
 0xd48   : > { %3731 = vrsqrt.f32 %v1668_v12 }
 0xd50   : > { %v3730_v15 = vpop.eup %3729 }
 0xd51   : > { %v1671_v16 = vmul.f32 %v3730_v15, %v1655_v60 }
 0xd52   : > { %v3732_v17 = vpop.eup %3731 }
 0xd53   : > { %v1677_v19 = vmul.f32 %v1676_v14, %v1671_v16  ;;  %v1672_v20 = vmul.f32 %v3732_v17, %v1656_v33 }
 0xd55   : > { %v1678_v26 = vmul.f32 %v1676_v14, %v1672_v20  ;;  %v4220_v27 = vadd.f32 %v1682_v23, %v1677_v19 }
 0xd57   : > { %v4222_v28 = vadd.f32 %v1682_v23, %v1678_v26 }
 0xd59   : > { %v1685_v35 = vpack.c.bf16 %v4222_v28, %v4220_v27 }
 0xd5b   : > { %3483 = vmatmul.mubr.msk.bf16.vlgmr.msra.gmra.mrb[32].mxu0 %vm586_vm2, %v1685_v35 }
 0xd5c   : > { %3496 = vmatprep.mubr.msk.bf16.mxu0 %vm3812_vm1, %v3811_v4  ;;  %3495 = vmatpush3.bf16.xpose.msra.mxu0 %v1839_v25 }
 0xd5d   : > { %3506 = vmatprep.subr.bf16.mxu0 %v3811_v4 }
 0xe2e   : > { %v1743_v50 = vpop.f32.mrb[32].mxu0 }
 0xe2f   : > { %v1744_v53 = vadd.f32 %v1743_v50, %v1693_v49  ;;  %v3484_v54 = vpop.f32.mrb[33].mxu0 }
 0xe30   : > { %v1746_v32 = vpop.f32.mrb[34].mxu0 }
 0xe31   : > { %v4245_v55 = vpack.c.bf16 %v1744_v53, %v1744_v53  ;;  %v1747_v56 = vadd.f32 %v1746_v32, %v1693_v49  ;;  %v3485_v57 = vpop.f32.mrb[35].mxu0 }
 0xe33   : > { %v4247_v58 = vpack.c.bf16 %v1747_v56, %v1747_v56  ;;  %3497 = vmatmul.mubr.msk.bf16.vlgmr.msra.gmra.mrb[36].mxu0 %vm666_vm3, %v4245_v55 }
 0xe34   : > { %3508 = vmatprep.mubr.msk.bf16.mxu0 %vm3812_vm1, %v3811_v4 }
 0xe35   : > { %3503 = vmatmul.mubr.msk.bf16.vlgmr.msra.gmra.mrb[44].mxu1 %vm666_vm3, %v4247_v58 }
 0xe36   : > { %3514 = vmatprep.mubr.msk.bf16.mxu1 %vm3812_vm1, %v3811_v4 }
 0xf06   : > { %v1875_v8 = vpop.f32.mrb[36].mxu0 }
 0xf07   : > { %v3498_v59 = vpop.f32.mrb[37].mxu0  ;;  %v1927_v51 = vsel %vm666_vm3, %v1875_v8, -inf }
 0xf08   : > { %1928 = vmax.xlane.f32.xlu0 %v1927_v51  ;;  %v1878_v60 = vpop.f32.mrb[38].mxu0  ;;  %v1921_v24 = vpop.f32.mrb[44].mxu1 }
 0xf09   : > { %v3499_v33 = vpop.f32.mrb[39].mxu0  ;;  %v3504_v34 = vpop.f32.mrb[45].mxu1  ;;  %v1930_v18 = vsel %vm666_vm3, %v1921_v24, -inf }
 0xf0a   : > { %1931 = vmax.xlane.f32.xlu1 %v1930_v18  ;;  %v1924_v6 = vpop.f32.mrb[46].mxu1 }
 0xf0b   : > { %v3505_v7 = vpop.f32.mrb[47].mxu1 }
 0xf1e   : > { %1824 = vrot.lane.b32.xlu0 %v1822_v61, %s3813_s5 }
 0xf95   : > { %v1929_v31 = vpop.xlane.xlu0 %1928 }
 0xf96   : > { %v1933_v22 = vsub.f32 %v1875_v8, %v1929_v31 }
 0xf97   : > { %v1932_v52 = vpop.xlane.xlu1 %1931 }
 0xf98   : > { %v1935_v3 = vmul.f32 1.442695, %v1933_v22  ;;  %v1934_v5 = vsub.f32 %v1921_v24, %v1932_v52 }
 0xf99   : > { %v1825_v62 = vpop.permute.xlu0 %1824 }
 0xf9a   : > { %v1827_v63 = vadd.f32 %v1825_v62, %v1806_v38  ;;  %v1828_v0 = vadd.f32 %v1825_v62, %v1809_v41  ;;  %3733 = vpow2.f32 %v1935_v3  ;;  %v1937_v11 = vmul.f32 1.442695, %v1934_v5 }
 0xf9c   : > { %v4266_v1 = vpack.c.bf16 %v1827_v63, %v1827_v63  ;;  %v4268_v2 = vpack.c.bf16 %v1828_v0, %v1828_v0  ;;  %3735 = vpow2.f32 %v1937_v11 }
 0xf9e   : > { %2001 = vrot.lane.b32.xlu0 %v4268_v2, %s3814_s6  ;;  %1952 = vrot.lane.b32.xlu1 %v4266_v1, %s3814_s6 }
 0xfa2   : > { %2053 = vrot.lane.b32.xlu0 %v4231_v42, %s3817_s15 }
 0xfa4   : > { %v3734_v12 = vpop.eup %3733 }
 0xfa5   : > { %v1939_v14 = vsel %vm666_vm3, %v3734_v12, 0.0 }
 0xfa6   : > { %2050 = vrot.lane.b32.xlu0 %v4245_v55, %s3817_s15  ;;  %v3736_v15 = vpop.eup %3735 }
 0xfa7   : > { %v1942_v16 = vsel %vm666_vm3, %v3736_v15, 0.0 }
 0xfc2   : > { %1940 = vadd.xlane.f32.xlu1 %v1939_v14 }
 0xfc6   : > { %1943 = vadd.xlane.f32.xlu1 %v1942_v16 }
 0xfd7   : > { %2105 = vrot.lane.b32.xlu1 %v4233_v46, %s3817_s15 }
 0xfdb   : > { %2102 = vrot.lane.b32.xlu1 %v4247_v58, %s3817_s15 }
0x1010   : > { %v2002_v17 = vpop.permute.xlu0 %2001  ;;  %v1953_v19 = vpop.permute.xlu1 %1952 }
0x1011   : > { %v2007_v20 = vsel %vm792_vm4, %v2002_v17, 0  ;;  %v1958_v23 = vsel %vm792_vm4, %v1953_v19, 0 }
0x1012   : > { %3507 = vmatpush3.bf16.msra.mxu0 %v1958_v23  ;;  %3513 = vmatpush3.bf16.msra.mxu1 %v2007_v20 }
0x1013   : > { %3518 = vmatprep.subr.bf16.mxu0 %v3811_v4  ;;  %3524 = vmatprep.subr.bf16.mxu1 %v3811_v4 }
0x1014   : > { %v2054_v38 = vpop.permute.xlu0 %2053 }
0x1015   : > { %v2059_v41 = vsel %vm666_vm3, %v2054_v38, 0 }
0x1018   : > { %v2051_v49 = vpop.permute.xlu0 %2050 }
0x104f   : > { %v1941_v26 = vpop.xlane.xlu1 %1940 }
0x1050   : > { %3737 = vrcp.f32 %v1941_v26 }
0x1053   : > { %v1944_v35 = vpop.xlane.xlu1 %1943 }
0x1054   : > { %3739 = vrcp.f32 %v1944_v35 }
0x1057   : > { %v2106_v44 = vpop.permute.xlu1 %2105 }
0x1058   : > { %v2111_v47 = vsel %vm666_vm3, %v2106_v44, 0 }
0x105a   : > { %v3738_v36 = vpop.eup %3737 }
0x105b   : > { %v1947_v37 = vmul.f32 %v3738_v36, %v3734_v12  ;;  %v2103_v50 = vpop.permute.xlu1 %2102 }
0x105d   : > { %v1949_v39 = vpack.c.bf16 %v1947_v37, %v1947_v37 }
0x105e   : > { %v3740_v40 = vpop.eup %3739 }
0x105f   : > { %v1948_v43 = vmul.f32 %v3740_v40, %v3736_v15  ;;  %3509 = vmatmul.mubr.msk.bf16.vlgmr.msra.gmra.mrb[40].mxu0 %vm666_vm3, %v1949_v39 }
0x1060   : > { %3519 = vmatpush3.bf16.xpose.msra.mxu0 %v2059_v41  ;;  %3520 = vmatprep.mubr.msk.bf16.mxu0 %vm3812_vm1, %v3811_v4 }
0x1061   : > { %v1950_v25 = vpack.c.bf16 %v1948_v43, %v1948_v43  ;;  %3530 = vmatprep.subr.bf16.mxu0 %v3811_v4 }
0x1063   : > { %3515 = vmatmul.mubr.msk.bf16.vlgmr.msra.gmra.mrb[48].mxu1 %vm666_vm3, %v1950_v25 }
0x1064   : > { %3525 = vmatpush3.bf16.xpose.msra.mxu1 %v2111_v47  ;;  %3526 = vmatprep.mubr.msk.bf16.mxu1 %vm3812_vm1, %v3811_v4 }
0x1065   : > { %3536 = vmatprep.subr.bf16.mxu1 %v3811_v4 }
0x1067   : > { %3521 = vmatmul.mubr.msk.bf16.vlgmr.msra.gmra.mrb[44].mxu0 %vm666_vm3, %v2051_v49 }
0x1068   : > { %3532 = vmatprep.mubr.msk.bf16.mxu0 %vm3812_vm1, %v3811_v4 }
0x106b   : > { %3527 = vmatmul.mubr.msk.bf16.vlgmr.msra.gmra.mrb[52].mxu1 %vm666_vm3, %v2103_v50 }
0x106c   : > { %3538 = vmatprep.mubr.msk.bf16.mxu1 %vm3812_vm1, %v3811_v4 }
0x1132   : > { %v4304_v53 = vpop.f32.mrb[40].mxu0 }
0x1133   : > { %v3510_v54 = vpop.f32.mrb[41].mxu0 }
0x1134   : > { %v1997_v32 = vpop.f32.mrb[42].mxu0 }
0x1135   : > { %v3511_v56 = vpop.f32.mrb[43].mxu0 }
0x1136   : > { %v4306_v57 = vpop.f32.mrb[48].mxu1 }
0x1137   : > { %v3516_v8 = vpop.f32.mrb[49].mxu1 }
0x1138   : > { %v2046_v59 = vpop.f32.mrb[50].mxu1 }
0x1139   : > { %v3517_v51 = vpop.f32.mrb[51].mxu1 }
0x113a   : > { %v2095_v60 = vpop.f32.mrb[44].mxu0 }
0x113b   : > { %v3522_v24 = vpop.f32.mrb[45].mxu0  ;;  %v2153_v33 = vsel %vm666_vm3, %v2095_v60, -inf }
0x113c   : > { %2154 = vmax.xlane.f32.xlu0 %v2153_v33  ;;  %v2098_v34 = vpop.f32.mrb[46].mxu0 }
0x113d   : > { %v3523_v18 = vpop.f32.mrb[47].mxu0 }
0x113e   : > { %v2147_v6 = vpop.f32.mrb[52].mxu1 }
0x113f   : > { %v3528_v7 = vpop.f32.mrb[53].mxu1  ;;  %v2156_v61 = vsel %vm666_vm3, %v2147_v6, -inf }
0x1140   : > { %2157 = vmax.xlane.f32.xlu1 %v2156_v61  ;;  %v2150_v31 = vpop.f32.mrb[54].mxu1 }
0x1141   : > { %v3529_v62 = vpop.f32.mrb[55].mxu1 }
0x1151   : > { %2177 = vrot.lane.b32.xlu1 %v4266_v1, %s3816_s30 }
0x1155   : > { %2275 = vrot.lane.b32.xlu1 %v4231_v42, %s3820_s20 }
0x1159   : > { %2325 = vrot.lane.b32.xlu1 %v4233_v46, %s3820_s20 }
0x115d   : > { %2323 = vrot.lane.b32.xlu1 %v4247_v58, %s3820_s20 }
0x11c9   : > { %v2155_v63 = vpop.xlane.xlu0 %2154 }
0x11ca   : > { %v2159_v0 = vsub.f32 %v2095_v60, %v2155_v63 }
0x11cc   : > { %v2161_v22 = vmul.f32 1.442695, %v2159_v0 }
0x11cd   : > { %v2158_v52 = vpop.xlane.xlu1 %2157 }
0x11ce   : > { %3741 = vpow2.f32 %v2161_v22  ;;  %v2160_v3 = vsub.f32 %v2147_v6, %v2158_v52 }
0x11d0   : > { %v2163_v5 = vmul.f32 1.442695, %v2160_v3 }
0x11d1   : > { %v2178_v11 = vpop.permute.xlu1 %2177 }
0x11d2   : > { %3743 = vpow2.f32 %v2163_v5  ;;  %v2183_v12 = vsel %vm792_vm4, %v2178_v11, 0 }
0x11d3   : > { %3531 = vmatpush3.bf16.msra.mxu0 %v2183_v12 }
0x11d4   : > { %3542 = vmatprep.subr.bf16.mxu0 %v3811_v4 }
0x11d5   : > { %v2276_v36 = vpop.permute.xlu1 %2275 }
0x11d6   : > { %v2281_v40 = vsel %vm666_vm3, %v2276_v36, 0 }
0x11d8   : > { %v3742_v14 = vpop.eup %3741 }
0x11d9   : > { %v2165_v15 = vsel %vm666_vm3, %v3742_v14, 0.0  ;;  %v2326_v43 = vpop.permute.xlu1 %2325 }
0x11da   : > { %2166 = vadd.xlane.f32.xlu0 %v2165_v15  ;;  %v2331_v25 = vsel %vm666_vm3, %v2326_v43, 0 }
0x11dc   : > { %v3744_v16 = vpop.eup %3743 }
0x11dd   : > { %v2168_v17 = vsel %vm666_vm3, %v3744_v16, 0.0  ;;  %v2324_v49 = vpop.permute.xlu1 %2323 }
0x11de   : > { %2169 = vadd.xlane.f32.xlu0 %v2168_v17 }
0x11f4   : > { %2225 = vrot.lane.b32.xlu0 %v4268_v2, %s3816_s30 }
0x11f8   : > { %2273 = vrot.lane.b32.xlu0 %v4245_v55, %s3820_s20 }
0x1267   : > { %v2167_v19 = vpop.xlane.xlu0 %2166 }
0x1268   : > { %3745 = vrcp.f32 %v2167_v19 }
0x126b   : > { %v2170_v20 = vpop.xlane.xlu0 %2169 }
0x126c   : > { %3747 = vrcp.f32 %v2170_v20 }
0x126f   : > { %v2226_v23 = vpop.permute.xlu0 %2225 }
0x1270   : > { %v2231_v26 = vsel %vm792_vm4, %v2226_v23, 0 }
0x1271   : > { %3537 = vmatpush3.bf16.msra.mxu1 %v2231_v26 }
0x1272   : > { %v3746_v35 = vpop.eup %3745  ;;  %3548 = vmatprep.subr.bf16.mxu1 %v3811_v4 }
0x1273   : > { %v2173_v37 = vmul.f32 %v3746_v35, %v3742_v14  ;;  %v2274_v47 = vpop.permute.xlu0 %2273 }
0x1275   : > { %v2175_v38 = vpack.c.bf16 %v2173_v37, %v2173_v37 }
0x1276   : > { %v3748_v39 = vpop.eup %3747 }
0x1277   : > { %v2174_v41 = vmul.f32 %v3748_v39, %v3744_v16  ;;  %3533 = vmatmul.mubr.msk.bf16.vlgmr.msra.gmra.mrb[48].mxu0 %vm666_vm3, %v2175_v38 }
0x1278   : > { %3543 = vmatpush3.bf16.xpose.msra.mxu0 %v2281_v40  ;;  %3544 = vmatprep.mubr.msk.bf16.mxu0 %vm3812_vm1, %v3811_v4 }
0x1279   : > { %v2176_v44 = vpack.c.bf16 %v2174_v41, %v2174_v41  ;;  %3554 = vmatprep.subr.bf16.mxu0 %v3811_v4 }
0x127b   : > { %3539 = vmatmul.mubr.msk.bf16.vlgmr.msra.gmra.mrb[56].mxu1 %vm666_vm3, %v2176_v44 }
0x127c   : > { %3549 = vmatpush3.bf16.xpose.msra.mxu1 %v2331_v25  ;;  %3550 = vmatprep.mubr.msk.bf16.mxu1 %vm3812_vm1, %v3811_v4 }
0x127d   : > { %3560 = vmatprep.subr.bf16.mxu1 %v3811_v4 }
0x127f   : > { %3545 = vmatmul.mubr.msk.bf16.vlgmr.msra.gmra.mrb[52].mxu0 %vm666_vm3, %v2274_v47 }
0x1280   : > { %3556 = vmatprep.mubr.msk.bf16.mxu0 %vm3812_vm1, %v3811_v4 }
0x1283   : > { %3551 = vmatmul.mubr.msk.bf16.vlgmr.msra.gmra.mrb[60].mxu1 %vm666_vm3, %v2324_v49 }
0x1284   : > { %3562 = vmatprep.mubr.msk.bf16.mxu1 %vm3812_vm1, %v3811_v4 }
0x134a   : > { %v4344_v50 = vpop.f32.mrb[48].mxu0 }
0x134b   : > { %v3534_v54 = vpop.f32.mrb[49].mxu0 }
0x134c   : > { %v2222_v32 = vpop.f32.mrb[50].mxu0 }
0x134d   : > { %v3535_v56 = vpop.f32.mrb[51].mxu0 }
0x134e   : > { %v4346_v8 = vpop.f32.mrb[56].mxu1 }
0x134f   : > { %v3666_v59 = vpack.i.bf16 %v4346_v8, %v4344_v50  ;;  %v3540_v51 = vpop.f32.mrb[57].mxu1 }
0x1350   : > { %v2270_v60 = vpop.f32.mrb[58].mxu1 }
0x1351   : > { %v3541_v24 = vpop.f32.mrb[59].mxu1 }
0x1352   : > { %v2317_v33 = vpop.f32.mrb[52].mxu0 }
0x1353   : > { %v3546_v34 = vpop.f32.mrb[53].mxu0  ;;  %v2373_v18 = vsel %vm666_vm3, %v2317_v33, -inf }
0x1354   : > { %2374 = vmax.xlane.f32.xlu0 %v2373_v18  ;;  %v2320_v6 = vpop.f32.mrb[54].mxu0 }
0x1355   : > { %v3547_v7 = vpop.f32.mrb[55].mxu0 }
0x1356   : > { %v2367_v61 = vpop.f32.mrb[60].mxu1 }
0x1357   : > { %v3552_v31 = vpop.f32.mrb[61].mxu1  ;;  %v2376_v62 = vsel %vm666_vm3, %v2367_v61, -inf }
0x1358   : > { %2377 = vmax.xlane.f32.xlu1 %v2376_v62  ;;  %v2370_v63 = vpop.f32.mrb[62].mxu1 }
0x1359   : > { %v3553_v0 = vpop.f32.mrb[63].mxu1 }
0x1369   : > { %2397 = vrot.lane.b32.xlu1 %v4266_v1, %s3819_s3 }
0x136d   : > { %2495 = vrot.lane.b32.xlu1 %v4231_v42, %s3823_s24 }
0x1371   : > { %2545 = vrot.lane.b32.xlu1 %v4233_v46, %s3823_s24 }
0x1375   : > { %2543 = vrot.lane.b32.xlu1 %v4247_v58, %s3823_s24 }
0x13e1   : > { %v2375_v22 = vpop.xlane.xlu0 %2374 }
0x13e2   : > { %v2379_v52 = vsub.f32 %v2317_v33, %v2375_v22 }
0x13e4   : > { %v2381_v3 = vmul.f32 1.442695, %v2379_v52 }
0x13e5   : > { %v2378_v5 = vpop.xlane.xlu1 %2377 }
0x13e6   : > { %3749 = vpow2.f32 %v2381_v3  ;;  %v2380_v11 = vsub.f32 %v2367_v61, %v2378_v5 }
0x13e8   : > { %v2383_v12 = vmul.f32 1.442695, %v2380_v11 }
0x13e9   : > { %v2398_v14 = vpop.permute.xlu1 %2397 }
0x13ea   : > { %3751 = vpow2.f32 %v2383_v12  ;;  %v2403_v15 = vsel %vm792_vm4, %v2398_v14, 0 }
0x13eb   : > { %3555 = vmatpush3.bf16.msra.mxu0 %v2403_v15 }
0x13ec   : > { %3566 = vmatprep.subr.bf16.mxu0 %v3811_v4 }
0x13ed   : > { %v2496_v35 = vpop.permute.xlu1 %2495 }
0x13ee   : > { %v2501_v39 = vsel %vm666_vm3, %v2496_v35, 0 }
0x13f0   : > { %v3750_v42 = vpop.eup %3749 }
0x13f1   : > { %v2385_v46 = vsel %vm666_vm3, %v3750_v42, 0.0 }
0x13f2   : > { %2386 = vadd.xlane.f32.xlu0 %v2385_v46 }
0x13f4   : > { %v3752_v16 = vpop.eup %3751 }
0x13f5   : > { %v2388_v58 = vsel %vm666_vm3, %v3752_v16, 0.0 }
0x13f6   : > { %2389 = vadd.xlane.f32.xlu0 %v2388_v58 }
0x140c   : > { %2445 = vrot.lane.b32.xlu0 %v4268_v2, %s3819_s3 }
0x1410   : > { %2493 = vrot.lane.b32.xlu0 %v4245_v55, %s3823_s24  ;;  %v2546_v55 = vpop.permute.xlu1 %2545 }
0x1411   : > { %v2551_v43 = vsel %vm666_vm3, %v2546_v55, 0 }
0x1414   : > { %v2544_v25 = vpop.permute.xlu1 %2543 }
0x147f   : > { %v2387_v17 = vpop.xlane.xlu0 %2386 }
0x1480   : > { %3753 = vrcp.f32 %v2387_v17 }
0x1483   : > { %v2390_v19 = vpop.xlane.xlu0 %2389 }
0x1484   : > { %3755 = vrcp.f32 %v2390_v19 }
0x1487   : > { %v2446_v20 = vpop.permute.xlu0 %2445 }
0x1488   : > { %v2451_v23 = vsel %vm792_vm4, %v2446_v20, 0 }
0x1489   : > { %3561 = vmatpush3.bf16.msra.mxu1 %v2451_v23 }
0x148a   : > { %v3754_v26 = vpop.eup %3753  ;;  %3572 = vmatprep.subr.bf16.mxu1 %v3811_v4 }
0x148b   : > { %v2393_v36 = vmul.f32 %v3754_v26, %v3750_v42  ;;  %v2494_v44 = vpop.permute.xlu0 %2493 }
0x148d   : > { %v2395_v37 = vpack.c.bf16 %v2393_v36, %v2393_v36  ;;  %v3689_v36 = vld [vmem:[%s3932_s26] sm:$0xff]  }
0x148e   : > { %v3756_v38 = vpop.eup %3755 }
0x148f   : > { %v2394_v40 = vmul.f32 %v3756_v38, %v3752_v16  ;;  %3557 = vmatmul.mubr.msk.bf16.vlgmr.msra.gmra.mrb[56].mxu0 %vm666_vm3, %v2395_v37  ;;  %v3690_v37 = vld [vmem:[%s3932_s26 + $0x8] sm:$0xff]  }
0x1490   : > { %3567 = vmatpush3.bf16.xpose.msra.mxu0 %v2501_v39  ;;  %3568 = vmatprep.mubr.msk.bf16.mxu0 %vm3812_vm1, %v3811_v4 }
0x1491   : > { %v2396_v41 = vpack.c.bf16 %v2394_v40, %v2394_v40  ;;  %3578 = vmatprep.subr.bf16.mxu0 %v3811_v4 }
0x1493   : > { %3563 = vmatmul.mubr.msk.bf16.vlgmr.msra.gmra.mrb[64].mxu1 %vm666_vm3, %v2396_v41 }
0x1494   : > { %3573 = vmatpush3.bf16.xpose.msra.mxu1 %v2551_v43  ;;  %3574 = vmatprep.mubr.msk.bf16.mxu1 %vm3812_vm1, %v3811_v4 }
0x1495   : > { %3584 = vmatprep.subr.bf16.mxu1 %v3811_v4 }
0x1497   : > { %3569 = vmatmul.mubr.msk.bf16.vlgmr.msra.gmra.mrb[60].mxu0 %vm666_vm3, %v2494_v44 }
0x1498   : > { %3580 = vmatprep.mubr.msk.bf16.mxu0 %vm3812_vm1, %v3811_v4 }
0x149b   : > { %3575 = vmatmul.mubr.msk.bf16.vlgmr.msra.gmra.mrb[68].mxu1 %vm666_vm3, %v2544_v25 }
0x149c   : > { %3586 = vmatprep.mubr.msk.bf16.mxu1 %vm3812_vm1, %v3811_v4 }
0x1562   : > { %v2439_v47 = vpop.f32.mrb[56].mxu0 }
0x1563   : > { %v3558_v49 = vpop.f32.mrb[57].mxu0 }
0x1564   : > { %v2442_v54 = vpop.f32.mrb[58].mxu0 }
0x1565   : > { %v3559_v32 = vpop.f32.mrb[59].mxu0 }
0x1566   : > { %v2487_v56 = vpop.f32.mrb[64].mxu1 }
0x1567   : > { %v3671_v51 = vpack.i.bf16 %v2487_v56, %v2439_v47  ;;  %v3564_v60 = vpop.f32.mrb[65].mxu1 }
0x1568   : > { %v2490_v24 = vpop.f32.mrb[66].mxu1 }
0x1569   : > { %v3565_v33 = vpop.f32.mrb[67].mxu1 }
0x156a   : > { %v2537_v34 = vpop.f32.mrb[60].mxu0 }
0x156b   : > { %v3570_v18 = vpop.f32.mrb[61].mxu0  ;;  %v2593_v6 = vsel %vm666_vm3, %v2537_v34, -inf }
0x156c   : > { %2594 = vmax.xlane.f32.xlu0 %v2593_v6  ;;  %v2540_v7 = vpop.f32.mrb[62].mxu0 }
0x156d   : > { %v3571_v61 = vpop.f32.mrb[63].mxu0 }
0x156e   : > { %v2587_v31 = vpop.f32.mrb[68].mxu1 }
0x156f   : > { %v3576_v62 = vpop.f32.mrb[69].mxu1  ;;  %v2596_v63 = vsel %vm666_vm3, %v2587_v31, -inf }
0x1570   : > { %2597 = vmax.xlane.f32.xlu1 %v2596_v63  ;;  %v2590_v0 = vpop.f32.mrb[70].mxu1 }
0x1571   : > { %v3577_v22 = vpop.f32.mrb[71].mxu1 }
0x1581   : > { %2617 = vrot.lane.b32.xlu1 %v4266_v1, %s3822_s25 }
0x1585   : > { %3667 = vrot.lane.b32.xlu1 %v3666_v59, %s3825_s27 }
0x1589   : > { %3672 = vrot.lane.b32.xlu1 %v3671_v51, %s3826_s18 }
0x15f9   : > { %v2595_v52 = vpop.xlane.xlu0 %2594 }
0x15fa   : > { %v2599_v3 = vsub.f32 %v2537_v34, %v2595_v52 }
0x15fc   : > { %v2601_v5 = vmul.f32 1.442695, %v2599_v3 }
0x15fd   : > { %v2598_v11 = vpop.xlane.xlu1 %2597 }
0x15fe   : > { %3757 = vpow2.f32 %v2601_v5  ;;  %v2600_v12 = vsub.f32 %v2587_v31, %v2598_v11 }
0x1600   : > { %v2603_v14 = vmul.f32 1.442695, %v2600_v12 }
0x1601   : > { %v2618_v15 = vpop.permute.xlu1 %2617 }
0x1602   : > { %3759 = vpow2.f32 %v2603_v14  ;;  %v2623_v42 = vsel %vm792_vm4, %v2618_v15, 0 }
0x1603   : > { %3579 = vmatpush3.bf16.msra.mxu0 %v2623_v42 }
0x1604   : > { %3590 = vmatprep.subr.bf16.mxu0 %v3811_v4 }
0x1605   : > { %v3668_v49 = vpop.permute.xlu1 %3667 }
0x1606   : > { %v3670_v32 = vunpack.i.h.bf16 %v3668_v49  ;;  %v3669_v56 = vunpack.i.l.bf16 %v3668_v49 }
0x1608   : > { %v3758_v1 = vpop.eup %3757  ;;  %v2738_v33 = vsel %vm666_vm3, %v4306_v57, %v3670_v32  ;;  %v2737_v34 = vsel %vm666_vm3, %v4304_v53, %v3669_v56  ;;  %v2751_v53 = vrot.slane %v4260_v21, %v639_v10  ;;  %v3695_v32 = vld [vmem:[%s3942_s14 + $0x10] sm:$0xff]  }
0x1609   : > { %v2605_v50 = vsel %vm666_vm3, %v3758_v1, 0.0  ;;  %v3673_v54 = vpop.permute.xlu1 %3672 }
0x160a   : > { %2606 = vadd.xlane.f32.xlu0 %v2605_v50  ;;  %v3675_v51 = vunpack.i.h.bf16 %v3673_v54  ;;  %v3674_v60 = vunpack.i.l.bf16 %v3673_v54 }
0x160c   : > { %v3760_v8 = vpop.eup %3759  ;;  %v2739_v7 = vsel %vm1573_vm5, %v2737_v34, %v3674_v60  ;;  %v2740_v61 = vsel %vm1573_vm5, %v2738_v33, %v3675_v51 }
0x160d   : > { %v2608_v59 = vsel %vm666_vm3, %v3760_v8, 0.0 }
0x160e   : > { %2609 = vadd.xlane.f32.xlu0 %v2608_v59 }
0x1624   : > { %2665 = vrot.lane.b32.xlu0 %v4268_v2, %s3822_s25 }
0x1697   : > { %v2607_v46 = vpop.xlane.xlu0 %2606 }
0x1698   : > { %3761 = vrcp.f32 %v2607_v46 }
0x169b   : > { %v2610_v16 = vpop.xlane.xlu0 %2609 }
0x169c   : > { %3763 = vrcp.f32 %v2610_v16 }
0x169f   : > { %v2666_v58 = vpop.permute.xlu0 %2665 }
0x16a0   : > { %v2671_v17 = vsel %vm792_vm4, %v2666_v58, 0  ;;  %v3691_v58 = vld [vmem:[%s3937_s29] sm:$0xff]  }
0x16a1   : > { %3585 = vmatpush3.bf16.msra.mxu1 %v2671_v17  ;;  %v3692_v17 = vld [vmem:[%s3937_s29 + $0x8] sm:$0xff]   ;;  %s4526_s29 = scalar_lea.vmem %s4511_s10, %s3907_s23 }
0x16a2   : > { %v3762_v19 = vpop.eup %3761  ;;  %3598 = vmatprep.subr.bf16.mxu1 %v3811_v4  ;;  %v3257_v56 = vld [vmem:[%s4526_s29] ss:$0 sm:$0xff] }
0x16a3   : > { %v2613_v20 = vmul.f32 %v3762_v19, %v3758_v1  ;;  %v3693_v19 = vld [vmem:[%s3942_s14] sm:$0xff]  }
0x16a5   : > { %v2615_v23 = vpack.c.bf16 %v2613_v20, %v2613_v20  ;;  %v3694_v20 = vld [vmem:[%s3942_s14 + $0x8] sm:$0xff]  }
0x16a6   : > { %v3764_v26 = vpop.eup %3763 }
0x16a7   : > { %v2614_v35 = vmul.f32 %v3764_v26, %v3760_v8  ;;  %3581 = vmatmul.mubr.msk.bf16.vlgmr.msra.gmra.mrb[64].mxu0 %vm666_vm3, %v2615_v23 }
0x16a8   : > { %3594 = vmatprep.mubr.msk.bf16.mxu0 %vm3812_vm1, %v3811_v4  ;;  %3591 = vmatpush3.bf16.msra.mxu0 %v3689_v36 }
0x16a9   : > { %v2616_v2 = vpack.c.bf16 %v2614_v35, %v2614_v35  ;;  %3592 = vmatprep.subr.bf16.mxu0 %v3811_v4 }
0x16ab   : > { %3587 = vmatmul.mubr.msk.bf16.vlgmr.msra.gmra.mrb[72].mxu1 %vm666_vm3, %v2616_v2 }
0x16ac   : > { %3602 = vmatprep.mubr.msk.bf16.mxu1 %vm3812_vm1, %v3811_v4  ;;  %3593 = vmatpush3.bf16.msra.mxu0 %v3690_v37 }
0x16ad   : > { %3606 = vmatprep.subr.bf16.mxu0 %v3811_v4  ;;  %3599 = vmatpush3.bf16.msra.mxu1 %v3691_v58  ;;  %v3031_v58 = vrot.slane %v4260_v21, %v1681_v30 }
0x16ae   : > { %3600 = vmatprep.subr.bf16.mxu1 %v3811_v4 }
0x16b1   : > { %3601 = vmatpush3.bf16.msra.mxu1 %v3692_v17 }
0x177a   : > { %v2659_v38 = vpop.f32.mrb[64].mxu0 }
0x177b   : > { %v3582_v39 = vpop.f32.mrb[65].mxu0 }
0x177c   : > { %v2662_v40 = vpop.f32.mrb[66].mxu0 }
0x177d   : > { %v3583_v55 = vpop.f32.mrb[67].mxu0 }
0x177e   : > { %v2707_v41 = vpop.f32.mrb[72].mxu1 }
0x177f   : > { %v3676_v43 = vpack.i.bf16 %v2707_v41, %v2659_v38  ;;  %v3588_v44 = vpop.f32.mrb[73].mxu1  ;;  %v2839_v38 = vrot.slane %v4260_v21, %v649_v45  ;;  %v2845_v41 = vrot.slane %v4260_v21, %v1586_v29  ;;  %v3696_v45 = vld [vmem:[%s3942_s14 + $0x18] sm:$0xff]  }
0x1780   : > { %v2710_v25 = vpop.f32.mrb[74].mxu1 }
0x1781   : > { %3677 = vrot.lane.b32.xlu0 %v3676_v43, %s4525_s16  ;;  %v3589_v47 = vpop.f32.mrb[75].mxu1 }
0x17f3   : > { %v3678_v24 = vpop.permute.xlu0 %3677 }
0x17f4   : > { %v3680_v18 = vunpack.i.h.bf16 %v3678_v24  ;;  %v3679_v6 = vunpack.i.l.bf16 %v3678_v24 }
0x17f6   : > { %v2742_v31 = vsel %vm1576_vm6, %v2740_v61, %v3680_v18  ;;  %v2741_v62 = vsel %vm1576_vm6, %v2739_v7, %v3679_v6 }
0x17f7   : > { %v2743_v63 = vpack.c.bf16 %v2742_v31, %v2741_v62 }
0x17f9   : > { %3595 = vmatmul.mubr.msk.bf16.vlgmr.msra.gmra.mrb[68].mxu0 %vm586_vm2, %v2743_v63 }
0x17fa   : > { %3614 = vmatprep.mubr.msk.bf16.mxu0 %vm3812_vm1, %v3811_v4  ;;  %3607 = vmatpush3.bf16.msra.mxu0 %v3693_v19  ;;  %v3037_v19 = vrot.slane %v4260_v21, %v1692_v48 }
0x17fb   : > { %3608 = vmatprep.subr.bf16.mxu0 %v3811_v4 }
0x17fe   : > { %3609 = vmatpush3.bf16.msra.mxu0 %v3694_v20 }
0x17ff   : > { %3610 = vmatprep.subr.bf16.mxu0 %v3811_v4 }
0x1802   : > { %3611 = vmatpush3.bf16.msra.mxu0 %v3695_v32 }
0x1803   : > { %3612 = vmatprep.subr.bf16.mxu0 %v3811_v4  ;;  %v2930_v4 = vrot.slane %v4260_v21, %v1675_v13 }
0x1806   : > { %3613 = vmatpush3.bf16.msra.mxu0 %v3696_v45 }
0x18cc   : > { %v2801_v57 = vpop.f32.mrb[68].mxu0 }
0x18cd   : > { %v2802_v0 = vadd.f32 %v2801_v57, %v2751_v53  ;;  %v3596_v22 = vpop.f32.mrb[69].mxu0 }
0x18ce   : > { %v2804_v52 = vpop.f32.mrb[70].mxu0 }
0x18cf   : > { %v2805_v3 = vadd.f32 %v2804_v52, %v2751_v53  ;;  %v3597_v5 = vpop.f32.mrb[71].mxu0  ;;  %v2808_v11 = vadd.f32 %v2802_v0, %v4220_v27 }
0x18d1   : > { %v2810_v12 = vsel %vm586_vm2, %v2808_v11, 0.0  ;;  %v2809_v14 = vadd.f32 %v2805_v3, %v4222_v28 }
0x18d2   : > { %2811 = vadd.xlane.f32.xlu1 %v2810_v12 }
0x18d3   : > { %v2813_v15 = vsel %vm586_vm2, %v2809_v14, 0.0 }
0x18d4   : > { %2814 = vadd.xlane.f32.xlu0 %v2813_v15 }
0x195f   : > { %v2812_v42 = vpop.xlane.xlu1 %2811 }
0x1960   : > { %v2816_v10 = vmul.f32 0.03125, %v2812_v42 }
0x1961   : > { %v2815_v1 = vpop.xlane.xlu0 %2814 }
0x1962   : > { %v2818_v50 = vsub.f32 %v2808_v11, %v2816_v10  ;;  %v2817_v8 = vmul.f32 0.03125, %v2815_v1 }
0x1964   : > { %v2819_v59 = vsub.f32 %v2809_v14, %v2817_v8  ;;  %v2820_v46 = vmul.f32 %v2818_v50, %v2818_v50 }
0x1966   : > { %v2822_v27 = vsel %vm586_vm2, %v2820_v46, 0.0  ;;  %v2821_v16 = vmul.f32 %v2819_v59, %v2819_v59 }
0x1967   : > { %2823 = vadd.xlane.f32.xlu0 %v2822_v27 }
0x1968   : > { %v2825_v28 = vsel %vm586_vm2, %v2821_v16, 0.0 }
0x1969   : > { %2826 = vadd.xlane.f32.xlu1 %v2825_v28 }
0x19f4   : > { %v2824_v23 = vpop.xlane.xlu0 %2823 }
0x19f5   : > { %v2828_v26 = vmul.f32 0.03125, %v2824_v23 }
0x19f6   : > { %v2827_v35 = vpop.xlane.xlu1 %2826 }
0x19f7   : > { %v2830_v2 = vadd.f32 1e-05, %v2828_v26  ;;  %v2829_v36 = vmul.f32 0.03125, %v2827_v35 }
0x19f9   : > { %3765 = vrsqrt.f32 %v2830_v2  ;;  %v2831_v37 = vadd.f32 1e-05, %v2829_v36 }
0x19fb   : > { %3767 = vrsqrt.f32 %v2831_v37 }
0x1a03   : > { %v3766_v39 = vpop.eup %3765 }
0x1a04   : > { %v2834_v40 = vmul.f32 %v3766_v39, %v2818_v50 }
0x1a05   : > { %v3768_v55 = vpop.eup %3767 }
0x1a06   : > { %v2840_v43 = vmul.f32 %v2839_v38, %v2834_v40  ;;  %v2835_v44 = vmul.f32 %v3768_v55, %v2819_v59 }
0x1a08   : > { %v2841_v25 = vmul.f32 %v2839_v38, %v2835_v44  ;;  %v2846_v47 = vadd.f32 %v2845_v41, %v2840_v43 }
0x1a0a   : > { %v2847_v49 = vadd.f32 %v2845_v41, %v2841_v25 }
0x1a0c   : > { %v2848_v54 = vpack.c.bf16 %v2847_v49, %v2846_v47 }
0x1a0e   : > { %3603 = vmatmul.mubr.msk.bf16.vlgmr.msra.gmra.mrb[76].mxu1 %vm586_vm2, %v2848_v54 }
0x1ae1   : > { %v2909_v29 = vpop.f32.mrb[76].mxu1 }
0x1ae2   : > { %v2910_v51 = vadd.f32 %v3257_v56, %v2909_v29  ;;  %v3604_v60 = vpop.f32.mrb[77].mxu1 }
0x1ae3   : > { %v2912_v24 = vpop.f32.mrb[78].mxu1 }
0x1ae4   : > { %v2913_v33 = vadd.f32 %v3257_v56, %v2912_v24  ;;  %v3605_v34 = vpop.f32.mrb[79].mxu1  ;;  %v2916_v18 = vmax.f32 %v2910_v51, 0.0 }
0x1ae6   : > { %v2917_v6 = vmax.f32 %v2913_v33, 0.0 }
0x1ae8   : > { %v2918_v7 = vpack.c.bf16 %v2917_v6, %v2916_v18 }
0x1aea   : > { %3615 = vmatmul.mubr.msk.bf16.vlgmr.msra.gmra.mrb[72].mxu0 %vm2955_vm7, %v2918_v7 }
0x1bbd   : > { %v2993_v61 = vpop.f32.mrb[72].mxu0 }
0x1bbe   : > { %v2994_v31 = vadd.f32 %v2993_v61, %v2930_v4  ;;  %v3616_v62 = vpop.f32.mrb[73].mxu0 }
0x1bbf   : > { %v2996_v63 = vpop.f32.mrb[74].mxu0 }
0x1bc0   : > { %v2997_v53 = vadd.f32 %v2996_v63, %v2930_v4  ;;  %v3617_v57 = vpop.f32.mrb[75].mxu0  ;;  %v3000_v0 = vadd.f32 %v2994_v31, %v2846_v47 }
0x1bc2   : > { %v3002_v22 = vsel %vm586_vm2, %v3000_v0, 0.0  ;;  %v3001_v52 = vadd.f32 %v2997_v53, %v2847_v49 }
0x1bc3   : > { %3003 = vadd.xlane.f32.xlu0 %v3002_v22 }
0x1bc4   : > { %v3005_v3 = vsel %vm586_vm2, %v3001_v52, 0.0 }
0x1bc5   : > { %3006 = vadd.xlane.f32.xlu1 %v3005_v3 }
0x1c50   : > { %v3004_v5 = vpop.xlane.xlu0 %3003 }
0x1c51   : > { %v3008_v11 = vmul.f32 0.03125, %v3004_v5 }
0x1c52   : > { %v3007_v12 = vpop.xlane.xlu1 %3006 }
0x1c53   : > { %v3010_v14 = vsub.f32 %v3000_v0, %v3008_v11  ;;  %v3009_v15 = vmul.f32 0.03125, %v3007_v12 }
0x1c55   : > { %v3011_v13 = vsub.f32 %v3001_v52, %v3009_v15  ;;  %v3012_v42 = vmul.f32 %v3010_v14, %v3010_v14 }
0x1c57   : > { %v3014_v10 = vsel %vm586_vm2, %v3012_v42, 0.0  ;;  %v3013_v1 = vmul.f32 %v3011_v13, %v3011_v13 }
0x1c58   : > { %3015 = vadd.xlane.f32.xlu0 %v3014_v10 }
0x1c59   : > { %v3017_v50 = vsel %vm586_vm2, %v3013_v1, 0.0 }
0x1c5a   : > { %3018 = vadd.xlane.f32.xlu1 %v3017_v50 }
0x1ce5   : > { %v3016_v8 = vpop.xlane.xlu0 %3015 }
0x1ce6   : > { %v3020_v59 = vmul.f32 0.03125, %v3016_v8 }
0x1ce7   : > { %v3019_v46 = vpop.xlane.xlu1 %3018 }
0x1ce8   : > { %v3022_v27 = vadd.f32 1e-05, %v3020_v59  ;;  %v3021_v16 = vmul.f32 0.03125, %v3019_v46 }
0x1cea   : > { %3769 = vrsqrt.f32 %v3022_v27  ;;  %v3023_v28 = vadd.f32 1e-05, %v3021_v16 }
0x1cec   : > { %3771 = vrsqrt.f32 %v3023_v28 }
0x1cf4   : > { %v3770_v17 = vpop.eup %3769 }
0x1cf5   : > { %v3026_v20 = vmul.f32 %v3770_v17, %v3010_v14 }
0x1cf6   : > { %v3772_v23 = vpop.eup %3771 }
0x1cf7   : > { %v3032_v26 = vmul.f32 %v3031_v58, %v3026_v20  ;;  %v3027_v35 = vmul.f32 %v3772_v23, %v3011_v13  ;;  %3045 = sbr.rel (%p3266_p5) target bundleno = 7422 (0x1cfe), region = 76 }
0x1cf9   : > { %v3038_v2 = vadd.f32 %v3037_v19, %v3032_v26  ;;  %v3033_v36 = vmul.f32 %v3031_v58, %v3027_v35 }
0x1cfb   : > { %3040 = vst.msk [vmem:[#allocation2] sm:$0xff] %vm586_vm2, %v3038_v2  ;;  %v3039_v37 = vadd.f32 %v3037_v19, %v3033_v36  ;;  %3046 = vst.msk [vmem:[#allocation3] sm:$0xff] (!%p3266_p5), %vm586_vm2, %v3038_v2 }
0x1cfd   : > { %3041 = vst.msk [vmem:[#allocation2 + $0x8] sm:$0xff] %vm586_vm2, %v3039_v37  ;;  %3047 = vst.msk [vmem:[#allocation3 + $0x8] sm:$0xff] (!%p3266_p5), %vm586_vm2, %v3039_v37 }
0x1cfe PF: > { %p3622_p6 = scmp.eq.s32.totalorder %s3901_s22, 1  ;;  %s3828_s23 = smov [#allocation3]  }
0x1cff   : > { %s3054_s14 = sshll.u32 %s3828_s23, 4  ;;  %s3055_s14 = int_to_ptr.vmem [resolvable:$true] %s3054_s14 }
0x1d00   : > { %s3773_s17 = scalar_lea.vmem %s3055_s14, 256  ;;  %p3780_p10 = scmp.lt.s32.totalorder %s3055_s14, %s3055_s14 }
0x1d01   : > { %p3774_p7 = scmp.ne.s32.totalorder %s3055_s14, %s3773_s17  ;;  %p3781_p11 = scmp.lt.s32.totalorder %s3773_s17, %s3773_s17 }
0x1d03   : > { %p3775_p8 = pnand %p3774_p7, %p3622_p6  ;;  %p3782_p12 = por %p3781_p11, %p3780_p10 }
0x1d05   : > { %p3776_p9 = pneg %p3775_p8 }
0x1d07   : > { %p3783_p13 = pnand %p3782_p12, %p3776_p9 }
0x1d09   : > { %3786 = shalt.err (!%p3783_p13)
}
0x1d0a   : > { %s3787_s6 = scalar_lea.hbm %s4513_s12, 256 }
0x1d0b   : > { %p3788_p0 = scmp.ne.s32.totalorder %s4513_s12, %s3787_s6  ;;  %p3793_p3 = scmp.lt.u32.totalorder %s3787_s6, %s4513_s12 }
0x1d0d   : > { %p3789_p1 = pnand %p3788_p0, %p3622_p6 }
0x1d0f   : > { %p3790_p2 = pneg %p3789_p1 }
0x1d11   : > { %p3795_p4 = pnand %p3793_p3, %p3790_p2 }
0x1d13   : > { %3798 = shalt.err (!%p3795_p4)
}
0x1d14   : > { %s3829_s25 = smov 128  }
0x1d15   : > { %3619 = dma.vmem_to_hbm [thread:$0]  (%p3622_p6), %s3055_s14, 256, %s4513_s12, [#allocation4], %s3829_s25, %s3829_s25, %s3825_s27  }
0x1d16   : > { %3804 = dma.done.wait (%p3622_p6), [#allocation4], 256  }
0x1d17   : > { %3806 = vsyncadd (%p3622_p6), [#allocation4], 4294967040 }
0x1d18 PF: > { %s4527_s4 = sld [smem:[#allocation6_spill]] }
0x1d1e   : > { %s23_s21 = sadd.s32 1, %s4527_s4  }
0x1d1f   : > { %p20_p5 = scmp.ge.s32.totalorder %s23_s21, 4  }
0x1d21   :  { %22 = sbr.rel (!%p20_p5) target bundleno = 6 (0x6), region = 127 }
0x1d28   :  { %3070 = vsyncpa [#allocation4], 1 }
0x1d29   :  { %3072 = vsyncpa [#allocation4 + $0x1], 1 }

</bundles_post_ra>
